<compile_context>
chip_gen: v6e
topology: v6e:2x2x1
jax: 0.10.0
libtpu: 0.0.40
codegen_flags: <defaults>
</compile_context>

<pallas_src>
import functools

import jax
import jax.numpy as jnp
from jax.experimental import pallas as pl
from jax.experimental.pallas import tpu as pltpu


_LANE = 128
_SUBLANE = 8


def _round_up(x, m):
    return (x + m - 1) // m * m


def _vmem_limit_bytes():
    # Generation-aware VMEM budget (v5e/v6e: 128 MiB, v7x: 64 MiB per core).
    try:
        cap = int(pltpu.get_tpu_info().vmem_capacity_bytes)
    except Exception:
        cap = 64 * 1024 * 1024          # conservative (v7x-safe) fallback
    return min(cap * 3 // 4, 96 * 1024 * 1024)


_VMEM_LIMIT = _vmem_limit_bytes()
_VMEM_BUDGET = int(_VMEM_LIMIT * 0.8)   # working-set budget for tile planning


# ----------------------------------------------------------------------------
# Kernel 1: tiled im2col matmul (bf16 -> f32 acc) + per-tile channel stats.
# grid = (num_m_tiles, num_k_tiles); M axis parallel, K axis arbitrary.
# ----------------------------------------------------------------------------
def _matmul_stats_kernel(p_ref, w_ref, y_ref, sum_ref, ssq_ref, acc_ref):
    k = pl.program_id(1)

    @pl.when(k == 0)
    def _():
        acc_ref[...] = jnp.zeros_like(acc_ref)

    acc_ref[...] += jnp.dot(p_ref[...], w_ref[...],
                            preferred_element_type=jnp.float32)

    @pl.when(k == pl.num_programs(1) - 1)
    def _():
        y = acc_ref[...]
        y_ref[...] = y.astype(y_ref.dtype)
        # Per-M-tile partial stats (broadcast over 8 sublanes for an aligned
        # (8, C_pad) block); reduced across tiles in tiny JAX glue.
        sum_ref[...] = jnp.broadcast_to(
            jnp.sum(y, axis=0, keepdims=True), sum_ref.shape)
        ssq_ref[...] = jnp.broadcast_to(
            jnp.sum(y * y, axis=0, keepdims=True), ssq_ref.shape)


# ----------------------------------------------------------------------------
# Kernel 2: stride-1 3x3 conv straight from the flattened padded activation.
# Each grid step sees its tile + the next tile; the 9 taps are static slices
# of that band at constant flat offsets.  No im2col in HBM.
# ----------------------------------------------------------------------------
def _tap_conv_stats_kernel(cur_ref, nxt_ref, mask_ref, w_ref,
                           y_ref, sum_ref, ssq_ref, *, offsets):
    tm = cur_ref.shape[0]
    band = jnp.concatenate([cur_ref[...], nxt_ref[...]], axis=0)   # (2*tm, Cin)
    acc = jnp.zeros(y_ref.shape, jnp.float32)
    for t, off in enumerate(offsets):            # static 9-tap unroll
        tap = band[off:off + tm, :]
        acc = acc + jnp.dot(tap, w_ref[t], preferred_element_type=jnp.float32)
    y = acc * mask_ref[...]                      # zero the non-output rows
    y_ref[...] = y.astype(y_ref.dtype)
    sum_ref[...] = jnp.broadcast_to(
        jnp.sum(y, axis=0, keepdims=True), sum_ref.shape)
    ssq_ref[...] = jnp.broadcast_to(
        jnp.sum(y * y, axis=0, keepdims=True), ssq_ref.shape)


# ----------------------------------------------------------------------------
# Kernel 3: y * scale + shift (final BN2 apply only), fully parallel.
# ----------------------------------------------------------------------------
def _bn_apply_kernel(y_ref, scale_ref, shift_ref, o_ref):
    y = y_ref[...].astype(jnp.float32)
    o_ref[...] = (y * scale_ref[...] + shift_ref[...]).astype(o_ref.dtype)


# ----------------------------------------------------------------------------
# Tile planning (footprint counts double-buffered inputs/outputs/weights and
# in-kernel f32 temporaries).
# ----------------------------------------------------------------------------
def _m_candidates(m_rows, start):
    cap_m = _round_up(m_rows, _SUBLANE)
    cands = []
    for c in start:
        c = min(c, cap_m)
        if c not in cands:
            cands.append(c)
    return cands


def _plan_matmul_tiles(m_rows, k_pad, c_pad, budget):
    m_cands = _m_candidates(m_rows, (2048, 1024, 512, 256, 128, 64, 32, 16, 8))
    k_cands = [k_pad] + [t for t in (4096, 2048, 1024, 512, 256, 128) if t < k_pad]

    def footprint(tm, tk):
        return (2 * tm * tk * 2            # patch tile, double-buffered, bf16
                + 2 * tk * c_pad * 2       # weight tile, double-buffered, bf16
                + 2 * tm * c_pad * 2       # y out tile, double-buffered, bf16
                + 4 * 8 * c_pad * 4        # stats outs, double-buffered
                + tm * c_pad * 4           # f32 acc scratch
                + 2 * tm * c_pad * 4)      # in-kernel f32 temps (y, y*y)

    for tm in m_cands:                     # prefer big M tiles, tile K instead
        for tk in k_cands:
            if footprint(tm, tk) <= budget:
                return tm, tk
    return m_cands[-1], k_cands[-1]


def _plan_tap_tile(m_rows, cin_pad, cout_pad, n_taps, max_off, budget):
    def footprint(tm):
        return (2 * 2 * tm * cin_pad * 2           # cur + next tiles, dbl-buf
                + 2 * tm * 4                       # mask column
                + 2 * n_taps * cin_pad * cout_pad * 2   # weights, dbl-buf
                + 2 * tm * cout_pad * 2            # y out, dbl-buf, bf16
                + 4 * 8 * cout_pad * 4             # stats outs
                + 2 * tm * cin_pad * 2             # band concat temp
                + tm * cin_pad * 2                 # tap slice temp
                + 3 * tm * cout_pad * 4)           # acc + y + y*y f32 temps

    for tm in _m_candidates(m_rows, (4096, 2048, 1024, 512, 256, 128, 64, 32, 16, 8)):
        if tm > max_off and footprint(tm) <= budget:
            return tm
    return None                                    # caller falls back to im2col


def _plan_apply_tile(rows, c_pad, budget):
    for tm in _m_candidates(rows, (4096, 2048, 1024, 512, 256, 128, 64, 32, 16, 8)):
        if (2 * tm * c_pad * 2 + 2 * tm * c_pad * 4 + tm * c_pad * 4) <= budget:
            return tm
    return _SUBLANE


# ----------------------------------------------------------------------------
# Pallas call wrappers
# ----------------------------------------------------------------------------
def _conv_matmul_stats(patches, w2d, cout):
    """(M, K) patches @ (K, Cout) weights -> bf16 y (M_pad, C_pad) + stats."""
    M, K = patches.shape
    c_pad = _round_up(cout, _LANE)
    k_pad = _round_up(K, _LANE)
    tile_m, tile_k = _plan_matmul_tiles(M, k_pad, c_pad, _VMEM_BUDGET)
    nk = pl.cdiv(k_pad, tile_k)
    k_tot = nk * tile_k
    nt = pl.cdiv(M, tile_m)
    m_pad = nt * tile_m

    p = jnp.pad(patches.astype(jnp.bfloat16), ((0, m_pad - M), (0, k_tot - K)))
    w = jnp.pad(w2d.astype(jnp.bfloat16), ((0, k_tot - K), (0, c_pad - cout)))

    flops = 2 * m_pad * k_tot * c_pad
    bytes_accessed = (m_pad * k_tot * 2 + nt * k_tot * c_pad * 2
                      + m_pad * c_pad * 2 + 2 * nt * 8 * c_pad * 4)

    y_pad, psum, pssq = pl.pallas_call(
        _matmul_stats_kernel,
        out_shape=(
            jax.ShapeDtypeStruct((m_pad, c_pad), jnp.bfloat16),
            jax.ShapeDtypeStruct((nt * 8, c_pad), jnp.float32),
            jax.ShapeDtypeStruct((nt * 8, c_pad), jnp.float32),
        ),
        grid=(nt, nk),
        in_specs=[
            pl.BlockSpec((tile_m, tile_k), lambda i, k: (i, k)),
            pl.BlockSpec((tile_k, c_pad), lambda i, k: (k, 0)),
        ],
        out_specs=(
            pl.BlockSpec((tile_m, c_pad), lambda i, k: (i, 0)),
            pl.BlockSpec((8, c_pad), lambda i, k: (i, 0)),
            pl.BlockSpec((8, c_pad), lambda i, k: (i, 0)),
        ),
        scratch_shapes=[pltpu.VMEM((tile_m, c_pad), jnp.float32)],
        compiler_params=pltpu.CompilerParams(
            dimension_semantics=("parallel", "arbitrary"),
            vmem_limit_bytes=_VMEM_LIMIT),
        cost_estimate=pl.CostEstimate(flops=flops, transcendentals=0,
                                      bytes_accessed=bytes_accessed),
    )(p, w)
    return y_pad, psum, pssq


def _conv2_tap_stats(a_nhwc, w_taps, dilation):
    """3x3 / stride-1 / pad=dilation conv on NHWC bf16 activation, no HBM im2col.

    Outputs are laid out on the (N, H+2d, W+2d) padded row grid; rows that are
    not real conv outputs are masked to zero.  Returns None if the halo does
    not fit the planned M tile (caller falls back to im2col)."""
    N, H, W, C = a_nhwc.shape
    d = dilation
    HA, WA = H + 2 * d, W + 2 * d
    n_taps = w_taps.shape[0]
    cout = w_taps.shape[-1]
    cin_pad = _round_up(C, _LANE)
    cout_pad = _round_up(cout, _LANE)
    rows = N * HA * WA
    max_off = 2 * d * WA + 2 * d          # largest tap offset into the band

    tile_m = _plan_tap_tile(rows, cin_pad, cout_pad, n_taps, max_off, _VMEM_BUDGET)
    if tile_m is None:
        return None

    nt = pl.cdiv(rows, tile_m)
    rows_pad = nt * tile_m

    # Flattened, spatially padded activation; +1 extra M tile of zero rows so
    # the "next tile" BlockSpec of the last grid step stays in bounds.
    a_p = jnp.pad(a_nhwc.astype(jnp.bfloat16), ((0, 0), (d, d), (d, d), (0, 0)))
    flat = a_p.reshape(rows, C)
    flat = jnp.pad(flat, ((0, rows_pad + tile_m - rows), (0, cin_pad - C)))

    # Row-validity mask (1 where (u, v) is a real output coordinate).
    valid2d = (jnp.arange(HA)[:, None] < H) & (jnp.arange(WA)[None, :] < W)
    mask = jnp.broadcast_to(valid2d[None], (N, HA, WA)).reshape(rows, 1)
    mask = jnp.pad(mask.astype(jnp.float32), ((0, rows_pad - rows), (0, 0)))

    w_p = jnp.pad(w_taps.astype(jnp.bfloat16),
                  ((0, 0), (0, cin_pad - C), (0, cout_pad - cout)))

    offsets = tuple(ky * d * WA + kx * d for ky in range(3) for kx in range(3))

    flops = 2 * rows_pad * n_taps * cin_pad * cout_pad
    bytes_accessed = (2 * rows_pad * cin_pad * 2 + rows_pad * 4
                      + nt * n_taps * cin_pad * cout_pad * 2
                      + rows_pad * cout_pad * 2 + 2 * nt * 8 * cout_pad * 4)

    y_pad, psum, pssq = pl.pallas_call(
        functools.partial(_tap_conv_stats_kernel, offsets=offsets),
        out_shape=(
            jax.ShapeDtypeStruct((rows_pad, cout_pad), jnp.bfloat16),
            jax.ShapeDtypeStruct((nt * 8, cout_pad), jnp.float32),
            jax.ShapeDtypeStruct((nt * 8, cout_pad), jnp.float32),
        ),
        grid=(nt,),
        in_specs=[
            pl.BlockSpec((tile_m, cin_pad), lambda i: (i, 0)),
            pl.BlockSpec((tile_m, cin_pad), lambda i: (i + 1, 0)),
            pl.BlockSpec((tile_m, 1), lambda i: (i, 0)),
            pl.BlockSpec((n_taps, cin_pad, cout_pad), lambda i: (0, 0, 0)),
        ],
        out_specs=(
            pl.BlockSpec((tile_m, cout_pad), lambda i: (i, 0)),
            pl.BlockSpec((8, cout_pad), lambda i: (i, 0)),
            pl.BlockSpec((8, cout_pad), lambda i: (i, 0)),
        ),
        compiler_params=pltpu.CompilerParams(
            dimension_semantics=("parallel",),
            vmem_limit_bytes=_VMEM_LIMIT),
        cost_estimate=pl.CostEstimate(flops=flops, transcendentals=0,
                                      bytes_accessed=bytes_accessed),
    )(flat, flat, mask, w_p)
    return y_pad, psum, pssq, (HA, WA)


def _bn_apply(y_pad, scale, shift):
    rows, c_pad = y_pad.shape
    tile_m = _plan_apply_tile(rows, c_pad, _VMEM_BUDGET)
    nt = pl.cdiv(rows, tile_m)
    rows2 = nt * tile_m
    if rows2 != rows:
        y_pad = jnp.pad(y_pad, ((0, rows2 - rows), (0, 0)))
    out = pl.pallas_call(
        _bn_apply_kernel,
        out_shape=jax.ShapeDtypeStruct((rows2, c_pad), jnp.float32),
        grid=(nt,),
        in_specs=[
            pl.BlockSpec((tile_m, c_pad), lambda i: (i, 0)),
            pl.BlockSpec((1, c_pad), lambda i: (0, 0)),
            pl.BlockSpec((1, c_pad), lambda i: (0, 0)),
        ],
        out_specs=pl.BlockSpec((tile_m, c_pad), lambda i: (i, 0)),
        compiler_params=pltpu.CompilerParams(
            dimension_semantics=("parallel",),
            vmem_limit_bytes=_VMEM_LIMIT),
        cost_estimate=pl.CostEstimate(
            flops=2 * rows2 * c_pad, transcendentals=0,
            bytes_accessed=rows2 * c_pad * 6 + 2 * c_pad * 4),
    )(y_pad, scale, shift)
    return out[:rows]


# ----------------------------------------------------------------------------
# Small JAX glue: im2col (conv1 only), weight re-layouts, BN folding.
# ----------------------------------------------------------------------------
def _im2col(x_nhwc, ksize, stride, dilation, pad):
    N, H, W, C = x_nhwc.shape
    xp = jnp.pad(x_nhwc, ((0, 0), (pad, pad), (pad, pad), (0, 0)))
    Ho = (H + 2 * pad - dilation * (ksize - 1) - 1) // stride + 1
    Wo = (W + 2 * pad - dilation * (ksize - 1) - 1) // stride + 1
    cols = []
    for ky in range(ksize):
        for kx in range(ksize):
            cols.append(xp[
                :,
                ky * dilation: ky * dilation + (Ho - 1) * stride + 1: stride,
                kx * dilation: kx * dilation + (Wo - 1) * stride + 1: stride,
                :,
            ])
    patches = jnp.stack(cols, axis=3).reshape(N * Ho * Wo, ksize * ksize * C)
    return patches, (N, Ho, Wo)


def _weight_to_2d(w):
    cout, cin, kh, kw = w.shape
    return jnp.transpose(w, (2, 3, 1, 0)).reshape(kh * kw * cin, cout)


def _weight_to_taps(w):
    cout, cin, kh, kw = w.shape
    return jnp.transpose(w, (2, 3, 1, 0)).reshape(kh * kw, cin, cout)


def _fold_bn(psum, pssq, count, gamma, beta, c_pad, eps):
    s = psum.reshape(-1, 8, c_pad)[:, 0, :].sum(axis=0)
    q = pssq.reshape(-1, 8, c_pad)[:, 0, :].sum(axis=0)
    mean = s / count
    var = jnp.maximum(q / count - mean * mean, 0.0)
    inv_std = jax.lax.rsqrt(var + eps)
    g = jnp.pad(gamma, (0, c_pad - gamma.shape[0]))
    b = jnp.pad(beta, (0, c_pad - beta.shape[0]))
    scale = (g * inv_std).astype(jnp.float32)
    shift = (b - mean * scale).astype(jnp.float32)
    return scale.reshape(1, c_pad), shift.reshape(1, c_pad)


# ----------------------------------------------------------------------------
# EncoderPath forward (training-mode BatchNorm, batch statistics)
# ----------------------------------------------------------------------------
def encoder_path(x_nchw, w1, g1, b1, w2, g2, b2, *, dilation, eps=1e-5):
    d = dilation
    x = jnp.transpose(x_nchw, (0, 2, 3, 1))          # NCHW -> NHWC
    N = x.shape[0]
    cout = w1.shape[0]
    c_pad = _round_up(cout, _LANE)

    # conv1 (3x3 / stride 2 / pad=d / dil=d) + per-channel batch stats.
    p1, (_, ho1, wo1) = _im2col(x, 3, stride=2, dilation=d, pad=d)
    m1 = N * ho1 * wo1
    y1_pad, ps1, pq1 = _conv_matmul_stats(p1, _weight_to_2d(w1), cout)
    scale1, shift1 = _fold_bn(ps1, pq1, m1, g1, b1, c_pad, eps)

    # BN1 + ReLU are applied in the XLA glue that re-layouts / pads y1 for
    # conv2 (pad AFTER normalize keeps the zero-padding semantics); conv1
    # therefore needs no separate Pallas normalization pass.
    y1 = y1_pad[:m1, :cout].astype(jnp.float32).reshape(N, ho1, wo1, cout)
    a1 = jnp.maximum(y1 * scale1[0, :cout] + shift1[0, :cout], 0.0)
    a1 = a1.astype(jnp.bfloat16)

    # conv2 (3x3 / stride 1 / pad=d / dil=d) without an HBM im2col.
    m2 = N * ho1 * wo1                                # stride 1 -> same spatial
    tap = _conv2_tap_stats(a1, _weight_to_taps(w2), d)
    if tap is not None:
        y2_pad, ps2, pq2, (hg, wg) = tap
    else:
        # Halo did not fit the planned M tile: im2col fallback (K-tiled kernel).
        p2, _ = _im2col(a1, 3, stride=1, dilation=d, pad=d)
        y2_pad, ps2, pq2 = _conv_matmul_stats(p2, _weight_to_2d(w2), cout)
        hg, wg = ho1, wo1
    scale2, shift2 = _fold_bn(ps2, pq2, m2, g2, b2, c_pad, eps)

    # Final BN2 apply (no ReLU) -> f32 module output.
    out_pad = _bn_apply(y2_pad, scale2, shift2)
    out = out_pad[:N * hg * wg, :cout].reshape(N, hg, wg, cout)[:, :ho1, :wo1, :]
    return jnp.transpose(out, (0, 3, 1, 2))           # NHWC -> NCHW


# ----------------------------------------------------------------------------
# Pure-JAX reference (f32) for a tolerance sanity check.
# ----------------------------------------------------------------------------
def _reference(x, w1, g1, b1, w2, g2, b2, dilation, eps=1e-5):
    def conv(a, w, stride):
        return jax.lax.conv_general_dilated(
            a, jnp.transpose(w, (2, 3, 1, 0)),
            window_strides=(stride, stride),
            padding=[(dilation, dilation), (dilation, dilation)],
            rhs_dilation=(dilation, dilation),
            dimension_numbers=("NHWC", "HWIO", "NHWC"))

    def bn(y, g, b):
        mean = y.mean(axis=(0, 1, 2))
        var = ((y - mean) ** 2).mean(axis=(0, 1, 2))
        return (y - mean) * jax.lax.rsqrt(var + eps) * g + b

    xh = jnp.transpose(x, (0, 2, 3, 1))
    a = jax.nn.relu(bn(conv(xh, w1, 2), g1, b1))
    o = bn(conv(a, w2, 1), g2, b2)
    return jnp.transpose(o, (0, 3, 1, 2))


if __name__ == "__main__":
    N, Cin, Cout, H, W, dil = 2, 4, 8, 16, 16, 1

    key = jax.random.PRNGKey(0)
    k1, k2, k3, k4, k5, k6, k7 = jax.random.split(key, 7)

    x = jax.random.normal(k1, (N, Cin, H, W), jnp.float32)
    w1 = 0.1 * jax.random.normal(k2, (Cout, Cin, 3, 3), jnp.float32)
    w2 = 0.1 * jax.random.normal(k3, (Cout, Cout, 3, 3), jnp.float32)
    g1 = 1.0 + 0.1 * jax.random.normal(k4, (Cout,), jnp.float32)
    b1 = 0.1 * jax.random.normal(k5, (Cout,), jnp.float32)
    g2 = 1.0 + 0.1 * jax.random.normal(k6, (Cout,), jnp.float32)
    b2 = 0.1 * jax.random.normal(k7, (Cout,), jnp.float32)

    fwd = jax.jit(functools.partial(encoder_path, dilation=dil))
    out = fwd(x, w1, g1, b1, w2, g2, b2)
    jax.block_until_ready(out)
    assert out.shape == (N, Cout, H // 2, W // 2), out.shape

    ref = _reference(x, w1, g1, b1, w2, g2, b2, dil)
    err = float(jnp.mean(jnp.abs(out - ref)))
    assert err < 0.05, f"mean |err| too large: {err}"

    print("KERNEL_OK")
</pallas_src>

<mosaic_0001>
module attributes {stable_mosaic.version = 11 : i64} {
  func.func @_matmul_stats_kernel(%arg0: i32, %arg1: i32, %arg2: memref<128x128xbf16, #tpu.memory_space<vmem>>, %arg3: memref<128x128xbf16, #tpu.memory_space<vmem>>, %arg4: memref<128x128xbf16, #tpu.memory_space<vmem>>, %arg5: memref<8x128xf32, #tpu.memory_space<vmem>>, %arg6: memref<8x128xf32, #tpu.memory_space<vmem>>, %arg7: memref<128x128xf32, #tpu.memory_space<vmem>>) attributes {dimension_semantics = [#tpu.dimension_semantics<parallel>, #tpu.dimension_semantics<arbitrary>], iteration_bounds = array<i64: 1, 1>, scalar_prefetch = 0 : i64, scratch_operands = 1 : i64, tpu.core_type = #tpu.core_type<tc>, window_params = [{transform_indices = @transform_0, window_bounds = array<i64: 128, 128>}, {transform_indices = @transform_1, window_bounds = array<i64: 128, 128>}, {transform_indices = @transform_2, window_bounds = array<i64: 128, 128>}, {transform_indices = @transform_3, window_bounds = array<i64: 8, 128>}, {transform_indices = @transform_4, window_bounds = array<i64: 8, 128>}]} {
    %c0_i32 = arith.constant 0 : i32
    %0 = arith.cmpi eq, %arg1, %c0_i32 : i32
    %1 = arith.extui %0 : i1 to i32
    %c0_i32_0 = arith.constant 0 : i32
    %2 = arith.cmpi ne, %1, %c0_i32_0 : i32
    scf.if %2 {
      %cst_10 = arith.constant 0.000000e+00 : f32
      %12 = vector.broadcast %cst_10 : f32 to vector<128x128xf32>
      %c0_11 = arith.constant 0 : index
      %c0_12 = arith.constant 0 : index
      %13 = vector.load %arg7[%c0_11, %c0_12] : memref<128x128xf32, #tpu.memory_space<vmem>>, vector<128x128xf32>
      tpu.vector_store %arg7[%c0_11, %c0_12], %12 {strides = array<i32>} : memref<128x128xf32, #tpu.memory_space<vmem>>, vector<128x128xf32>,
    } else {
    }
    %c0 = arith.constant 0 : index
    %c0_1 = arith.constant 0 : index
    %3 = vector.load %arg7[%c0, %c0_1] : memref<128x128xf32, #tpu.memory_space<vmem>>, vector<128x128xf32>
    %c0_2 = arith.constant 0 : index
    %c0_3 = arith.constant 0 : index
    %4 = vector.load %arg2[%c0_2, %c0_3] : memref<128x128xbf16, #tpu.memory_space<vmem>>, vector<128x128xbf16>
    %c0_4 = arith.constant 0 : index
    %c0_5 = arith.constant 0 : index
    %5 = vector.load %arg3[%c0_4, %c0_5] : memref<128x128xbf16, #tpu.memory_space<vmem>>, vector<128x128xbf16>
    %cst = arith.constant dense<0.000000e+00> : vector<128x128xf32>
    %6 = tpu.matmul %4, %5, %cst {dimension_numbers = #tpu.dot_dimension_numbers<[1], [0], [0], [1], [0, 0, 1, 1], [], []>} : vector<128x128xbf16>, vector<128x128xbf16>, vector<128x128xf32> -> vector<128x128xf32>
    %7 = arith.addf %3, %6 : vector<128x128xf32>
    %c0_6 = arith.constant 0 : index
    %c0_7 = arith.constant 0 : index
    %8 = vector.load %arg7[%c0_6, %c0_7] : memref<128x128xf32, #tpu.memory_space<vmem>>, vector<128x128xf32>
    tpu.vector_store %arg7[%c0_6, %c0_7], %7 {strides = array<i32>} : memref<128x128xf32, #tpu.memory_space<vmem>>, vector<128x128xf32>,
    %c0_i32_8 = arith.constant 0 : i32
    %9 = arith.cmpi eq, %arg1, %c0_i32_8 : i32
    %10 = arith.extui %9 : i1 to i32
    %c0_i32_9 = arith.constant 0 : i32
    %11 = arith.cmpi ne, %10, %c0_i32_9 : i32
    scf.if %11 {
      %c0_10 = arith.constant 0 : index
      %c0_11 = arith.constant 0 : index
      %12 = vector.load %arg7[%c0_10, %c0_11] : memref<128x128xf32, #tpu.memory_space<vmem>>, vector<128x128xf32>
      %13 = arith.truncf %12 : vector<128x128xf32> to vector<128x128xbf16>
      %c0_12 = arith.constant 0 : index
      %c0_13 = arith.constant 0 : index
      %14 = vector.load %arg4[%c0_12, %c0_13] : memref<128x128xbf16, #tpu.memory_space<vmem>>, vector<128x128xbf16>
      tpu.vector_store %arg4[%c0_12, %c0_13], %13 {strides = array<i32>} : memref<128x128xbf16, #tpu.memory_space<vmem>>, vector<128x128xbf16>,
      %cst_14 = arith.constant dense<0.000000e+00> : vector<128xf32>
      %15 = vector.multi_reduction <add>, %12, %cst_14 [0] : vector<128x128xf32> to vector<128xf32>
      %16 = vector.shape_cast %15 : vector<128xf32> to vector<1x128xf32>
      %17 = vector.shape_cast %16 : vector<1x128xf32> to vector<1x128xf32>
      %18 = vector.broadcast %17 : vector<1x128xf32> to vector<8x128xf32>
      %c0_15 = arith.constant 0 : index
      %c0_16 = arith.constant 0 : index
      %19 = vector.load %arg5[%c0_15, %c0_16] : memref<8x128xf32, #tpu.memory_space<vmem>>, vector<8x128xf32>
      tpu.vector_store %arg5[%c0_15, %c0_16], %18 {strides = array<i32>} : memref<8x128xf32, #tpu.memory_space<vmem>>, vector<8x128xf32>,
      %20 = arith.mulf %12, %12 : vector<128x128xf32>
      %cst_17 = arith.constant dense<0.000000e+00> : vector<128xf32>
      %21 = vector.multi_reduction <add>, %20, %cst_17 [0] : vector<128x128xf32> to vector<128xf32>
      %22 = vector.shape_cast %21 : vector<128xf32> to vector<1x128xf32>
      %23 = vector.shape_cast %22 : vector<1x128xf32> to vector<1x128xf32>
      %24 = vector.broadcast %23 : vector<1x128xf32> to vector<8x128xf32>
      %c0_18 = arith.constant 0 : index
      %c0_19 = arith.constant 0 : index
      %25 = vector.load %arg6[%c0_18, %c0_19] : memref<8x128xf32, #tpu.memory_space<vmem>>, vector<8x128xf32>
      tpu.vector_store %arg6[%c0_18, %c0_19], %24 {strides = array<i32>} : memref<8x128xf32, #tpu.memory_space<vmem>>, vector<8x128xf32>,
    } else {
    }
    return
  }
  func.func @transform_0(%arg0: i32, %arg1: i32) -> (i32, i32) {
    %c0_i32 = arith.constant 0 : i32
    return %arg0, %arg1 : i32, i32
  }
  func.func @transform_1(%arg0: i32, %arg1: i32) -> (i32, i32) {
    %c0_i32 = arith.constant 0 : i32
    %c0_i32_0 = arith.constant 0 : i32
    return %arg1, %c0_i32 : i32, i32
  }
  func.func @transform_2(%arg0: i32, %arg1: i32) -> (i32, i32) {
    %c0_i32 = arith.constant 0 : i32
    %c0_i32_0 = arith.constant 0 : i32
    return %arg0, %c0_i32 : i32, i32
  }
  func.func @transform_3(%arg0: i32, %arg1: i32) -> (i32, i32) {
    %c0_i32 = arith.constant 0 : i32
    %c0_i32_0 = arith.constant 0 : i32
    return %arg0, %c0_i32 : i32, i32
  }
  func.func @transform_4(%arg0: i32, %arg1: i32) -> (i32, i32) {
    %c0_i32 = arith.constant 0 : i32
    %c0_i32_0 = arith.constant 0 : i32
    return %arg0, %c0_i32 : i32, i32
  }
}

module attributes {stable_mosaic.version = 11 : i64} {
  func.func @_tap_conv_stats_kernel(%arg0: i32, %arg1: memref<200x128xbf16, #tpu.memory_space<vmem>>, %arg2: memref<200x128xbf16, #tpu.memory_space<vmem>>, %arg3: memref<200x1xf32, #tpu.memory_space<vmem>>, %arg4: memref<9x128x128xbf16, #tpu.memory_space<vmem>>, %arg5: memref<200x128xbf16, #tpu.memory_space<vmem>>, %arg6: memref<8x128xf32, #tpu.memory_space<vmem>>, %arg7: memref<8x128xf32, #tpu.memory_space<vmem>>) attributes {dimension_semantics = [#tpu.dimension_semantics<parallel>], iteration_bounds = array<i64: 1>, scalar_prefetch = 0 : i64, scratch_operands = 0 : i64, tpu.core_type = #tpu.core_type<tc>, window_params = [{transform_indices = @transform_0, window_bounds = array<i64: 200, 128>}, {transform_indices = @transform_1, window_bounds = array<i64: 200, 128>}, {transform_indices = @transform_2, window_bounds = array<i64: 200, 1>}, {pipeline_mode = #tpu.pipeline_mode<synchronous>, transform_indices = @transform_3, window_bounds = array<i64: 9, 128, 128>}, {transform_indices = @transform_4, window_bounds = array<i64: 200, 128>}, {transform_indices = @transform_5, window_bounds = array<i64: 8, 128>}, {transform_indices = @transform_6, window_bounds = array<i64: 8, 128>}]} {
    %c0 = arith.constant 0 : index
    %c0_0 = arith.constant 0 : index
    %0 = vector.load %arg1[%c0, %c0_0] : memref<200x128xbf16, #tpu.memory_space<vmem>>, vector<200x128xbf16>
    %c0_1 = arith.constant 0 : index
    %c0_2 = arith.constant 0 : index
    %1 = vector.load %arg2[%c0_1, %c0_2] : memref<200x128xbf16, #tpu.memory_space<vmem>>, vector<200x128xbf16>
    %2 = tpu.concatenate %0, %1 in 0 : vector<200x128xbf16>, vector<200x128xbf16> -> vector<400x128xbf16>
    %cst = arith.constant 0.000000e+00 : f32
    %3 = vector.broadcast %cst : f32 to vector<200x128xf32>
    %4 = vector.extract_strided_slice %2 {offsets = [0, 0], sizes = [200, 128], strides = [1, 1]} : vector<400x128xbf16> to vector<200x128xbf16>
    %c0_3 = arith.constant 0 : index
    %c0_4 = arith.constant 0 : index
    %c0_5 = arith.constant 0 : index
    %5 = vector.load %arg4[%c0_3, %c0_4, %c0_5] : memref<9x128x128xbf16, #tpu.memory_space<vmem>>, vector<1x128x128xbf16>
    %6 = vector.shape_cast %5 : vector<1x128x128xbf16> to vector<128x128xbf16>
    %cst_6 = arith.constant dense<0.000000e+00> : vector<200x128xf32>
    %7 = tpu.matmul %4, %6, %cst_6 {dimension_numbers = #tpu.dot_dimension_numbers<[1], [0], [0], [1], [0, 0, 1, 1], [], []>} : vector<200x128xbf16>, vector<128x128xbf16>, vector<200x128xf32> -> vector<200x128xf32>
    %8 = arith.addf %3, %7 : vector<200x128xf32>
    %9 = vector.extract_strided_slice %2 {offsets = [1, 0], sizes = [200, 128], strides = [1, 1]} : vector<400x128xbf16> to vector<200x128xbf16>
    %c1 = arith.constant 1 : index
    %c0_7 = arith.constant 0 : index
    %c0_8 = arith.constant 0 : index
    %10 = vector.load %arg4[%c1, %c0_7, %c0_8] : memref<9x128x128xbf16, #tpu.memory_space<vmem>>, vector<1x128x128xbf16>
    %11 = vector.shape_cast %10 : vector<1x128x128xbf16> to vector<128x128xbf16>
    %cst_9 = arith.constant dense<0.000000e+00> : vector<200x128xf32>
    %12 = tpu.matmul %9, %11, %cst_9 {dimension_numbers = #tpu.dot_dimension_numbers<[1], [0], [0], [1], [0, 0, 1, 1], [], []>} : vector<200x128xbf16>, vector<128x128xbf16>, vector<200x128xf32> -> vector<200x128xf32>
    %13 = arith.addf %8, %12 : vector<200x128xf32>
    %14 = vector.extract_strided_slice %2 {offsets = [2, 0], sizes = [200, 128], strides = [1, 1]} : vector<400x128xbf16> to vector<200x128xbf16>
    %c2 = arith.constant 2 : index
    %c0_10 = arith.constant 0 : index
    %c0_11 = arith.constant 0 : index
    %15 = vector.load %arg4[%c2, %c0_10, %c0_11] : memref<9x128x128xbf16, #tpu.memory_space<vmem>>, vector<1x128x128xbf16>
    %16 = vector.shape_cast %15 : vector<1x128x128xbf16> to vector<128x128xbf16>
    %cst_12 = arith.constant dense<0.000000e+00> : vector<200x128xf32>
    %17 = tpu.matmul %14, %16, %cst_12 {dimension_numbers = #tpu.dot_dimension_numbers<[1], [0], [0], [1], [0, 0, 1, 1], [], []>} : vector<200x128xbf16>, vector<128x128xbf16>, vector<200x128xf32> -> vector<200x128xf32>
    %18 = arith.addf %13, %17 : vector<200x128xf32>
    %19 = vector.extract_strided_slice %2 {offsets = [10, 0], sizes = [200, 128], strides = [1, 1]} : vector<400x128xbf16> to vector<200x128xbf16>
    %c3 = arith.constant 3 : index
    %c0_13 = arith.constant 0 : index
    %c0_14 = arith.constant 0 : index
    %20 = vector.load %arg4[%c3, %c0_13, %c0_14] : memref<9x128x128xbf16, #tpu.memory_space<vmem>>, vector<1x128x128xbf16>
    %21 = vector.shape_cast %20 : vector<1x128x128xbf16> to vector<128x128xbf16>
    %cst_15 = arith.constant dense<0.000000e+00> : vector<200x128xf32>
    %22 = tpu.matmul %19, %21, %cst_15 {dimension_numbers = #tpu.dot_dimension_numbers<[1], [0], [0], [1], [0, 0, 1, 1], [], []>} : vector<200x128xbf16>, vector<128x128xbf16>, vector<200x128xf32> -> vector<200x128xf32>
    %23 = arith.addf %18, %22 : vector<200x128xf32>
    %24 = vector.extract_strided_slice %2 {offsets = [11, 0], sizes = [200, 128], strides = [1, 1]} : vector<400x128xbf16> to vector<200x128xbf16>
    %c4 = arith.constant 4 : index
    %c0_16 = arith.constant 0 : index
    %c0_17 = arith.constant 0 : index
    %25 = vector.load %arg4[%c4, %c0_16, %c0_17] : memref<9x128x128xbf16, #tpu.memory_space<vmem>>, vector<1x128x128xbf16>
    %26 = vector.shape_cast %25 : vector<1x128x128xbf16> to vector<128x128xbf16>
    %cst_18 = arith.constant dense<0.000000e+00> : vector<200x128xf32>
    %27 = tpu.matmul %24, %26, %cst_18 {dimension_numbers = #tpu.dot_dimension_numbers<[1], [0], [0], [1], [0, 0, 1, 1], [], []>} : vector<200x128xbf16>, vector<128x128xbf16>, vector<200x128xf32> -> vector<200x128xf32>
    %28 = arith.addf %23, %27 : vector<200x128xf32>
    %29 = vector.extract_strided_slice %2 {offsets = [12, 0], sizes = [200, 128], strides = [1, 1]} : vector<400x128xbf16> to vector<200x128xbf16>
    %c5 = arith.constant 5 : index
    %c0_19 = arith.constant 0 : index
    %c0_20 = arith.constant 0 : index
    %30 = vector.load %arg4[%c5, %c0_19, %c0_20] : memref<9x128x128xbf16, #tpu.memory_space<vmem>>, vector<1x128x128xbf16>
    %31 = vector.shape_cast %30 : vector<1x128x128xbf16> to vector<128x128xbf16>
    %cst_21 = arith.constant dense<0.000000e+00> : vector<200x128xf32>
    %32 = tpu.matmul %29, %31, %cst_21 {dimension_numbers = #tpu.dot_dimension_numbers<[1], [0], [0], [1], [0, 0, 1, 1], [], []>} : vector<200x128xbf16>, vector<128x128xbf16>, vector<200x128xf32> -> vector<200x128xf32>
    %33 = arith.addf %28, %32 : vector<200x128xf32>
    %34 = vector.extract_strided_slice %2 {offsets = [20, 0], sizes = [200, 128], strides = [1, 1]} : vector<400x128xbf16> to vector<200x128xbf16>
    %c6 = arith.constant 6 : index
    %c0_22 = arith.constant 0 : index
    %c0_23 = arith.constant 0 : index
    %35 = vector.load %arg4[%c6, %c0_22, %c0_23] : memref<9x128x128xbf16, #tpu.memory_space<vmem>>, vector<1x128x128xbf16>
    %36 = vector.shape_cast %35 : vector<1x128x128xbf16> to vector<128x128xbf16>
    %cst_24 = arith.constant dense<0.000000e+00> : vector<200x128xf32>
    %37 = tpu.matmul %34, %36, %cst_24 {dimension_numbers = #tpu.dot_dimension_numbers<[1], [0], [0], [1], [0, 0, 1, 1], [], []>} : vector<200x128xbf16>, vector<128x128xbf16>, vector<200x128xf32> -> vector<200x128xf32>
    %38 = arith.addf %33, %37 : vector<200x128xf32>
    %39 = vector.extract_strided_slice %2 {offsets = [21, 0], sizes = [200, 128], strides = [1, 1]} : vector<400x128xbf16> to vector<200x128xbf16>
    %c7 = arith.constant 7 : index
    %c0_25 = arith.constant 0 : index
    %c0_26 = arith.constant 0 : index
    %40 = vector.load %arg4[%c7, %c0_25, %c0_26] : memref<9x128x128xbf16, #tpu.memory_space<vmem>>, vector<1x128x128xbf16>
    %41 = vector.shape_cast %40 : vector<1x128x128xbf16> to vector<128x128xbf16>
    %cst_27 = arith.constant dense<0.000000e+00> : vector<200x128xf32>
    %42 = tpu.matmul %39, %41, %cst_27 {dimension_numbers = #tpu.dot_dimension_numbers<[1], [0], [0], [1], [0, 0, 1, 1], [], []>} : vector<200x128xbf16>, vector<128x128xbf16>, vector<200x128xf32> -> vector<200x128xf32>
    %43 = arith.addf %38, %42 : vector<200x128xf32>
    %44 = vector.extract_strided_slice %2 {offsets = [22, 0], sizes = [200, 128], strides = [1, 1]} : vector<400x128xbf16> to vector<200x128xbf16>
    %c8 = arith.constant 8 : index
    %c0_28 = arith.constant 0 : index
    %c0_29 = arith.constant 0 : index
    %45 = vector.load %arg4[%c8, %c0_28, %c0_29] : memref<9x128x128xbf16, #tpu.memory_space<vmem>>, vector<1x128x128xbf16>
    %46 = vector.shape_cast %45 : vector<1x128x128xbf16> to vector<128x128xbf16>
    %cst_30 = arith.constant dense<0.000000e+00> : vector<200x128xf32>
    %47 = tpu.matmul %44, %46, %cst_30 {dimension_numbers = #tpu.dot_dimension_numbers<[1], [0], [0], [1], [0, 0, 1, 1], [], []>} : vector<200x128xbf16>, vector<128x128xbf16>, vector<200x128xf32> -> vector<200x128xf32>
    %48 = arith.addf %43, %47 : vector<200x128xf32>
    %c0_31 = arith.constant 0 : index
    %c0_32 = arith.constant 0 : index
    %49 = vector.load %arg3[%c0_31, %c0_32] : memref<200x1xf32, #tpu.memory_space<vmem>>, vector<200x1xf32>
    %50 = vector.broadcast %49 : vector<200x1xf32> to vector<200x128xf32>
    %51 = arith.mulf %48, %50 : vector<200x128xf32>
    %52 = arith.truncf %51 : vector<200x128xf32> to vector<200x128xbf16>
    %c0_33 = arith.constant 0 : index
    %c0_34 = arith.constant 0 : index
    %53 = vector.load %arg5[%c0_33, %c0_34] : memref<200x128xbf16, #tpu.memory_space<vmem>>, vector<200x128xbf16>
    tpu.vector_store %arg5[%c0_33, %c0_34], %52 {strides = array<i32>} : memref<200x128xbf16, #tpu.memory_space<vmem>>, vector<200x128xbf16>,
    %cst_35 = arith.constant dense<0.000000e+00> : vector<128xf32>
    %54 = vector.multi_reduction <add>, %51, %cst_35 [0] : vector<200x128xf32> to vector<128xf32>
    %55 = vector.shape_cast %54 : vector<128xf32> to vector<1x128xf32>
    %56 = vector.shape_cast %55 : vector<1x128xf32> to vector<1x128xf32>
    %57 = vector.broadcast %56 : vector<1x128xf32> to vector<8x128xf32>
    %c0_36 = arith.constant 0 : index
    %c0_37 = arith.constant 0 : index
    %58 = vector.load %arg6[%c0_36, %c0_37] : memref<8x128xf32, #tpu.memory_space<vmem>>, vector<8x128xf32>
    tpu.vector_store %arg6[%c0_36, %c0_37], %57 {strides = array<i32>} : memref<8x128xf32, #tpu.memory_space<vmem>>, vector<8x128xf32>,
    %59 = arith.mulf %51, %51 : vector<200x128xf32>
    %cst_38 = arith.constant dense<0.000000e+00> : vector<128xf32>
    %60 = vector.multi_reduction <add>, %59, %cst_38 [0] : vector<200x128xf32> to vector<128xf32>
    %61 = vector.shape_cast %60 : vector<128xf32> to vector<1x128xf32>
    %62 = vector.shape_cast %61 : vector<1x128xf32> to vector<1x128xf32>
    %63 = vector.broadcast %62 : vector<1x128xf32> to vector<8x128xf32>
    %c0_39 = arith.constant 0 : index
    %c0_40 = arith.constant 0 : index
    %64 = vector.load %arg7[%c0_39, %c0_40] : memref<8x128xf32, #tpu.memory_space<vmem>>, vector<8x128xf32>
    tpu.vector_store %arg7[%c0_39, %c0_40], %63 {strides = array<i32>} : memref<8x128xf32, #tpu.memory_space<vmem>>, vector<8x128xf32>,
    return
  }
  func.func @transform_0(%arg0: i32) -> (i32, i32) {
    %c0_i32 = arith.constant 0 : i32
    %c0_i32_0 = arith.constant 0 : i32
    return %arg0, %c0_i32 : i32, i32
  }
  func.func @transform_1(%arg0: i32) -> (i32, i32) {
    %c1_i32 = arith.constant 1 : i32
    %0 = arith.addi %arg0, %c1_i32 : i32
    %c0_i32 = arith.constant 0 : i32
    %c0_i32_0 = arith.constant 0 : i32
    return %0, %c0_i32 : i32, i32
  }
  func.func @transform_2(%arg0: i32) -> (i32, i32) {
    %c0_i32 = arith.constant 0 : i32
    %c0_i32_0 = arith.constant 0 : i32
    return %arg0, %c0_i32 : i32, i32
  }
  func.func @transform_3(%arg0: i32) -> (i32, i32, i32) {
    %c0_i32 = arith.constant 0 : i32
    %c0_i32_0 = arith.constant 0 : i32
    %c0_i32_1 = arith.constant 0 : i32
    %c0_i32_2 = arith.constant 0 : i32
    return %c0_i32, %c0_i32_0, %c0_i32_1 : i32, i32, i32
  }
  func.func @transform_4(%arg0: i32) -> (i32, i32) {
    %c0_i32 = arith.constant 0 : i32
    %c0_i32_0 = arith.constant 0 : i32
    return %arg0, %c0_i32 : i32, i32
  }
  func.func @transform_5(%arg0: i32) -> (i32, i32) {
    %c0_i32 = arith.constant 0 : i32
    %c0_i32_0 = arith.constant 0 : i32
    return %arg0, %c0_i32 : i32, i32
  }
  func.func @transform_6(%arg0: i32) -> (i32, i32) {
    %c0_i32 = arith.constant 0 : i32
    %c0_i32_0 = arith.constant 0 : i32
    return %arg0, %c0_i32 : i32, i32
  }
}

module attributes {stable_mosaic.version = 11 : i64} {
  func.func @_bn_apply_kernel(%arg0: i32, %arg1: memref<200x128xbf16, #tpu.memory_space<vmem>>, %arg2: memref<1x128xf32, #tpu.memory_space<vmem>>, %arg3: memref<1x128xf32, #tpu.memory_space<vmem>>, %arg4: memref<200x128xf32, #tpu.memory_space<vmem>>) attributes {dimension_semantics = [#tpu.dimension_semantics<parallel>], iteration_bounds = array<i64: 1>, scalar_prefetch = 0 : i64, scratch_operands = 0 : i64, tpu.core_type = #tpu.core_type<tc>, window_params = [{transform_indices = @transform_0, window_bounds = array<i64: 200, 128>}, {pipeline_mode = #tpu.pipeline_mode<synchronous>, transform_indices = @transform_1, window_bounds = array<i64: 1, 128>}, {pipeline_mode = #tpu.pipeline_mode<synchronous>, transform_indices = @transform_2, window_bounds = array<i64: 1, 128>}, {transform_indices = @transform_3, window_bounds = array<i64: 200, 128>}]} {
    %c0 = arith.constant 0 : index
    %c0_0 = arith.constant 0 : index
    %0 = vector.load %arg1[%c0, %c0_0] : memref<200x128xbf16, #tpu.memory_space<vmem>>, vector<200x128xbf16>
    %1 = arith.extf %0 : vector<200x128xbf16> to vector<200x128xf32>
    %c0_1 = arith.constant 0 : index
    %c0_2 = arith.constant 0 : index
    %2 = vector.load %arg2[%c0_1, %c0_2] : memref<1x128xf32, #tpu.memory_space<vmem>>, vector<1x128xf32>
    %3 = vector.broadcast %2 : vector<1x128xf32> to vector<200x128xf32>
    %4 = arith.mulf %1, %3 : vector<200x128xf32>
    %c0_3 = arith.constant 0 : index
    %c0_4 = arith.constant 0 : index
    %5 = vector.load %arg3[%c0_3, %c0_4] : memref<1x128xf32, #tpu.memory_space<vmem>>, vector<1x128xf32>
    %6 = vector.broadcast %5 : vector<1x128xf32> to vector<200x128xf32>
    %7 = arith.addf %4, %6 : vector<200x128xf32>
    %c0_5 = arith.constant 0 : index
    %c0_6 = arith.constant 0 : index
    %8 = vector.load %arg4[%c0_5, %c0_6] : memref<200x128xf32, #tpu.memory_space<vmem>>, vector<200x128xf32>
    tpu.vector_store %arg4[%c0_5, %c0_6], %7 {strides = array<i32>} : memref<200x128xf32, #tpu.memory_space<vmem>>, vector<200x128xf32>,
    return
  }
  func.func @transform_0(%arg0: i32) -> (i32, i32) {
    %c0_i32 = arith.constant 0 : i32
    %c0_i32_0 = arith.constant 0 : i32
    return %arg0, %c0_i32 : i32, i32
  }
  func.func @transform_1(%arg0: i32) -> (i32, i32) {
    %c0_i32 = arith.constant 0 : i32
    %c0_i32_0 = arith.constant 0 : i32
    %c0_i32_1 = arith.constant 0 : i32
    return %c0_i32, %c0_i32_0 : i32, i32
  }
  func.func @transform_2(%arg0: i32) -> (i32, i32) {
    %c0_i32 = arith.constant 0 : i32
    %c0_i32_0 = arith.constant 0 : i32
    %c0_i32_1 = arith.constant 0 : i32
    return %c0_i32, %c0_i32_0 : i32, i32
  }
  func.func @transform_3(%arg0: i32) -> (i32, i32) {
    %c0_i32 = arith.constant 0 : i32
    %c0_i32_0 = arith.constant 0 : i32
    return %arg0, %c0_i32 : i32, i32
  }
}

</mosaic_0001>

<bundles_post_ra>
// kernel: encoder_path.3
= control target key start
LH: loop header
LB: loop body
LE: loop exit
PB: predicated region body
PF: predicated region fallthrough
CT: control target
= control target key end

     0   :  { %s757_s1 = inlined_call_operand.vmem [shape: bf16[128,128], index: 1, kind: input, shape index: {}]   ;;  %s758_s0 = inlined_call_operand.vmem [shape: bf16[128,128], index: 0, kind: input, shape index: {}]   ;;  %s759_s2 = inlined_call_operand.vmem [shape: bf16[128,128], index: 2, kind: output, shape index: {0}]   ;;  %s760_s3 = inlined_call_operand.vmem [shape: f32[8,128], index: 3, kind: output, shape index: {1}]   ;;  %s761_s4 = inlined_call_operand.vmem [shape: f32[8,128], index: 4, kind: output, shape index: {2}]  }
   0x1   :  { %v638_v0 = vld [vmem:[%s757_s1 + $0x38] sm:$0xff]   ;;  %v639_v1 = vld [vmem:[%s757_s1 + $0x30] sm:$0xff]   ;;  %v640_v2 = vld [vmem:[%s757_s1 + $0x28] sm:$0xff]  }
   0x2   :  { %590 = vmatprep.subr.bf16.mxu0 %v638_v0  ;;  %622 = vmatprep.subr.bf16.mxu1 %v638_v0  ;;  %v641_v3 = vld [vmem:[%s757_s1 + $0x20] sm:$0xff]   ;;  %v642_v5 = vld [vmem:[%s757_s1 + $0x18] sm:$0xff]   ;;  %v643_v7 = vld [vmem:[%s757_s1 + $0x10] sm:$0xff]  }
   0x3   :  { %591 = vmatpush3.bf16.msra.mxu0 %v638_v0  ;;  %630 = vmatpush3.bf16.msra.mxu1 %v638_v0  ;;  %v646_v4 = vld [vmem:[%s758_s0] sm:$0xff]   ;;  %v644_v8 = vld [vmem:[%s757_s1 + $0x8] sm:$0xff]   ;;  %v648_v12 = vld [vmem:[%s758_s0 + $0x10] sm:$0xff]  }
   0x4   :  { %592 = vmatprep.subr.bf16.mxu0 %v639_v1  ;;  %623 = vmatprep.subr.bf16.mxu1 %v639_v1  ;;  %v650_v6 = vld [vmem:[%s758_s0 + $0x20] sm:$0xff]   ;;  %v647_v10 = vld [vmem:[%s758_s0 + $0x8] sm:$0xff]   ;;  %v652_v13 = vld [vmem:[%s758_s0 + $0x30] sm:$0xff]  }
   0x5   :  { %606 = vmatprep.mubr.bf16.mxu0 %v646_v4  ;;  %614 = vmatprep.mubr.bf16.mxu1 %v650_v6  ;;  %v645_v9 = vld [vmem:[%s757_s1] sm:$0xff]   ;;  %v651_v11 = vld [vmem:[%s758_s0 + $0x28] sm:$0xff]   ;;  %v649_v14 = vld [vmem:[%s758_s0 + $0x18] sm:$0xff]  }
   0x6   :  { %v653_v15 = vld [vmem:[%s758_s0 + $0x38] sm:$0xff]  }
   0x7   :  { %593 = vmatpush3.bf16.msra.mxu0 %v639_v1  ;;  %631 = vmatpush3.bf16.msra.mxu1 %v639_v1 }
   0x8   :  { %594 = vmatprep.subr.bf16.mxu0 %v640_v2  ;;  %624 = vmatprep.subr.bf16.mxu1 %v640_v2 }
   0xb   :  { %595 = vmatpush3.bf16.msra.mxu0 %v640_v2  ;;  %632 = vmatpush3.bf16.msra.mxu1 %v640_v2 }
   0xc   :  { %596 = vmatprep.subr.bf16.mxu0 %v641_v3  ;;  %625 = vmatprep.subr.bf16.mxu1 %v641_v3 }
   0xf   :  { %597 = vmatpush3.bf16.msra.mxu0 %v641_v3  ;;  %633 = vmatpush3.bf16.msra.mxu1 %v641_v3 }
  0x10   :  { %598 = vmatprep.subr.bf16.mxu0 %v642_v5  ;;  %626 = vmatprep.subr.bf16.mxu1 %v642_v5 }
  0x13   :  { %599 = vmatpush3.bf16.msra.mxu0 %v642_v5  ;;  %634 = vmatpush3.bf16.msra.mxu1 %v642_v5 }
  0x14   :  { %600 = vmatprep.subr.bf16.mxu0 %v643_v7  ;;  %627 = vmatprep.subr.bf16.mxu1 %v643_v7 }
  0x17   :  { %601 = vmatpush3.bf16.msra.mxu0 %v643_v7  ;;  %635 = vmatpush3.bf16.msra.mxu1 %v643_v7 }
  0x18   :  { %602 = vmatprep.subr.bf16.mxu0 %v644_v8  ;;  %628 = vmatprep.subr.bf16.mxu1 %v644_v8 }
  0x1b   :  { %603 = vmatpush3.bf16.msra.mxu0 %v644_v8  ;;  %636 = vmatpush3.bf16.msra.mxu1 %v644_v8 }
  0x1c   :  { %604 = vmatprep.subr.bf16.mxu0 %v645_v9  ;;  %629 = vmatprep.subr.bf16.mxu1 %v645_v9 }
  0x1f   :  { %605 = vmatpush3.bf16.msra.mxu0 %v645_v9  ;;  %637 = vmatpush3.bf16.msra.mxu1 %v645_v9 }
  0x22   :  { %607 = vmatmul.mubr.bf16.vlgmr.msra.gmra.mxu0 %v647_v10  ;;  %615 = vmatmul.mubr.bf16.vlgmr.msra.gmra.mxu1 %v651_v11 }
  0x23   :  { %610 = vmatprep.mubr.bf16.mxu0 %v648_v12  ;;  %618 = vmatprep.mubr.bf16.mxu1 %v652_v13 }
  0x2a   :  { %611 = vmatmul.mubr.bf16.gmra.mxu0 %v649_v14  ;;  %619 = vmatmul.mubr.bf16.gmra.mxu1 %v653_v15 }
  0xe2   :  { %v608_v16 = vpop.f32.mrf.mxu0  ;;  %v616_v17 = vpop.f32.mrf.mxu1 }
  0xe3   :  { %v431_v33 = vmul.f32 %v608_v16, %v608_v16  ;;  %v439_v3 = vmul.f32 %v616_v17, %v616_v17 }
  0xe4   :  { %v213_v18 = vpop.f32.mrf.mxu0  ;;  %v245_v19 = vpop.f32.mrf.mxu1 }
  0xe5   :  { %v429_v24 = vmul.f32 %v213_v18, %v213_v18  ;;  %v437_v61 = vmul.f32 %v245_v19, %v245_v19 }
  0xe6   :  { %v609_v20 = vpop.f32.mrf.mxu0  ;;  %v617_v21 = vpop.f32.mrf.mxu1 }
  0xe7   :  { %v535_v22 = vpack.c.bf16 %v609_v20, %v608_v16  ;;  %v555_v23 = vpack.c.bf16 %v617_v21, %v616_v17  ;;  %v432_v38 = vmul.f32 %v609_v20, %v609_v20  ;;  %v440_v6 = vmul.f32 %v617_v21, %v617_v21 }
  0xe8   :  { %v216_v25 = vpop.f32.mrf.mxu0  ;;  %v248_v26 = vpop.f32.mrf.mxu1 }
  0xe9   :  { %567 = vst [vmem:[%s759_s2 + $0x8] sm:$0xff] %v535_v22   ;;  %v530_v27 = vpack.c.bf16 %v216_v25, %v213_v18  ;;  %v407_v28 = vadd.f32 %v216_v25, %v213_v18  ;;  %v430_v29 = vmul.f32 %v216_v25, %v216_v25  ;;  %571 = vst [vmem:[%s759_s2 + $0x28] sm:$0xff] %v555_v23  }
  0xea   :  { %v550_v30 = vpack.c.bf16 %v248_v26, %v245_v19  ;;  %v612_v31 = vpop.f32.mrf.mxu0  ;;  %v620_v32 = vpop.f32.mrf.mxu1  ;;  %v438_v1 = vmul.f32 %v248_v26, %v248_v26 }
  0xeb   :  { %531 = vst [vmem:[%s759_s2] sm:$0xff] %v530_v27   ;;  %v408_v34 = vadd.f32 %v608_v16, %v407_v28  ;;  %v445_v35 = vadd.f32 %v430_v29, %v429_v24  ;;  %v435_v55 = vmul.f32 %v612_v31, %v612_v31  ;;  %v443_v15 = vmul.f32 %v620_v32, %v620_v32 }
  0xec   :  { %570 = vst [vmem:[%s759_s2 + $0x20] sm:$0xff] %v550_v30   ;;  %v229_v36 = vpop.f32.mrf.mxu0  ;;  %v261_v37 = vpop.f32.mrf.mxu1 }
  0xed   :  { %v446_v39 = vadd.f32 %v445_v35, %v431_v33  ;;  %v409_v40 = vadd.f32 %v609_v20, %v408_v34  ;;  %v433_v44 = vmul.f32 %v229_v36, %v229_v36  ;;  %v441_v10 = vmul.f32 %v261_v37, %v261_v37 }
  0xee   :  { %v613_v41 = vpop.f32.mrf.mxu0  ;;  %v621_v42 = vpop.f32.mrf.mxu1 }
  0xef   :  { %v410_v43 = vadd.f32 %v409_v40, %v229_v36  ;;  %v447_v45 = vadd.f32 %v446_v39, %v432_v38  ;;  %v545_v46 = vpack.c.bf16 %v613_v41, %v612_v31  ;;  %v565_v48 = vpack.c.bf16 %v621_v42, %v620_v32 }
  0xf0   :  { %v232_v47 = vpop.f32.mrf.mxu0  ;;  %v264_v49 = vpop.f32.mrf.mxu1  ;;  %v436_v58 = vmul.f32 %v613_v41, %v613_v41  ;;  %v444_v20 = vmul.f32 %v621_v42, %v621_v42 }
  0xf1   :  { %v448_v50 = vadd.f32 %v447_v45, %v433_v44  ;;  %569 = vst [vmem:[%s759_s2 + $0x18] sm:$0xff] %v545_v46   ;;  %v540_v51 = vpack.c.bf16 %v232_v47, %v229_v36  ;;  %v411_v52 = vadd.f32 %v410_v43, %v232_v47  ;;  %v434_v53 = vmul.f32 %v232_v47, %v232_v47 }
  0xf2   :  { %573 = vst [vmem:[%s759_s2 + $0x38] sm:$0xff] %v565_v48   ;;  %v560_v54 = vpack.c.bf16 %v264_v49, %v261_v37  ;;  %v442_v14 = vmul.f32 %v264_v49, %v264_v49 }
  0xf3   :  { %568 = vst [vmem:[%s759_s2 + $0x10] sm:$0xff] %v540_v51   ;;  %v412_v56 = vadd.f32 %v612_v31, %v411_v52  ;;  %v449_v57 = vadd.f32 %v448_v50, %v434_v53 }
  0xf4   :  { %572 = vst [vmem:[%s759_s2 + $0x30] sm:$0xff] %v560_v54  }
  0xf5   :  { %v413_v59 = vadd.f32 %v613_v41, %v412_v56  ;;  %v450_v60 = vadd.f32 %v449_v57, %v435_v55 }
  0xf7   :  { %v451_v62 = vadd.f32 %v450_v60, %v436_v58  ;;  %v414_v63 = vadd.f32 %v413_v59, %v245_v19 }
  0xf9   :  { %v415_v0 = vadd.f32 %v414_v63, %v248_v26  ;;  %v452_v2 = vadd.f32 %v451_v62, %v437_v61 }
  0xfb   :  { %v416_v4 = vadd.f32 %v616_v17, %v415_v0  ;;  %v453_v5 = vadd.f32 %v452_v2, %v438_v1 }
  0xfd   :  { %v454_v7 = vadd.f32 %v453_v5, %v439_v3  ;;  %v417_v8 = vadd.f32 %v617_v21, %v416_v4 }
  0xff   :  { %v418_v9 = vadd.f32 %v417_v8, %v261_v37  ;;  %v455_v11 = vadd.f32 %v454_v7, %v440_v6 }
 0x101   :  { %v456_v12 = vadd.f32 %v455_v11, %v441_v10  ;;  %v419_v13 = vadd.f32 %v418_v9, %v264_v49 }
 0x103   :  { %v420_v16 = vadd.f32 %v620_v32, %v419_v13  ;;  %v457_v18 = vadd.f32 %v456_v12, %v442_v14 }
 0x105   :  { %v421_v19 = vadd.f32 %v621_v42, %v420_v16  ;;  %v458_v22 = vadd.f32 %v457_v18, %v443_v15 }
 0x107   :  { %v422_v23 = vrot.slane %v421_v19, 4  ;;  %v459_v24 = vadd.f32 %v458_v22, %v444_v20 }
 0x109   :  { %v423_v25 = vadd.f32 %v422_v23, %v421_v19  ;;  %v460_v17 = vrot.slane %v459_v24, 4 }
 0x10b   :  { %v424_v26 = vrot.slane %v423_v25, 2  ;;  %v461_v27 = vadd.f32 %v460_v17, %v459_v24 }
 0x10d   :  { %v425_v28 = vadd.f32 %v424_v26, %v423_v25  ;;  %v462_v21 = vrot.slane %v461_v27, 2 }
 0x10f   :  { %v426_v29 = vrot.slane %v425_v28, 1  ;;  %v463_v30 = vadd.f32 %v462_v21, %v461_v27 }
 0x111   :  { %v427_v31 = vadd.f32 %v426_v29, %v425_v28  ;;  %v464_v33 = vrot.slane %v463_v30, 1 }
 0x113   :  { %428 = vst [vmem:[%s760_s3] sm:$0xff] %v427_v31  ;;  %v465_v32 = vadd.f32 %v464_v33, %v463_v30 }
 0x115   :  { %466 = vst [vmem:[%s761_s4] sm:$0xff] %v465_v32 }

// kernel: encoder_path.5
= control target key start
LH: loop header
LB: loop body
LE: loop exit
PB: predicated region body
PF: predicated region fallthrough
CT: control target
= control target key end

     0   :  { %s412_s0 = inlined_call_operand.vmem [shape: bf16[200,128], index: 0, kind: input, shape index: {}]   ;;  %s413_s1 = inlined_call_operand.vmem [shape: f32[1,128], index: 1, kind: input, shape index: {}]   ;;  %s414_s2 = inlined_call_operand.vmem [shape: f32[1,128], index: 2, kind: input, shape index: {}]   ;;  %s415_s3 = inlined_call_operand.vmem [shape: f32[200,128], index: 3, kind: output, shape index: {}]  }
   0x1   :  { %v160_v0 = vld [vmem:[%s412_s0] sm:$0xff]   ;;  %v207_v4 = vld [vmem:[%s412_s0 + $0x8] sm:$0xff]   ;;  %v208_v5 = vld [vmem:[%s412_s0 + $0x10] sm:$0xff]  }
   0x2   :  { %v244_v1 = vld [vmem:[%s413_s1] ss:$0 sm:$0xff]  ;;  %v161_v2 = vunpack.c.l.bf16 %v160_v0  ;;  %v162_v3 = vunpack.c.h.bf16 %v160_v0  ;;  %v209_v6 = vld [vmem:[%s412_s0 + $0x18] sm:$0xff]   ;;  %v165_v8 = vunpack.c.l.bf16 %v207_v4  ;;  %v166_v9 = vunpack.c.h.bf16 %v207_v4  ;;  %v211_v25 = vld [vmem:[%s412_s0 + $0x28] sm:$0xff]  }
   0x3   :  { %v258_v7 = vld [vmem:[%s414_s2] ss:$0 sm:$0xff]  ;;  %v169_v10 = vunpack.c.l.bf16 %v208_v5  ;;  %v170_v11 = vunpack.c.h.bf16 %v208_v5  ;;  %v173_v14 = vunpack.c.l.bf16 %v209_v6  ;;  %v174_v15 = vunpack.c.h.bf16 %v209_v6  ;;  %v212_v26 = vld [vmem:[%s412_s0 + $0x30] sm:$0xff]   ;;  %v213_v31 = vld [vmem:[%s412_s0 + $0x38] sm:$0xff]  }
   0x4   :  { %v71_v12 = vmul.f32 %v161_v2, %v244_v1  ;;  %v72_v13 = vmul.f32 %v162_v3, %v244_v1  ;;  %v73_v16 = vmul.f32 %v165_v8, %v244_v1  ;;  %v74_v17 = vmul.f32 %v166_v9, %v244_v1  ;;  %v210_v20 = vld [vmem:[%s412_s0 + $0x20] sm:$0xff]   ;;  %v215_v53 = vld [vmem:[%s412_s0 + $0x48] sm:$0xff]   ;;  %v216_v54 = vld [vmem:[%s412_s0 + $0x50] sm:$0xff]  }
   0x5   :  { %v75_v18 = vmul.f32 %v169_v10, %v244_v1  ;;  %v76_v19 = vmul.f32 %v170_v11, %v244_v1  ;;  %v77_v23 = vmul.f32 %v173_v14, %v244_v1  ;;  %v78_v24 = vmul.f32 %v174_v15, %v244_v1  ;;  %v214_v48 = vld [vmem:[%s412_s0 + $0x40] sm:$0xff]   ;;  %v217_v59 = vld [vmem:[%s412_s0 + $0x58] sm:$0xff]  }
   0x6   :  { %v103_v21 = vadd.f32 %v258_v7, %v71_v12  ;;  %v104_v22 = vadd.f32 %v258_v7, %v72_v13  ;;  %v105_v27 = vadd.f32 %v258_v7, %v73_v16  ;;  %v106_v28 = vadd.f32 %v258_v7, %v74_v17  ;;  %v38_v14 = vld [vmem:[%s412_s0 + $0x60] sm:$0xf] }
   0x7   :  { %v107_v29 = vadd.f32 %v258_v7, %v75_v18  ;;  %v108_v30 = vadd.f32 %v258_v7, %v76_v19  ;;  %v109_v32 = vadd.f32 %v258_v7, %v77_v23  ;;  %v110_v33 = vadd.f32 %v258_v7, %v78_v24 }
   0x8   :  { %128 = vst [vmem:[%s415_s3] sm:$0xff] %v103_v21  ;;  %129 = vst [vmem:[%s415_s3 + $0x8] sm:$0xff] %v104_v22  ;;  %v177_v34 = vunpack.c.l.bf16 %v210_v20  ;;  %v178_v35 = vunpack.c.h.bf16 %v210_v20  ;;  %v181_v36 = vunpack.c.l.bf16 %v211_v25  ;;  %v182_v37 = vunpack.c.h.bf16 %v211_v25 }
   0x9   :  { %130 = vst [vmem:[%s415_s3 + $0x10] sm:$0xff] %v105_v27  ;;  %131 = vst [vmem:[%s415_s3 + $0x18] sm:$0xff] %v106_v28  ;;  %v185_v38 = vunpack.c.l.bf16 %v212_v26  ;;  %v186_v39 = vunpack.c.h.bf16 %v212_v26  ;;  %v189_v42 = vunpack.c.l.bf16 %v213_v31  ;;  %v190_v43 = vunpack.c.h.bf16 %v213_v31 }
   0xa   :  { %132 = vst [vmem:[%s415_s3 + $0x20] sm:$0xff] %v107_v29  ;;  %133 = vst [vmem:[%s415_s3 + $0x28] sm:$0xff] %v108_v30  ;;  %v79_v40 = vmul.f32 %v177_v34, %v244_v1  ;;  %v80_v41 = vmul.f32 %v178_v35, %v244_v1  ;;  %v81_v44 = vmul.f32 %v181_v36, %v244_v1  ;;  %v193_v62 = vunpack.c.l.bf16 %v214_v48 }
   0xb   :  { %134 = vst [vmem:[%s415_s3 + $0x30] sm:$0xff] %v109_v32  ;;  %135 = vst [vmem:[%s415_s3 + $0x38] sm:$0xff] %v110_v33  ;;  %v82_v45 = vmul.f32 %v182_v37, %v244_v1  ;;  %v83_v46 = vmul.f32 %v185_v38, %v244_v1  ;;  %v84_v47 = vmul.f32 %v186_v39, %v244_v1  ;;  %v194_v63 = vunpack.c.h.bf16 %v214_v48 }
   0xc   :  { %v111_v49 = vadd.f32 %v258_v7, %v79_v40  ;;  %v112_v50 = vadd.f32 %v258_v7, %v80_v41  ;;  %v85_v51 = vmul.f32 %v189_v42, %v244_v1  ;;  %v86_v52 = vmul.f32 %v190_v43, %v244_v1 }
   0xd   :  { %v113_v55 = vadd.f32 %v258_v7, %v81_v44  ;;  %v114_v56 = vadd.f32 %v258_v7, %v82_v45  ;;  %v115_v57 = vadd.f32 %v258_v7, %v83_v46  ;;  %v116_v58 = vadd.f32 %v258_v7, %v84_v47 }
   0xe   :  { %136 = vst [vmem:[%s415_s3 + $0x40] sm:$0xff] %v111_v49  ;;  %137 = vst [vmem:[%s415_s3 + $0x48] sm:$0xff] %v112_v50  ;;  %v117_v60 = vadd.f32 %v258_v7, %v85_v51  ;;  %v118_v61 = vadd.f32 %v258_v7, %v86_v52  ;;  %v197_v0 = vunpack.c.l.bf16 %v215_v53  ;;  %v198_v2 = vunpack.c.h.bf16 %v215_v53 }
   0xf   :  { %138 = vst [vmem:[%s415_s3 + $0x50] sm:$0xff] %v113_v55  ;;  %139 = vst [vmem:[%s415_s3 + $0x58] sm:$0xff] %v114_v56  ;;  %v201_v3 = vunpack.c.l.bf16 %v216_v54  ;;  %v202_v4 = vunpack.c.h.bf16 %v216_v54  ;;  %v87_v5 = vmul.f32 %v193_v62, %v244_v1  ;;  %v88_v6 = vmul.f32 %v194_v63, %v244_v1 }
  0x10   :  { %140 = vst [vmem:[%s415_s3 + $0x60] sm:$0xff] %v115_v57  ;;  %141 = vst [vmem:[%s415_s3 + $0x68] sm:$0xff] %v116_v58  ;;  %v205_v8 = vunpack.c.l.bf16 %v217_v59  ;;  %v206_v9 = vunpack.c.h.bf16 %v217_v59  ;;  %v89_v10 = vmul.f32 %v197_v0, %v244_v1  ;;  %v90_v11 = vmul.f32 %v198_v2, %v244_v1 }
  0x11   :  { %142 = vst [vmem:[%s415_s3 + $0x70] sm:$0xff] %v117_v60  ;;  %143 = vst [vmem:[%s415_s3 + $0x78] sm:$0xff] %v118_v61  ;;  %v91_v12 = vmul.f32 %v201_v3, %v244_v1  ;;  %v92_v13 = vmul.f32 %v202_v4, %v244_v1  ;;  %v119_v15 = vadd.f32 %v258_v7, %v87_v5  ;;  %v63_v25 = vunpack.c.l.bf16 %v38_v14 }
  0x12   :  { %v120_v16 = vadd.f32 %v258_v7, %v88_v6  ;;  %v93_v17 = vmul.f32 %v205_v8, %v244_v1  ;;  %v94_v18 = vmul.f32 %v206_v9, %v244_v1  ;;  %v121_v19 = vadd.f32 %v258_v7, %v89_v10 }
  0x13   :  { %v122_v20 = vadd.f32 %v258_v7, %v90_v11  ;;  %v123_v21 = vadd.f32 %v258_v7, %v91_v12  ;;  %v124_v22 = vadd.f32 %v258_v7, %v92_v13  ;;  %144 = vst [vmem:[%s415_s3 + $0x80] sm:$0xff] %v119_v15  ;;  %v95_v26 = vmul.f32 %v244_v1, %v63_v25 }
  0x14   :  { %145 = vst [vmem:[%s415_s3 + $0x88] sm:$0xff] %v120_v16  ;;  %v125_v23 = vadd.f32 %v258_v7, %v93_v17  ;;  %v126_v24 = vadd.f32 %v258_v7, %v94_v18  ;;  %146 = vst [vmem:[%s415_s3 + $0x90] sm:$0xff] %v121_v19 }
  0x15   :  { %147 = vst [vmem:[%s415_s3 + $0x98] sm:$0xff] %v122_v20  ;;  %148 = vst [vmem:[%s415_s3 + $0xa0] sm:$0xff] %v123_v21  ;;  %v127_v27 = vadd.f32 %v258_v7, %v95_v26 }
  0x16   :  { %149 = vst [vmem:[%s415_s3 + $0xa8] sm:$0xff] %v124_v22  ;;  %150 = vst [vmem:[%s415_s3 + $0xb0] sm:$0xff] %v125_v23 }
  0x17   :  { %151 = vst [vmem:[%s415_s3 + $0xb8] sm:$0xff] %v126_v24  ;;  %152 = vst [vmem:[%s415_s3 + $0xc0] sm:$0xff] %v127_v27 }

// kernel: encoder_path.4
= control target key start
LH: loop header
LB: loop body
LE: loop exit
PB: predicated region body
PF: predicated region fallthrough
CT: control target
= control target key end

     0   :  { %v5760_v0 = vmov 0.0   ;;  %vm4269_vm0 = vmmov 0   ;;  %vm192_vm1 = vsmask.f32 7424  ;;  %vm154_vm2 = vcmask 1043456   ;;  %s5752_s3 = inlined_call_operand.vmem [shape: bf16[9,128,128], index: 3, kind: input, shape index: {}]   ;;  %s5753_s0 = inlined_call_operand.vmem [shape: bf16[400,128], index: 0, kind: input, shape index: {}, may-alias: {0,1}]   ;;  %s5754_s1 = inlined_call_operand.vmem [shape: bf16[400,128], index: 1, kind: input, shape index: {}, may-alias: {0,1}]   ;;  %s5755_s2 = inlined_call_operand.vmem [shape: f32[200,1], index: 2, kind: input, shape index: {}]   ;;  %s5756_s4 = inlined_call_operand.vmem [shape: bf16[200,128], index: 4, kind: output, shape index: {0}]   ;;  %s5757_s5 = inlined_call_operand.vmem [shape: f32[8,128], index: 5, kind: output, shape index: {1}]   ;;  %s5758_s6 = inlined_call_operand.vmem [shape: f32[8,128], index: 6, kind: output, shape index: {2}]  }
   0x1   :  { %3531 = vmatprep.subr.bf16.mxu0 %v5760_v0  ;;  %4143 = vmatprep.subr.bf16.mxu1 %v5760_v0  ;;  %v4164_v1 = vld [vmem:[%s5752_s3 + $0x78] sm:$0xff]   ;;  %v4165_v2 = vld [vmem:[%s5752_s3 + $0x70] sm:$0xff]   ;;  %v4166_v3 = vld [vmem:[%s5752_s3 + $0x68] sm:$0xff]   ;;  %vm694_vm3 = vcmask 1046528   ;;  %vm959_vm4 = vcmask 1042432   ;;  %vm1526_vm6 = vcmask 1041408  }
   0x2   :  { %3547 = vmatprep.mubr.msk.bf16.mxu0 %vm4269_vm0, %v5760_v0  ;;  %3575 = vmatprep.mubr.msk.bf16.mxu1 %vm4269_vm0, %v5760_v0  ;;  %v4167_v4 = vld [vmem:[%s5752_s3 + $0x60] sm:$0xff]   ;;  %v4168_v5 = vld [vmem:[%s5752_s3 + $0x58] sm:$0xff]   ;;  %v4348_v8 = vld [vmem:[%s5753_s0 + $0x8] sm:$0xff]   ;;  %vm1226_vm5 = vsmask.f32 2304  ;;  %vm1793_vm7 = vcmask 1045504  }
   0x3   :  { %3532 = vmatpush3.bf16.msra.mxu0 %v4164_v1  ;;  %4151 = vmatpush3.bf16.msra.mxu1 %v4164_v1  ;;  %v4336_v6 = vld [vmem:[%s5753_s0] sm:$0xff]   ;;  %v4341_v7 = vld [vmem:[%s5753_s0 + $0x38] sm:$0xff]   ;;  %v4169_v9 = vld [vmem:[%s5752_s3 + $0x50] sm:$0xff]   ;;  %v4369_v15 = vshll.u32 %v4348_v8, 16  ;;  %v4408_v28 = vshrl.u32 %v4348_v8, 16  ;;  %vm2349_vm9 = vcmask 1044480  }
   0x4   :  { %3533 = vmatprep.subr.bf16.mxu0 %v5760_v0  ;;  %4144 = vmatprep.subr.bf16.mxu1 %v5760_v0  ;;  %v196_v10 = vshll.u32 %v4336_v6, 16  ;;  %v4357_v11 = vld [vmem:[%s5753_s0 + $0x40] sm:$0xff]   ;;  %v4360_v12 = vshll.u32 %v4341_v7, 16  ;;  %v4170_v13 = vld [vmem:[%s5752_s3 + $0x48] sm:$0xff]   ;;  %v194_v14 = vshrl.u32 %v4336_v6, 16  ;;  %v4374_v17 = vshrl.u32 %v4341_v7, 16 }
   0x5   :  { %v4378_v19 = vshll.u32 %v4357_v11, 16  ;;  %v4385_v20 = vld [vmem:[%s5753_s0 + $0x10] sm:$0xff]   ;;  %v4171_v21 = vld [vmem:[%s5752_s3 + $0x40] sm:$0xff]   ;;  %v4393_v22 = vld [vmem:[%s5753_s0 + $0x48] sm:$0xff]   ;;  %v203_v24 = vrot.slane %v4369_v15, 1  ;;  %v4419_v33 = vshrl.u32 %v4357_v11, 16 }
   0x6   :  { %5778 = vst [vmem:[#allocation2_spill] sm:$0xff] %v4360_v12  ;;  %v198_v16 = vrot.slane %v196_v10, 1  ;;  %5779 = vst [vmem:[#allocation3_spill] sm:$0xff] %v4374_v17  ;;  %v251_v18 = vrot.slane %v4360_v12, 1  ;;  %v4405_v27 = vshll.u32 %v4385_v20, 16  ;;  %v4411_v29 = vshll.u32 %v4393_v22, 16 }
   0x7   :  { %3534 = vmatpush3.bf16.msra.mxu0 %v4165_v2  ;;  %4152 = vmatpush3.bf16.msra.mxu1 %v4165_v2  ;;  %5780 = vst [vmem:[#allocation4_spill] sm:$0xff] %v4378_v19  ;;  %v259_v26 = vrot.slane %v4378_v19, 1  ;;  %v4176_v32 = vld [vmem:[%s5752_s3 + $0xb8] sm:$0xff]   ;;  %5782 = vst [vmem:[#allocation6_spill] sm:$0xff] %v4419_v33  ;;  %v4180_v36 = vld [vmem:[%s5752_s3 + $0xb0] sm:$0xff]   ;;  %v207_v40 = vor.u32 %v4408_v28, %v203_v24  ;;  %v4459_v45 = vshrl.u32 %v4385_v20, 16 }
   0x8   :  { %3535 = vmatprep.subr.bf16.mxu0 %v5760_v0  ;;  %4145 = vmatprep.subr.bf16.mxu1 %v5760_v0  ;;  %v199_v23 = vor.u32 %v198_v16, %v194_v14  ;;  %v255_v25 = vor.u32 %v4374_v17, %v251_v18  ;;  %5781 = vst [vmem:[#allocation5_spill] sm:$0xff] %v4411_v29  ;;  %v4177_v34 = vld [vmem:[%s5752_s3 + $0x38] sm:$0xff]   ;;  %v211_v35 = vrot.slane %v4405_v27, 1  ;;  %v267_v38 = vrot.slane %v4411_v29, 1  ;;  %v4439_v39 = vld [vmem:[%s5753_s0 + $0x50] sm:$0xff]   ;;  %v4182_v44 = vld [vmem:[%s5752_s3 + $0xa8] sm:$0xff]  }
   0x9   :  { %v4433_v37 = vld [vmem:[%s5753_s0 + $0x18] sm:$0xff]   ;;  %v263_v41 = vor.u32 %v4419_v33, %v259_v26  ;;  %v4181_v42 = vld [vmem:[%s5752_s3 + $0x30] sm:$0xff]   ;;  %v4462_v46 = vshll.u32 %v4439_v39, 16  ;;  %v4467_v49 = vshrl.u32 %v4393_v22, 16  ;;  %v4185_v50 = vld [vmem:[%s5752_s3 + $0x28] sm:$0xff]   ;;  %v4502_v60 = vshrl.u32 %v4439_v39, 16 }
   0xa   :  { %v204_v30 = vsel %vm192_vm1, %v199_v23, %v203_v24  ;;  %v260_v31 = vsel %vm192_vm1, %v255_v25, %v259_v26  ;;  %v4453_v43 = vshll.u32 %v4433_v37, 16  ;;  %v212_v47 = vsel %vm192_vm1, %v207_v40, %v211_v35  ;;  %v4476_v51 = vld [vmem:[%s5753_s0 + $0x20] sm:$0xff]   ;;  %v4487_v55 = vld [vmem:[%s5753_s0 + $0x58] sm:$0xff]   ;;  %v4521_v2 = vld [vmem:[%s5753_s0 + $0x28] sm:$0xff]  }
   0xb   :  { %3536 = vmatpush3.bf16.msra.mxu0 %v4166_v3  ;;  %4153 = vmatpush3.bf16.msra.mxu1 %v4166_v3  ;;  %5783 = vst [vmem:[#allocation7_spill] sm:$0xff] %v4462_v46  ;;  %v268_v48 = vsel %vm192_vm1, %v263_v41, %v267_v38  ;;  %5784 = vst [vmem:[#allocation8_spill] sm:$0xff] %v4467_v49  ;;  %v275_v53 = vrot.slane %v4462_v46, 1  ;;  %v4186_v54 = vld [vmem:[%s5752_s3 + $0xa0] sm:$0xff]   ;;  %v215_v56 = vor.u32 %v4459_v45, %v211_v35  ;;  %v4190_v63 = vld [vmem:[%s5752_s3 + $0x98] sm:$0xff]  }
   0xc   :  { %3537 = vmatprep.subr.bf16.mxu0 %v5760_v0  ;;  %4146 = vmatprep.subr.bf16.mxu1 %v5760_v0  ;;  %v219_v52 = vrot.slane %v4453_v43, 1  ;;  %v271_v57 = vor.u32 %v4467_v49, %v267_v38  ;;  %v4496_v58 = vshrl.u32 %v4433_v37, 16  ;;  %v4499_v59 = vshll.u32 %v4476_v51, 16  ;;  %5785 = vst [vmem:[#allocation9_spill] sm:$0xff] %v4502_v60  ;;  %v4189_v61 = vld [vmem:[%s5752_s3 + $0x20] sm:$0xff]   ;;  %v4191_v1 = vld [vmem:[%s5752_s3 + $0x18] sm:$0xff]  }
   0xd   :  { %v4510_v62 = vshll.u32 %v4487_v55, 16  ;;  %v4195_v24 = vld [vmem:[%s5752_s3 + $0x90] sm:$0xff]   ;;  %v4545_v25 = vshll.u32 %v4521_v2, 16  ;;  %v4572_v40 = vrot.slane %v194_v14, 5  ;;  %vm2058_vm8 = vsmask.f32 5376 }
   0xe   :  { %v220_v3 = vsel %vm192_vm1, %v215_v56, %v219_v52  ;;  %v223_v16 = vor.u32 %v4496_v58, %v219_v52  ;;  %v4568_v38 = vld [vmem:[%s5753_s0 + $0x30] sm:$0xff]   ;;  %v4201_v52 = vld [vmem:[%s5752_s3 + $0x80] sm:$0xff]   ;;  %v4606_v56 = vrot.slane %v196_v10, 6 }
   0xf   :  { %3538 = vmatpush3.bf16.msra.mxu0 %v4167_v4  ;;  %4154 = vmatpush3.bf16.msra.mxu1 %v4167_v4  ;;  %5786 = vst [vmem:[#allocation10_spill] sm:$0xff] %v4510_v62  ;;  %v276_v4 = vsel %vm192_vm1, %v271_v57, %v275_v53  ;;  %v283_v23 = vrot.slane %v4510_v62, 1  ;;  %v235_v41 = vrot.slane %v4545_v25, 1 }
  0x10   :  { %3539 = vmatprep.subr.bf16.mxu0 %v5760_v0  ;;  %4147 = vmatprep.subr.bf16.mxu1 %v5760_v0 }
  0x13   :  { %3540 = vmatpush3.bf16.msra.mxu0 %v4168_v5  ;;  %4155 = vmatpush3.bf16.msra.mxu1 %v4168_v5  ;;  %v4193_v5 = vld [vmem:[%s5753_s0 + $0x60] ss:$0 sps:$4 sm:$0xff]  }
  0x14   :  { %3541 = vmatprep.subr.bf16.mxu0 %v5760_v0  ;;  %4148 = vmatprep.subr.bf16.mxu1 %v5760_v0 }
  0x17   :  { %3542 = vmatpush3.bf16.msra.mxu0 %v4169_v9  ;;  %4156 = vmatpush3.bf16.msra.mxu1 %v4169_v9  ;;  %v4194_v9 = vld [vmem:[%s5754_s1 + $0x64] ss:$0 sps:$4 sm:$0xff]  }
  0x18   :  { %3543 = vmatprep.subr.bf16.mxu0 %v5760_v0  ;;  %4149 = vmatprep.subr.bf16.mxu1 %v5760_v0  ;;  %v4547_v26 = vsel %vm154_vm2, %v4193_v5, %v4194_v9 }
  0x19   :  { %v4616_v10 = vshrl.u32 %v4547_v26, 16 }
  0x1b   :  { %3544 = vmatpush3.bf16.msra.mxu0 %v4170_v13  ;;  %4157 = vmatpush3.bf16.msra.mxu1 %v4170_v13  ;;  %v227_v13 = vrot.slane %v4499_v59, 1  ;;  %5790 = vst [vmem:[#allocation14_spill] sm:$0xff] %v4616_v10 }
  0x1c   :  { %3545 = vmatprep.subr.bf16.mxu0 %v5760_v0  ;;  %4150 = vmatprep.subr.bf16.mxu1 %v5760_v0 }
  0x1f   :  { %3546 = vmatpush3.bf16.msra.mxu0 %v4171_v21  ;;  %4158 = vmatpush3.bf16.msra.mxu1 %v4171_v21  ;;  %v279_v21 = vor.u32 %v4502_v60, %v275_v53  ;;  %v4597_v53 = vshrl.u32 %v4521_v2, 16 }
  0x20   :  { %3667 = vmatprep.subr.bf16.mxu0 %v5760_v0  ;;  %3599 = vmatprep.subr.bf16.mxu1 %v5760_v0 }
  0x21   :  { %v284_v35 = vsel %vm192_vm1, %v279_v21, %v283_v23 }
  0x22   :  { %3548 = vmatmul.mubr.bf16.vlgmr.msra.gmra.mxu0 %v204_v30  ;;  %3576 = vmatmul.mubr.bf16.vlgmr.msra.gmra.mxu1 %v260_v31  ;;  %v4196_v30 = vld [vmem:[%s5752_s3 + $0x10] sm:$0xff]   ;;  %v4555_v31 = vshrl.u32 %v4476_v51, 16 }
  0x23   :  { %3668 = vmatpush3.bf16.msra.mxu0 %v4176_v32  ;;  %3551 = vmatprep.mubr.msk.bf16.mxu0 %vm4269_vm0, %v5760_v0  ;;  %v4558_v32 = vshrl.u32 %v4487_v55, 16 }
  0x24   :  { %3579 = vmatprep.mubr.msk.bf16.mxu1 %vm4269_vm0, %v5760_v0  ;;  %3600 = vmatpush3.bf16.msra.mxu1 %v4177_v34  ;;  %v228_v34 = vsel %vm192_vm1, %v223_v16, %v227_v13  ;;  %v231_v14 = vor.u32 %v4555_v31, %v227_v13  ;;  %v4202_v16 = vld [vmem:[%s5752_s3 + $0xf8] sm:$0xff]  }
  0x25   :  { %3669 = vmatprep.subr.bf16.mxu0 %v5760_v0  ;;  %3601 = vmatprep.subr.bf16.mxu1 %v5760_v0  ;;  %5787 = vst [vmem:[#allocation11_spill] sm:$0xff] %v4558_v32 }
  0x26   :  { %v236_v57 = vsel %vm192_vm1, %v231_v14, %v235_v41 }
  0x27   :  { %3670 = vmatpush3.bf16.msra.mxu0 %v4180_v36  ;;  %v4563_v36 = vshll.u32 %v4547_v26, 16 }
  0x28   :  { %3602 = vmatpush3.bf16.msra.mxu1 %v4181_v42  ;;  %3671 = vmatprep.subr.bf16.mxu0 %v5760_v0  ;;  %v4198_v42 = vld [vmem:[%s5752_s3 + $0x8] sm:$0xff]  }
  0x29   :  { %3603 = vmatprep.subr.bf16.mxu1 %v5760_v0  ;;  %5788 = vst [vmem:[#allocation12_spill] sm:$0xff] %v4563_v36 }
  0x2a   :  { %3552 = vmatmul.mubr.bf16.gmra.mxu0 %v212_v47  ;;  %3580 = vmatmul.mubr.bf16.gmra.mxu1 %v268_v48  ;;  %v287_v47 = vor.u32 %v4558_v32, %v283_v23  ;;  %v290_v48 = vrot.slane %v4563_v36, 1  ;;  %v695_v23 = vrot.slane %v4336_v6, 1 }
  0x2b   :  { %3555 = vmatprep.mubr.msk.bf16.mxu0 %vm4269_vm0, %v5760_v0  ;;  %3583 = vmatprep.mubr.msk.bf16.mxu1 %vm4269_vm0, %v5760_v0 }
  0x2c   :  { %3672 = vmatpush3.bf16.msra.mxu0 %v4182_v44  ;;  %3604 = vmatpush3.bf16.msra.mxu1 %v4185_v50  ;;  %v4199_v44 = vld [vmem:[%s5752_s3 + $0x88] sm:$0xff]   ;;  %v4200_v50 = vld [vmem:[%s5752_s3] sm:$0xff]   ;;  %v294_v5 = vor.u32 %v4616_v10, %v290_v48 }
  0x2d   :  { %3673 = vmatprep.subr.bf16.mxu0 %v5760_v0  ;;  %3605 = vmatprep.subr.bf16.mxu1 %v5760_v0 }
  0x30   :  { %3674 = vmatpush3.bf16.msra.mxu0 %v4186_v54  ;;  %3606 = vmatpush3.bf16.msra.mxu1 %v4189_v61  ;;  %v4600_v54 = vshll.u32 %v4568_v38, 16  ;;  %v291_v61 = vsel %vm192_vm1, %v287_v47, %v290_v48  ;;  %v4207_v47 = vld [vmem:[%s5752_s3 + $0x128] sm:$0xff]   ;;  %v4210_v48 = vld [vmem:[%s5752_s3 + $0xd8] sm:$0xff]  }
  0x31   :  { %3675 = vmatprep.subr.bf16.mxu0 %v5760_v0  ;;  %3607 = vmatprep.subr.bf16.mxu1 %v5760_v0 }
  0x32   :  { %3556 = vmatmul.mubr.bf16.gmra.mxu0 %v220_v3  ;;  %3584 = vmatmul.mubr.bf16.gmra.mxu1 %v276_v4  ;;  %5789 = vst [vmem:[#allocation13_spill] sm:$0xff] %v4600_v54  ;;  %v239_v3 = vor.u32 %v4597_v53, %v235_v41  ;;  %v4624_v4 = vshrl.u32 %v4568_v38, 16  ;;  %v698_v41 = vrot.slane %v4385_v20, 1 }
  0x33   :  { %3559 = vmatprep.mubr.msk.bf16.mxu0 %vm4269_vm0, %v5760_v0  ;;  %3587 = vmatprep.mubr.msk.bf16.mxu1 %vm4269_vm0, %v5760_v0 }
  0x34   :  { %3676 = vmatpush3.bf16.msra.mxu0 %v4190_v63  ;;  %3608 = vmatpush3.bf16.msra.mxu1 %v4191_v1  ;;  %v1229_v63 = vor.u32 %v4606_v56, %v4572_v40  ;;  %v243_v1 = vrot.slane %v4600_v54, 1  ;;  %v965_v40 = vrot.slane %v4433_v37, 5 }
  0x35   :  { %3677 = vmatprep.subr.bf16.mxu0 %v5760_v0  ;;  %3609 = vmatprep.subr.bf16.mxu1 %v5760_v0 }
  0x36   :  { %v244_v9 = vsel %vm192_vm1, %v239_v3, %v243_v1  ;;  %v247_v13 = vor.u32 %v4624_v4, %v243_v1  ;;  %v4211_v1 = vld [vmem:[%s5752_s3 + $0x118] sm:$0xff]   ;;  %v4214_v3 = vld [vmem:[%s5752_s3 + $0xc8] sm:$0xff]  }
  0x38   :  { %3678 = vmatpush3.bf16.msra.mxu0 %v4195_v24  ;;  %3610 = vmatpush3.bf16.msra.mxu1 %v4196_v30  ;;  %v252_v21 = vsel %vm192_vm1, %v247_v13, %v251_v18  ;;  %v696_v24 = vrot.slane %v4348_v8, 1  ;;  %v4204_v30 = vld [vmem:[%s5752_s3 + $0xf0] sm:$0xff]   ;;  %v4216_v13 = vld [vmem:[%s5752_s3 + $0xc0] sm:$0xff]  }
  0x39   :  { %3611 = vmatprep.subr.bf16.mxu1 %v5760_v0  ;;  %3679 = vmatprep.subr.bf16.mxu0 %v5760_v0 }
  0x3a   :  { %3560 = vmatmul.mubr.bf16.gmra.mxu0 %v228_v34  ;;  %3588 = vmatmul.mubr.bf16.gmra.mxu1 %v284_v35  ;;  %v697_v18 = vsel %vm694_vm3, %v695_v23, %v696_v24  ;;  %v4203_v34 = vld [vmem:[%s5752_s3 + $0x138] sm:$0xff]   ;;  %v4206_v35 = vld [vmem:[%s5752_s3 + $0xe8] sm:$0xff]   ;;  %v699_v14 = vsel %vm694_vm3, %v696_v24, %v698_v41  ;;  %v704_v23 = vrot.slane %v4521_v2, 1  ;;  %v4217_v24 = vld [vmem:[%s5752_s3 + $0x100] sm:$0xff]  }
  0x3b   :  { %3563 = vmatprep.mubr.msk.bf16.mxu0 %vm4269_vm0, %v5760_v0  ;;  %3591 = vmatprep.mubr.msk.bf16.mxu1 %vm4269_vm0, %v5760_v0 }
  0x3c   :  { %3612 = vmatpush3.bf16.msra.mxu1 %v4198_v42  ;;  %3680 = vmatpush3.bf16.msra.mxu0 %v4199_v44  ;;  %v4205_v42 = vld [vmem:[%s5752_s3 + $0x130] sm:$0xff]   ;;  %v4208_v44 = vld [vmem:[%s5752_s3 + $0xe0] sm:$0xff]  }
  0x3d   :  { %3613 = vmatprep.subr.bf16.mxu1 %v5760_v0  ;;  %3681 = vmatprep.subr.bf16.mxu0 %v5760_v0 }
  0x40   :  { %3614 = vmatpush3.bf16.msra.mxu1 %v4200_v50  ;;  %3682 = vmatpush3.bf16.msra.mxu0 %v4201_v52  ;;  %v700_v50 = vrot.slane %v4433_v37, 1  ;;  %v4209_v52 = vld [vmem:[%s5752_s3 + $0x120] sm:$0xff]  }
  0x41   :  { %3735 = vmatprep.subr.bf16.mxu1 %v5760_v0  ;;  %3803 = vmatprep.subr.bf16.mxu0 %v5760_v0 }
  0x42   :  { %3564 = vmatmul.mubr.bf16.gmra.mxu0 %v236_v57  ;;  %3592 = vmatmul.mubr.bf16.gmra.mxu1 %v291_v61  ;;  %v4212_v57 = vld [vmem:[%s5752_s3 + $0xd0] sm:$0xff]   ;;  %v701_v61 = vsel %vm694_vm3, %v698_v41, %v700_v50 }
  0x43   :  { %3567 = vmatprep.mubr.msk.bf16.mxu0 %vm4269_vm0, %v5760_v0  ;;  %3595 = vmatprep.mubr.msk.bf16.mxu1 %vm4269_vm0, %v5760_v0 }
  0x4a   :  { %3568 = vmatmul.mubr.bf16.gmra.mxu0 %v244_v9  ;;  %3596 = vmatmul.mubr.bf16.gmra.mxu1 %v294_v5  ;;  %v702_v5 = vrot.slane %v4476_v51, 1  ;;  %v4213_v9 = vld [vmem:[%s5752_s3 + $0x110] sm:$0xff]  }
  0x4b   :  { %3571 = vmatprep.mubr.msk.bf16.mxu0 %vm4269_vm0, %v5760_v0  ;;  %3615 = vmatprep.mubr.msk.bf16.mxu1 %vm4269_vm0, %v5760_v0 }
  0x52   :  { %3572 = vmatmul.mubr.bf16.gmra.mxu0 %v252_v21  ;;  %3616 = vmatmul.mubr.bf16.vlgmr.msra.gmra.mxu1 %v4336_v6  ;;  %v4215_v21 = vld [vmem:[%s5752_s3 + $0x108] sm:$0xff]  }
  0x53   :  { %3619 = vmatprep.mubr.msk.bf16.mxu1 %vm4269_vm0, %v5760_v0  ;;  %3683 = vmatprep.mubr.msk.bf16.mxu0 %vm4269_vm0, %v5760_v0 }
  0x54   :  { %3736 = vmatpush3.bf16.msra.mxu1 %v4202_v16  ;;  %v703_v16 = vsel %vm694_vm3, %v700_v50, %v702_v5 }
  0x55   :  { %3737 = vmatprep.subr.bf16.mxu1 %v5760_v0 }
  0x58   :  { %3738 = vmatpush3.bf16.msra.mxu1 %v4204_v30  ;;  %v705_v30 = vsel %vm694_vm3, %v702_v5, %v704_v23  ;;  %v4218_v5 = vld [vmem:[%s5752_s3 + $0x178] sm:$0xff]  }
  0x59   :  { %3739 = vmatprep.subr.bf16.mxu1 %v5760_v0 }
  0x5a   :  { %3620 = vmatmul.mubr.bf16.gmra.mxu1 %v4348_v8  ;;  %3684 = vmatmul.mubr.bf16.vlgmr.msra.gmra.mxu0 %v697_v18  ;;  %v706_v18 = vrot.slane %v4568_v38, 1 }
  0x5b   :  { %3804 = vmatpush3.bf16.msra.mxu0 %v4203_v34  ;;  %3623 = vmatprep.mubr.msk.bf16.mxu1 %vm4269_vm0, %v5760_v0 }
  0x5c   :  { %3687 = vmatprep.mubr.msk.bf16.mxu0 %vm4269_vm0, %v5760_v0  ;;  %3805 = vmatprep.subr.bf16.mxu0 %v5760_v0  ;;  %v707_v34 = vsel %vm694_vm3, %v704_v23, %v706_v18  ;;  %v1235_v23 = vrot.slane %v4405_v27, 6 }
  0x5d   :  { %3740 = vmatpush3.bf16.msra.mxu1 %v4206_v35  ;;  %v708_v35 = vrot.slane %v4341_v7, 1 }
  0x5e   :  { %3741 = vmatprep.subr.bf16.mxu1 %v5760_v0 }
  0x5f   :  { %3806 = vmatpush3.bf16.msra.mxu0 %v4205_v42  ;;  %v709_v41 = vsel %vm694_vm3, %v706_v18, %v708_v35  ;;  %v710_v42 = vrot.slane %v4357_v11, 1 }
  0x60   :  { %3807 = vmatprep.subr.bf16.mxu0 %v5760_v0 }
  0x61   :  { %3742 = vmatpush3.bf16.msra.mxu1 %v4208_v44  ;;  %v711_v44 = vsel %vm694_vm3, %v708_v35, %v710_v42  ;;  %v1239_v35 = vrot.slane %v4453_v43, 6 }
  0x62   :  { %3624 = vmatmul.mubr.bf16.gmra.mxu1 %v4385_v20  ;;  %3688 = vmatmul.mubr.bf16.gmra.mxu0 %v699_v14 }
  0x63   :  { %3627 = vmatprep.mubr.msk.bf16.mxu1 %vm4269_vm0, %v5760_v0  ;;  %3691 = vmatprep.mubr.msk.bf16.mxu0 %vm4269_vm0, %v5760_v0 }
  0x64   :  { %3808 = vmatpush3.bf16.msra.mxu0 %v4207_v47  ;;  %3743 = vmatprep.subr.bf16.mxu1 %v5760_v0 }
  0x65   :  { %3809 = vmatprep.subr.bf16.mxu0 %v5760_v0  ;;  %3744 = vmatpush3.bf16.msra.mxu1 %v4210_v48 }
  0x66   :  { %3745 = vmatprep.subr.bf16.mxu1 %v5760_v0 }
  0x68   :  { %3810 = vmatpush3.bf16.msra.mxu0 %v4209_v52  ;;  %v960_v52 = vrot.slane %v4336_v6, 5  ;;  %v963_v6 = vrot.slane %v4385_v20, 5  ;;  %v4219_v20 = vld [vmem:[%s5752_s3 + $0x1b8] sm:$0xff]  }
  0x69   :  { %3811 = vmatprep.subr.bf16.mxu0 %v5760_v0  ;;  %3746 = vmatpush3.bf16.msra.mxu1 %v4212_v57  ;;  %v961_v57 = vrot.slane %v4348_v8, 5 }
  0x6a   :  { %3628 = vmatmul.mubr.bf16.gmra.mxu1 %v4433_v37  ;;  %3692 = vmatmul.mubr.bf16.gmra.mxu0 %v701_v61  ;;  %v966_v18 = vsel %vm959_vm4, %v963_v6, %v965_v40 }
  0x6b   :  { %3631 = vmatprep.mubr.msk.bf16.mxu1 %vm4269_vm0, %v5760_v0  ;;  %3695 = vmatprep.mubr.msk.bf16.mxu0 %vm4269_vm0, %v5760_v0  ;;  %v962_v61 = vsel %vm959_vm4, %v960_v52, %v961_v57  ;;  %v969_v52 = vrot.slane %v4521_v2, 5 }
  0x6c   :  { %3812 = vmatpush3.bf16.msra.mxu0 %v4211_v1  ;;  %3747 = vmatprep.subr.bf16.mxu1 %v5760_v0  ;;  %v1230_v1 = vrot.slane %v4408_v28, 5 }
  0x6d   :  { %3813 = vmatprep.subr.bf16.mxu0 %v5760_v0  ;;  %3748 = vmatpush3.bf16.msra.mxu1 %v4214_v3  ;;  %v1231_v3 = vrot.slane %v4369_v15, 6 }
  0x6e   :  { %3749 = vmatprep.subr.bf16.mxu1 %v5760_v0 }
  0x6f   :  { %v1232_v8 = vor.u32 %v1231_v3, %v1230_v1  ;;  %v4233_v1 = vld [vmem:[%s5752_s3 + $0x140] sm:$0xff]  }
  0x70   :  { %3814 = vmatpush3.bf16.msra.mxu0 %v4213_v9  ;;  %v4220_v9 = vld [vmem:[%s5752_s3 + $0x170] sm:$0xff]  }
  0x71   :  { %3815 = vmatprep.subr.bf16.mxu0 %v5760_v0  ;;  %3750 = vmatpush3.bf16.msra.mxu1 %v4216_v13  ;;  %v964_v13 = vsel %vm959_vm4, %v961_v57, %v963_v6  ;;  %v1247_v6 = vrot.slane %v4545_v25, 6 }
  0x72   :  { %3632 = vmatmul.mubr.bf16.gmra.mxu1 %v4476_v51  ;;  %3696 = vmatmul.mubr.bf16.gmra.mxu0 %v703_v16  ;;  %v1233_v16 = vsel %vm1226_vm5, %v1229_v63, %v1232_v8  ;;  %v4221_v63 = vld [vmem:[%s5752_s3 + $0x1b0] sm:$0xff]  }
  0x73   :  { %3635 = vmatprep.mubr.msk.bf16.mxu1 %vm4269_vm0, %v5760_v0  ;;  %3699 = vmatprep.mubr.msk.bf16.mxu0 %vm4269_vm0, %v5760_v0 }
  0x74   :  { %3816 = vmatpush3.bf16.msra.mxu0 %v4215_v21  ;;  %3871 = vmatprep.subr.bf16.mxu1 %v5760_v0  ;;  %v1234_v21 = vrot.slane %v4459_v45, 5 }
  0x75   :  { %3817 = vmatprep.subr.bf16.mxu0 %v5760_v0 }
  0x76   :  { %v1236_v56 = vor.u32 %v1235_v23, %v1234_v21  ;;  %v1250_v23 = vrot.slane %v4624_v4, 5 }
  0x78   :  { %3818 = vmatpush3.bf16.msra.mxu0 %v4217_v24  ;;  %v4222_v24 = vld [vmem:[%s5752_s3 + $0x168] sm:$0xff]   ;;  %v1237_v37 = vsel %vm1226_vm5, %v1232_v8, %v1236_v56 }
  0x79   :  { %3939 = vmatprep.subr.bf16.mxu0 %v5760_v0  ;;  %v4231_v8 = vld [vmem:[%s5752_s3 + $0x188] sm:$0xff]  }
  0x7a   :  { %3636 = vmatmul.mubr.bf16.gmra.mxu1 %v4521_v2  ;;  %3700 = vmatmul.mubr.bf16.gmra.mxu0 %v705_v30  ;;  %v4224_v30 = vld [vmem:[%s5752_s3 + $0x160] sm:$0xff]  }
  0x7b   :  { %3639 = vmatprep.mubr.msk.bf16.mxu1 %vm4269_vm0, %v5760_v0  ;;  %3703 = vmatprep.mubr.msk.bf16.mxu0 %vm4269_vm0, %v5760_v0 }
  0x82   :  { %3640 = vmatmul.mubr.bf16.gmra.mxu1 %v4568_v38  ;;  %3704 = vmatmul.mubr.bf16.gmra.mxu0 %v707_v34  ;;  %v1238_v34 = vrot.slane %v4496_v58, 5 }
  0x83   :  { %3643 = vmatprep.mubr.msk.bf16.mxu1 %vm4269_vm0, %v5760_v0  ;;  %3707 = vmatprep.mubr.msk.bf16.mxu0 %vm4269_vm0, %v5760_v0 }
  0x8a   :  { %3644 = vmatmul.mubr.bf16.gmra.mxu1 %v4341_v7  ;;  %3708 = vmatmul.mubr.bf16.gmra.mxu0 %v709_v41  ;;  %v712_v7 = vrot.slane %v4393_v22, 1  ;;  %v4223_v41 = vld [vmem:[%s5752_s3 + $0x1a8] sm:$0xff]  }
  0x8b   :  { %3647 = vmatprep.mubr.msk.bf16.mxu1 %vm4269_vm0, %v5760_v0  ;;  %3711 = vmatprep.mubr.msk.bf16.mxu0 %vm4269_vm0, %v5760_v0 }
  0x8c   :  { %v713_v14 = vsel %vm694_vm3, %v710_v42, %v712_v7  ;;  %v4226_v42 = vld [vmem:[%s5752_s3 + $0x158] sm:$0xff]  }
  0x92   :  { %3648 = vmatmul.mubr.bf16.gmra.mxu1 %v4357_v11  ;;  %3712 = vmatmul.mubr.bf16.gmra.mxu0 %v711_v44  ;;  %v714_v11 = vrot.slane %v4439_v39, 1  ;;  %v967_v44 = vrot.slane %v4476_v51, 5 }
  0x93   :  { %3651 = vmatprep.mubr.msk.bf16.mxu1 %vm4269_vm0, %v5760_v0  ;;  %3715 = vmatprep.mubr.msk.bf16.mxu0 %vm4269_vm0, %v5760_v0 }
  0x94   :  { %v715_v47 = vsel %vm694_vm3, %v712_v7, %v714_v11  ;;  %v1240_v7 = vor.u32 %v1239_v35, %v1238_v34  ;;  %v970_v3 = vsel %vm959_vm4, %v967_v44, %v969_v52 }
  0x96   :  { %v1241_v51 = vsel %vm1226_vm5, %v1236_v56, %v1240_v7  ;;  %v4918_v56 = vld [vmem:[%s5753_s0 + $0x38] sm:$0xff]  }
  0x9a   :  { %3652 = vmatmul.mubr.bf16.gmra.mxu1 %v4393_v22  ;;  %3716 = vmatmul.mubr.bf16.gmra.mxu0 %v713_v14  ;;  %v716_v22 = vrot.slane %v4487_v55, 1  ;;  %v4225_v14 = vld [vmem:[%s5752_s3 + $0x1a0] sm:$0xff]  }
  0x9b   :  { %3655 = vmatprep.mubr.msk.bf16.mxu1 %vm4269_vm0, %v5760_v0  ;;  %3719 = vmatprep.mubr.msk.bf16.mxu0 %vm4269_vm0, %v5760_v0 }
  0x9c   :  { %v717_v48 = vsel %vm694_vm3, %v714_v11, %v716_v22  ;;  %v4228_v11 = vld [vmem:[%s5752_s3 + $0x150] sm:$0xff]  }
  0xa2   :  { %3656 = vmatmul.mubr.bf16.gmra.mxu1 %v4439_v39  ;;  %3720 = vmatmul.mubr.bf16.gmra.mxu0 %v715_v47  ;;  %v718_v39 = vrot.slane %v4547_v26, 1  ;;  %v968_v47 = vsel %vm959_vm4, %v965_v40, %v967_v44  ;;  %v1254_v44 = vrot.slane %v4374_v17, 5 }
  0xa3   :  { %3659 = vmatprep.mubr.msk.bf16.mxu1 %vm4269_vm0, %v5760_v0  ;;  %3723 = vmatprep.mubr.msk.bf16.mxu0 %vm4269_vm0, %v5760_v0 }
  0xa4   :  { %v719_v50 = vsel %vm694_vm3, %v716_v22, %v718_v39  ;;  %v1242_v22 = vrot.slane %v4555_v31, 5 }
  0xaa   :  { %3660 = vmatmul.mubr.bf16.gmra.mxu1 %v4487_v55  ;;  %3724 = vmatmul.mubr.bf16.gmra.mxu0 %v717_v48  ;;  %v1243_v48 = vrot.slane %v4499_v59, 6 }
  0xab   :  { %3663 = vmatprep.mubr.msk.bf16.mxu1 %vm4269_vm0, %v5760_v0  ;;  %3727 = vmatprep.mubr.msk.bf16.mxu0 %vm4269_vm0, %v5760_v0 }
  0xac   :  { %v1244_v57 = vor.u32 %v1243_v48, %v1242_v22  ;;  %v4940_v22 = vld [vmem:[%s5753_s0 + $0x40] sm:$0xff]  }
  0xad   :  { %v975_v48 = vrot.slane %v4940_v22, 5 }
  0xae   :  { %v1245_v2 = vsel %vm1226_vm5, %v1240_v7, %v1244_v57  ;;  %v1255_v7 = vrot.slane %v4360_v12, 6 }
  0xb2   :  { %3664 = vmatmul.mubr.bf16.gmra.mxu1 %v4547_v26  ;;  %3728 = vmatmul.mubr.bf16.gmra.mxu0 %v719_v50  ;;  %v4230_v50 = vld [vmem:[%s5752_s3 + $0x148] sm:$0xff]  }
  0xb3   :  { %3731 = vmatprep.mubr.msk.bf16.mxu0 %vm4269_vm0, %v5760_v0  ;;  %3751 = vmatprep.mubr.msk.bf16.mxu1 %vm4269_vm0, %v5760_v0 }
  0xba   :  { %3732 = vmatmul.mubr.bf16.gmra.mxu0 %v718_v39  ;;  %3752 = vmatmul.mubr.bf16.vlgmr.msra.gmra.mxu1 %v962_v61  ;;  %v4227_v39 = vld [vmem:[%s5752_s3 + $0x198] sm:$0xff]   ;;  %v4229_v61 = vld [vmem:[%s5752_s3 + $0x190] sm:$0xff]  }
  0xbb   :  { %3755 = vmatprep.mubr.msk.bf16.mxu1 %vm4269_vm0, %v5760_v0  ;;  %3819 = vmatprep.mubr.msk.bf16.mxu0 %vm4269_vm0, %v5760_v0 }
  0xbc   :  { %3872 = vmatpush3.bf16.msra.mxu1 %v4218_v5  ;;  %v1246_v5 = vrot.slane %v4597_v53, 5 }
  0xbd   :  { %3873 = vmatprep.subr.bf16.mxu1 %v5760_v0 }
  0xc0   :  { %3874 = vmatpush3.bf16.msra.mxu1 %v4220_v9  ;;  %v971_v9 = vrot.slane %v4568_v38, 5 }
  0xc1   :  { %3875 = vmatprep.subr.bf16.mxu1 %v5760_v0 }
  0xc2   :  { %3756 = vmatmul.mubr.bf16.gmra.mxu1 %v964_v13  ;;  %3820 = vmatmul.mubr.bf16.vlgmr.msra.gmra.mxu0 %v1233_v16  ;;  %v1248_v13 = vor.u32 %v1247_v6, %v1246_v5  ;;  %v4234_v16 = vld [vmem:[%s5752_s3 + $0x180] sm:$0xff]   ;;  %v1259_v5 = vrot.slane %v4378_v19, 6 }
  0xc3   :  { %3940 = vmatpush3.bf16.msra.mxu0 %v4219_v20  ;;  %3759 = vmatprep.mubr.msk.bf16.mxu1 %vm4269_vm0, %v5760_v0  ;;  %v972_v20 = vsel %vm959_vm4, %v969_v52, %v971_v9 }
  0xc4   :  { %3823 = vmatprep.mubr.msk.bf16.mxu0 %vm4269_vm0, %v5760_v0  ;;  %3941 = vmatprep.subr.bf16.mxu0 %v5760_v0  ;;  %v1249_v21 = vsel %vm1226_vm5, %v1244_v57, %v1248_v13 }
  0xc5   :  { %3876 = vmatpush3.bf16.msra.mxu1 %v4222_v24  ;;  %v1251_v24 = vrot.slane %v4600_v54, 6 }
  0xc6   :  { %3877 = vmatprep.subr.bf16.mxu1 %v5760_v0 }
  0xc7   :  { %3942 = vmatpush3.bf16.msra.mxu0 %v4221_v63  ;;  %v973_v63 = vrot.slane %v4918_v56, 5 }
  0xc8   :  { %3943 = vmatprep.subr.bf16.mxu0 %v5760_v0 }
  0xc9   :  { %3878 = vmatpush3.bf16.msra.mxu1 %v4224_v30  ;;  %v1252_v30 = vor.u32 %v1251_v24, %v1250_v23 }
  0xca   :  { %3760 = vmatmul.mubr.bf16.gmra.mxu1 %v966_v18  ;;  %3824 = vmatmul.mubr.bf16.gmra.mxu0 %v1237_v37 }
  0xcb   :  { %3763 = vmatprep.mubr.msk.bf16.mxu1 %vm4269_vm0, %v5760_v0  ;;  %3827 = vmatprep.mubr.msk.bf16.mxu0 %vm4269_vm0, %v5760_v0 }
  0xcc   :  { %3944 = vmatpush3.bf16.msra.mxu0 %v4223_v41  ;;  %3879 = vmatprep.subr.bf16.mxu1 %v5760_v0  ;;  %v974_v41 = vsel %vm959_vm4, %v971_v9, %v973_v63 }
  0xcd   :  { %3945 = vmatprep.subr.bf16.mxu0 %v5760_v0  ;;  %3880 = vmatpush3.bf16.msra.mxu1 %v4226_v42  ;;  %v1253_v42 = vsel %vm1226_vm5, %v1248_v13, %v1252_v30 }
  0xce   :  { %3881 = vmatprep.subr.bf16.mxu1 %v5760_v0 }
  0xd0   :  { %3946 = vmatpush3.bf16.msra.mxu0 %v4225_v14 }
  0xd1   :  { %3947 = vmatprep.subr.bf16.mxu0 %v5760_v0  ;;  %3882 = vmatpush3.bf16.msra.mxu1 %v4228_v11 }
  0xd2   :  { %3764 = vmatmul.mubr.bf16.gmra.mxu1 %v968_v47  ;;  %3828 = vmatmul.mubr.bf16.gmra.mxu0 %v1241_v51 }
  0xd3   :  { %3767 = vmatprep.mubr.msk.bf16.mxu1 %vm4269_vm0, %v5760_v0  ;;  %3831 = vmatprep.mubr.msk.bf16.mxu0 %vm4269_vm0, %v5760_v0 }
  0xd4   :  { %3948 = vmatpush3.bf16.msra.mxu0 %v4227_v39  ;;  %3883 = vmatprep.subr.bf16.mxu1 %v5760_v0  ;;  %v1256_v39 = vor.u32 %v1255_v7, %v1254_v44 }
  0xd5   :  { %3949 = vmatprep.subr.bf16.mxu0 %v5760_v0  ;;  %3884 = vmatpush3.bf16.msra.mxu1 %v4230_v50 }
  0xd6   :  { %3885 = vmatprep.subr.bf16.mxu1 %v5760_v0 }
  0xd8   :  { %3950 = vmatpush3.bf16.msra.mxu0 %v4229_v61 }
  0xd9   :  { %3951 = vmatprep.subr.bf16.mxu0 %v5760_v0  ;;  %3886 = vmatpush3.bf16.msra.mxu1 %v4233_v1  ;;  %v976_v1 = vsel %vm959_vm4, %v973_v63, %v975_v48 }
  0xda   :  { %3768 = vmatmul.mubr.bf16.gmra.mxu1 %v970_v3  ;;  %3832 = vmatmul.mubr.bf16.gmra.mxu0 %v1245_v2  ;;  %v1257_v3 = vsel %vm1226_vm5, %v1252_v30, %v1256_v39  ;;  %v1258_v2 = vrot.slane %v4419_v33, 5 }
  0xdb   :  { %3771 = vmatprep.mubr.msk.bf16.mxu1 %vm4269_vm0, %v5760_v0  ;;  %3835 = vmatprep.mubr.msk.bf16.mxu0 %vm4269_vm0, %v5760_v0 }
  0xdc   :  { %3952 = vmatpush3.bf16.msra.mxu0 %v4231_v8  ;;  %4007 = vmatprep.subr.bf16.mxu1 %v5760_v0 }
  0xdd   :  { %3953 = vmatprep.subr.bf16.mxu0 %v5760_v0 }
  0xe0   :  { %3954 = vmatpush3.bf16.msra.mxu0 %v4234_v16  ;;  %v4962_v16 = vld [vmem:[%s5753_s0 + $0x48] sm:$0xff]  }
  0xe1   :  { %4075 = vmatprep.subr.bf16.mxu0 %v5760_v0 }
  0xe2   :  { %v4907_v38 = vpop.f32.mrf.mxu0  ;;  %v4909_v40 = vpop.f32.mrf.mxu1  ;;  %3772 = vmatmul.mubr.bf16.gmra.mxu1 %v972_v20  ;;  %3836 = vmatmul.mubr.bf16.gmra.mxu0 %v1249_v21  ;;  %v977_v20 = vrot.slane %v4962_v16, 5  ;;  %v1260_v21 = vor.u32 %v1259_v5, %v1258_v2 }
  0xe3   :  { %3775 = vmatprep.mubr.msk.bf16.mxu1 %vm4269_vm0, %v5760_v0  ;;  %3839 = vmatprep.mubr.msk.bf16.mxu0 %vm4269_vm0, %v5760_v0 }
  0xe4   :  { %v3549_v18 = vpop.f32.mrf.mxu0  ;;  %v3577_v37 = vpop.f32.mrf.mxu1 }
  0xe5   :  { %v978_v18 = vsel %vm959_vm4, %v975_v48, %v977_v20  ;;  %v1261_v37 = vsel %vm1226_vm5, %v1256_v39, %v1260_v21  ;;  %v4984_v48 = vld [vmem:[%s5753_s0 + $0x50] sm:$0xff]  }
  0xe6   :  { %v4921_v34 = vpop.f32.mrf.mxu0  ;;  %v4923_v35 = vpop.f32.mrf.mxu1  ;;  %v979_v39 = vrot.slane %v4984_v48, 5 }
  0xe8   :  { %v3550_v14 = vpop.f32.mrf.mxu0  ;;  %v3578_v11 = vpop.f32.mrf.mxu1  ;;  %v980_v5 = vsel %vm959_vm4, %v977_v20, %v979_v39  ;;  %v981_v20 = vrot.slane %v4487_v55, 5 }
  0xea   :  { %v4929_v47 = vpop.f32.mrf.mxu0  ;;  %v4931_v51 = vpop.f32.mrf.mxu1  ;;  %3776 = vmatmul.mubr.bf16.gmra.mxu1 %v974_v41  ;;  %3840 = vmatmul.mubr.bf16.gmra.mxu0 %v1253_v42  ;;  %v1262_v41 = vrot.slane %v4467_v49, 5  ;;  %v1263_v42 = vrot.slane %v4411_v29, 6 }
  0xeb   :  { %3779 = vmatprep.mubr.msk.bf16.mxu1 %vm4269_vm0, %v5760_v0  ;;  %3843 = vmatprep.mubr.msk.bf16.mxu0 %vm4269_vm0, %v5760_v0 }
  0xec   :  { %v3553_v50 = vpop.f32.mrf.mxu0  ;;  %v3581_v52 = vpop.f32.mrf.mxu1 }
  0xed   :  { %v1264_v50 = vor.u32 %v1263_v42, %v1262_v41 }
  0xee   :  { %v4943_v57 = vpop.f32.mrf.mxu0  ;;  %v4945_v61 = vpop.f32.mrf.mxu1 }
  0xf0   :  { %v3554_v6 = vpop.f32.mrf.mxu0  ;;  %v3582_v8 = vpop.f32.mrf.mxu1 }
  0xf1   :  { %v1265_v6 = vsel %vm1226_vm5, %v1260_v21, %v1264_v50  ;;  %v1266_v8 = vrot.slane %v4502_v60, 5 }
  0xf2   :  { %v4951_v9 = vpop.f32.mrf.mxu0  ;;  %v4953_v13 = vpop.f32.mrf.mxu1  ;;  %3780 = vmatmul.mubr.bf16.gmra.mxu1 %v976_v1  ;;  %3844 = vmatmul.mubr.bf16.gmra.mxu0 %v1257_v3 }
  0xf3   :  { %3783 = vmatprep.mubr.msk.bf16.mxu1 %vm4269_vm0, %v5760_v0  ;;  %3847 = vmatprep.mubr.msk.bf16.mxu0 %vm4269_vm0, %v5760_v0 }
  0xf4   :  { %v3557_v23 = vpop.f32.mrf.mxu0  ;;  %v3585_v24 = vpop.f32.mrf.mxu1 }
  0xf5   :  { %v1267_v23 = vrot.slane %v4462_v46, 6 }
  0xf6   :  { %v4965_v63 = vpop.f32.mrf.mxu0  ;;  %v4967_v30 = vpop.f32.mrf.mxu1 }
  0xf7   :  { %v1268_v21 = vor.u32 %v1267_v23, %v1266_v8  ;;  %v5791_v8 = vmov 0.0  }
  0xf8   :  { %v3558_v44 = vpop.f32.mrf.mxu0  ;;  %v3586_v7 = vpop.f32.mrf.mxu1 }
  0xfa   :  { %v4973_v14 = vpop.f32.mrf.mxu0  ;;  %v4975_v11 = vpop.f32.mrf.mxu1  ;;  %3784 = vmatmul.mubr.bf16.gmra.mxu1 %v978_v18  ;;  %3848 = vmatmul.mubr.bf16.gmra.mxu0 %v1261_v37 }
  0xfb   :  { %3787 = vmatprep.mubr.msk.bf16.mxu1 %vm4269_vm0, %v5760_v0  ;;  %3851 = vmatprep.mubr.msk.bf16.mxu0 %vm4269_vm0, %v5760_v0 }
  0xfc   :  { %v3561_v52 = vpop.f32.mrf.mxu0  ;;  %v3589_v1 = vpop.f32.mrf.mxu1 }
  0xfd   :  { %v982_v1 = vsel %vm959_vm4, %v979_v39, %v981_v20  ;;  %v983_v39 = vrot.slane %v4547_v26, 5 }
  0xfe   :  { %v4987_v3 = vpop.f32.mrf.mxu0  ;;  %v4989_v2 = vpop.f32.mrf.mxu1 }
 0x100   :  { %v3562_v24 = vpop.f32.mrf.mxu0  ;;  %v3590_v18 = vpop.f32.mrf.mxu1 }
 0x101   :  { %v1271_v24 = vrot.slane %v4510_v62, 6 }
 0x102   :  { %v4995_v37 = vpop.f32.mrf.mxu0  ;;  %v4997_v44 = vpop.f32.mrf.mxu1  ;;  %3788 = vmatmul.mubr.bf16.gmra.mxu1 %v980_v5  ;;  %3852 = vmatmul.mubr.bf16.gmra.mxu0 %v1265_v6  ;;  %v1269_v5 = vsel %vm1226_vm5, %v1264_v50, %v1268_v21  ;;  %v1270_v6 = vrot.slane %v4558_v32, 5  ;;  %v1275_v32 = vrot.slane %v4563_v36, 6 }
 0x103   :  { %3791 = vmatprep.mubr.msk.bf16.mxu1 %vm4269_vm0, %v5760_v0  ;;  %3855 = vmatprep.mubr.msk.bf16.mxu0 %vm4269_vm0, %v5760_v0 }
 0x104   :  { %v3565_v41 = vpop.f32.mrf.mxu0  ;;  %v3593_v42 = vpop.f32.mrf.mxu1  ;;  %v1272_v50 = vor.u32 %v1271_v24, %v1270_v6 }
 0x106   :  { %v5004_v7 = vpop.f32.mrf.mxu0  ;;  %v5006_v52 = vpop.f32.mrf.mxu1  ;;  %v1273_v62 = vsel %vm1226_vm5, %v1268_v21, %v1272_v50 }
 0x108   :  { %v3566_v18 = vpop.f32.mrf.mxu0  ;;  %v3594_v46 = vpop.f32.mrf.mxu1 }
 0x109   :  { %v984_v18 = vsel %vm959_vm4, %v981_v20, %v983_v39 }
 0x10a   :  { %v5012_v0 = vpop.f32.mrf.mxu0  ;;  %v5014_v55 = vpop.f32.mrf.mxu1  ;;  %3792 = vmatmul.mubr.bf16.gmra.mxu1 %v982_v1  ;;  %3856 = vmatmul.mubr.bf16.gmra.mxu0 %v1269_v5  ;;  %v5028_v1 = vld [vmem:[%s5754_s1 + $0x68] sm:$0xff]   ;;  %v1274_v5 = vrot.slane %v4616_v10, 5 }
 0x10b   :  { %3795 = vmatprep.mubr.msk.bf16.mxu1 %vm4269_vm0, %v5791_v8  ;;  %3859 = vmatprep.mubr.msk.bf16.mxu0 %vm4269_vm0, %v5791_v8  ;;  %v5773_v20 = vshrl.u32 %v5028_v1, 16  ;;  %v5772_v21 = vshll.u32 %v5028_v1, 16 }
 0x10c   :  { %v3569_v23 = vpop.f32.mrf.mxu0  ;;  %v3597_v41 = vpop.f32.mrf.mxu1 }
 0x10e   :  { %v5021_v42 = vpop.f32.mrf.mxu0  ;;  %v489_v46 = vpop.f32.mrf.mxu1 }
 0x10f   :  { %v1276_v46 = vor.u32 %v1275_v32, %v1274_v5 }
 0x110   :  { %v3570_v60 = vpop.f32.mrf.mxu0  ;;  %v3598_v6 = vpop.f32.mrf.mxu1 }
 0x111   :  { %v985_v60 = vrot.slane %v5028_v1, 5  ;;  %v1277_v49 = vsel %vm1226_vm5, %v1272_v50, %v1276_v46 }
 0x112   :  { %v5032_v24 = vpop.f32.mrf.mxu0  ;;  %v574_v23 = vpop.f32.mrf.mxu1  ;;  %3796 = vmatmul.mubr.bf16.gmra.mxu1 %v984_v18  ;;  %3860 = vmatmul.mubr.bf16.gmra.mxu0 %v1273_v62  ;;  %v1281_v18 = vrot.slane %v5773_v20, 5 }
 0x113   :  { %v575_v41 = vadd.f32 %v574_v23, %v4907_v38  ;;  %3799 = vmatprep.mubr.msk.bf16.mxu1 %vm4269_vm0, %v5791_v8  ;;  %3863 = vmatprep.mubr.msk.bf16.mxu0 %vm4269_vm0, %v5791_v8  ;;  %v1284_v38 = vrot.slane %v5772_v21, 6  ;;  %v986_v29 = vsel %vm959_vm4, %v983_v39, %v985_v60 }
 0x114   :  { %v3573_v6 = vpop.f32.mrf.mxu0  ;;  %v3617_v36 = vpop.f32.mrf.mxu1 }
 0x115   :  { %v1285_v36 = vor.u32 %v1284_v38, %v1281_v18 }
 0x116   :  { %v5042_v10 = vpop.f32.mrf.mxu0  ;;  %v577_v62 = vpop.f32.mrf.mxu1 }
 0x117   :  { %v578_v23 = vadd.f32 %v577_v62, %v4921_v34  ;;  %v1286_v62 = vsel %vm1226_vm5, %v1276_v46, %v1285_v36 }
 0x118   :  { %v3574_v19 = vpop.f32.mrf.mxu0  ;;  %v3618_v33 = vpop.f32.mrf.mxu1 }
 0x119   :  { %v4255_v19 = vld [vmem:[%s5753_s0] sm:$0xff]  }
 0x11a   :  { %v582_v32 = vpop.f32.mrf.mxu1  ;;  %v815_v5 = vpop.f32.mrf.mxu0  ;;  %3800 = vmatmul.mubr.bf16.gmra.mxu1 %v986_v29  ;;  %3864 = vmatmul.mubr.bf16.gmra.mxu0 %v1277_v49  ;;  %v1527_v33 = vrot.slane %v4255_v19, 6  ;;  %v5064_v29 = vld [vmem:[%s5753_s0 + $0x8] sm:$0xff]  }
 0x11b   :  { %v583_v6 = vadd.f32 %v582_v32, %v4929_v47  ;;  %v5052_v12 = vadd.f32 %v815_v5, %v575_v41  ;;  %3867 = vmatprep.mubr.msk.bf16.mxu0 %vm4269_vm0, %v5791_v8  ;;  %3887 = vmatprep.mubr.msk.bf16.mxu1 %vm4269_vm0, %v5791_v8  ;;  %v1528_v49 = vrot.slane %v5064_v29, 6  ;;  %v4235_v5 = vld [vmem:[%s5752_s3 + $0x1f8] sm:$0xff]  }
 0x11c   :  { %v3621_v34 = vpop.f32.mrf.mxu1  ;;  %v3685_v47 = vpop.f32.mrf.mxu0 }
 0x11d   :  { %v1529_v18 = vsel %vm1526_vm6, %v1527_v33, %v1528_v49  ;;  %v1794_v33 = vrot.slane %v5064_v29, 2 }
 0x11e   :  { %v585_v39 = vpop.f32.mrf.mxu1  ;;  %v818_v50 = vpop.f32.mrf.mxu0 }
 0x11f   :  { %v586_v41 = vadd.f32 %v585_v39, %v4943_v57  ;;  %v5068_v60 = vadd.f32 %v818_v50, %v578_v23  ;;  %v5078_v57 = vld [vmem:[%s5753_s0 + $0x10] sm:$0xff]  }
 0x120   :  { %v3622_v38 = vpop.f32.mrf.mxu1  ;;  %v3686_v32 = vpop.f32.mrf.mxu0  ;;  %v1530_v23 = vrot.slane %v5078_v57, 6  ;;  %v1795_v47 = vrot.slane %v5078_v57, 2 }
 0x122   :  { %v590_v19 = vpop.f32.mrf.mxu1  ;;  %v823_v34 = vpop.f32.mrf.mxu0  ;;  %3868 = vmatmul.mubr.bf16.gmra.mxu0 %v1286_v62  ;;  %3888 = vmatmul.mubr.bf16.vlgmr.msra.gmra.mxu1 %v1529_v18  ;;  %v1531_v32 = vsel %vm1526_vm6, %v1528_v49, %v1530_v23 }
 0x123   :  { %v591_v46 = vadd.f32 %v590_v19, %v4951_v9  ;;  %v5082_v36 = vadd.f32 %v823_v34, %v583_v6  ;;  %3891 = vmatprep.mubr.msk.bf16.mxu1 %vm4269_vm0, %v5791_v8  ;;  %3955 = vmatprep.mubr.msk.bf16.mxu0 %vm4269_vm0, %v5791_v8  ;;  %v4237_v9 = vld [vmem:[%s5752_s3 + $0x1f0] sm:$0xff]   ;;  %v1796_v19 = vsel %vm1793_vm7, %v1794_v33, %v1795_v47 }
 0x124   :  { %v3625_v39 = vpop.f32.mrf.mxu1  ;;  %v3689_v50 = vpop.f32.mrf.mxu0  ;;  %4008 = vmatpush3.bf16.msra.mxu1 %v4235_v5  ;;  %v4236_v5 = vld [vmem:[%s5752_s3 + $0x238] sm:$0xff]  }
 0x125   :  { %4009 = vmatprep.subr.bf16.mxu1 %v5791_v8  ;;  %v4239_v50 = vld [vmem:[%s5752_s3 + $0x1e8] sm:$0xff]  }
 0x126   :  { %v593_v6 = vpop.f32.mrf.mxu1  ;;  %v826_v62 = vpop.f32.mrf.mxu0 }
 0x127   :  { %v594_v18 = vadd.f32 %v593_v6, %v4965_v63  ;;  %v5095_v38 = vadd.f32 %v826_v62, %v586_v41 }
 0x128   :  { %v3626_v34 = vpop.f32.mrf.mxu1  ;;  %v3690_v39 = vpop.f32.mrf.mxu0  ;;  %4010 = vmatpush3.bf16.msra.mxu1 %v4237_v9  ;;  %v5114_v9 = vld [vmem:[%s5753_s0 + $0x18] sm:$0xff]  }
 0x129   :  { %4011 = vmatprep.subr.bf16.mxu1 %v5791_v8  ;;  %v1532_v6 = vrot.slane %v5114_v9, 6  ;;  %v1797_v62 = vrot.slane %v5114_v9, 2 }
 0x12a   :  { %v598_v63 = vpop.f32.mrf.mxu1  ;;  %v831_v41 = vpop.f32.mrf.mxu0  ;;  %3892 = vmatmul.mubr.bf16.gmra.mxu1 %v1531_v32  ;;  %3956 = vmatmul.mubr.bf16.vlgmr.msra.gmra.mxu0 %v1796_v19  ;;  %v4238_v32 = vld [vmem:[%s5752_s3 + $0x230] sm:$0xff]   ;;  %v4241_v19 = vld [vmem:[%s5752_s3 + $0x1e0] sm:$0xff]  }
 0x12b   :  { %v599_v49 = vadd.f32 %v598_v63, %v4973_v14  ;;  %v5107_v33 = vadd.f32 %v831_v41, %v591_v46  ;;  %4076 = vmatpush3.bf16.msra.mxu0 %v4236_v5  ;;  %3895 = vmatprep.mubr.msk.bf16.mxu1 %vm4269_vm0, %v5791_v8  ;;  %v1533_v41 = vsel %vm1526_vm6, %v1530_v23, %v1532_v6 }
 0x12c   :  { %v3629_v14 = vpop.f32.mrf.mxu1  ;;  %v3693_v46 = vpop.f32.mrf.mxu0  ;;  %3959 = vmatprep.mubr.msk.bf16.mxu0 %vm4269_vm0, %v5791_v8  ;;  %4077 = vmatprep.subr.bf16.mxu0 %v5791_v8 }
 0x12d   :  { %4012 = vmatpush3.bf16.msra.mxu1 %v4239_v50  ;;  %v1798_v14 = vsel %vm1793_vm7, %v1795_v47, %v1797_v62  ;;  %v4240_v50 = vld [vmem:[%s5752_s3 + $0x228] sm:$0xff]  }
 0x12e   :  { %v601_v5 = vpop.f32.mrf.mxu1  ;;  %v834_v34 = vpop.f32.mrf.mxu0  ;;  %4013 = vmatprep.subr.bf16.mxu1 %v5791_v8 }
 0x12f   :  { %v602_v39 = vadd.f32 %v601_v5, %v4987_v3  ;;  %v5129_v63 = vadd.f32 %v834_v34, %v594_v18  ;;  %4078 = vmatpush3.bf16.msra.mxu0 %v4238_v32  ;;  %v4243_v3 = vld [vmem:[%s5752_s3 + $0x1d8] sm:$0xff]  }
 0x130   :  { %v3630_v46 = vpop.f32.mrf.mxu1  ;;  %v3694_v21 = vpop.f32.mrf.mxu0  ;;  %4079 = vmatprep.subr.bf16.mxu0 %v5791_v8 }
 0x131   :  { %4014 = vmatpush3.bf16.msra.mxu1 %v4241_v19  ;;  %v5150_v21 = vld [vmem:[%s5753_s0 + $0x20] sm:$0xff]  }
 0x132   :  { %v606_v18 = vpop.f32.mrf.mxu1  ;;  %v839_v5 = vpop.f32.mrf.mxu0  ;;  %3896 = vmatmul.mubr.bf16.gmra.mxu1 %v1533_v41  ;;  %3960 = vmatmul.mubr.bf16.gmra.mxu0 %v1798_v14  ;;  %v1534_v32 = vrot.slane %v5150_v21, 6  ;;  %v1799_v19 = vrot.slane %v5150_v21, 2 }
 0x133   :  { %v607_v23 = vadd.f32 %v606_v18, %v4995_v37  ;;  %v5141_v47 = vadd.f32 %v839_v5, %v599_v49  ;;  %3899 = vmatprep.mubr.msk.bf16.mxu1 %vm4269_vm0, %v5791_v8  ;;  %3963 = vmatprep.mubr.msk.bf16.mxu0 %vm4269_vm0, %v5791_v8  ;;  %v4242_v37 = vld [vmem:[%s5752_s3 + $0x220] sm:$0xff]   ;;  %v4245_v49 = vld [vmem:[%s5752_s3 + $0x1d0] sm:$0xff]  }
 0x134   :  { %v3633_v34 = vpop.f32.mrf.mxu1  ;;  %v3697_v41 = vpop.f32.mrf.mxu0  ;;  %4080 = vmatpush3.bf16.msra.mxu0 %v4240_v50  ;;  %4015 = vmatprep.subr.bf16.mxu1 %v5791_v8  ;;  %v1535_v5 = vsel %vm1526_vm6, %v1532_v6, %v1534_v32 }
 0x135   :  { %4081 = vmatprep.subr.bf16.mxu0 %v5791_v8  ;;  %4016 = vmatpush3.bf16.msra.mxu1 %v4243_v3  ;;  %v1800_v34 = vsel %vm1793_vm7, %v1797_v62, %v1799_v19  ;;  %v4244_v3 = vld [vmem:[%s5752_s3 + $0x218] sm:$0xff]  }
 0x136   :  { %v609_v14 = vpop.f32.mrf.mxu1  ;;  %v842_v46 = vpop.f32.mrf.mxu0  ;;  %4017 = vmatprep.subr.bf16.mxu1 %v5791_v8 }
 0x137   :  { %v610_v18 = vadd.f32 %v609_v14, %v5004_v7  ;;  %v5164_v50 = vadd.f32 %v842_v46, %v602_v39  ;;  %v4247_v7 = vld [vmem:[%s5752_s3 + $0x1c8] sm:$0xff]  }
 0x138   :  { %v3634_v41 = vpop.f32.mrf.mxu1  ;;  %v3698_v20 = vpop.f32.mrf.mxu0  ;;  %4082 = vmatpush3.bf16.msra.mxu0 %v4242_v37 }
 0x139   :  { %4083 = vmatprep.subr.bf16.mxu0 %v5791_v8  ;;  %4018 = vmatpush3.bf16.msra.mxu1 %v4245_v49  ;;  %v5185_v20 = vld [vmem:[%s5753_s0 + $0x28] sm:$0xff]  }
 0x13a   :  { %v614_v39 = vpop.f32.mrf.mxu1  ;;  %v847_v14 = vpop.f32.mrf.mxu0  ;;  %3900 = vmatmul.mubr.bf16.gmra.mxu1 %v1535_v5  ;;  %3964 = vmatmul.mubr.bf16.gmra.mxu0 %v1800_v34  ;;  %5792 = vst [vmem:[#allocation15_spill] sm:$0xff] %v5185_v20  ;;  %v1536_v37 = vrot.slane %v5185_v20, 6  ;;  %v1801_v49 = vrot.slane %v5185_v20, 2 }
 0x13b   :  { %v615_v6 = vadd.f32 %v614_v39, %v5012_v0  ;;  %v5176_v62 = vadd.f32 %v847_v14, %v607_v23  ;;  %3903 = vmatprep.mubr.msk.bf16.mxu1 %vm4269_vm0, %v5791_v8  ;;  %3967 = vmatprep.mubr.msk.bf16.mxu0 %vm4269_vm0, %v5791_v8  ;;  %v4246_v0 = vld [vmem:[%s5752_s3 + $0x210] sm:$0xff]   ;;  %v4249_v23 = vld [vmem:[%s5752_s3 + $0x1c0] sm:$0xff]  }
 0x13c   :  { %v3637_v46 = vpop.f32.mrf.mxu1  ;;  %v3701_v5 = vpop.f32.mrf.mxu0  ;;  %4084 = vmatpush3.bf16.msra.mxu0 %v4244_v3  ;;  %4019 = vmatprep.subr.bf16.mxu1 %v5791_v8  ;;  %v1537_v14 = vsel %vm1526_vm6, %v1534_v32, %v1536_v37 }
 0x13d   :  { %4085 = vmatprep.subr.bf16.mxu0 %v5791_v8  ;;  %4020 = vmatpush3.bf16.msra.mxu1 %v4247_v7  ;;  %v1802_v46 = vsel %vm1793_vm7, %v1799_v19, %v1801_v49  ;;  %v4248_v7 = vld [vmem:[%s5752_s3 + $0x208] sm:$0xff]  }
 0x13e   :  { %v617_v34 = vpop.f32.mrf.mxu1  ;;  %v850_v41 = vpop.f32.mrf.mxu0  ;;  %4021 = vmatprep.subr.bf16.mxu1 %v5791_v8 }
 0x13f   :  { %v618_v39 = vadd.f32 %v617_v34, %v5021_v42  ;;  %v5199_v3 = vadd.f32 %v850_v41, %v610_v18 }
 0x140   :  { %v3638_v5 = vpop.f32.mrf.mxu1  ;;  %v3702_v17 = vpop.f32.mrf.mxu0  ;;  %4086 = vmatpush3.bf16.msra.mxu0 %v4246_v0 }
 0x141   :  { %4087 = vmatprep.subr.bf16.mxu0 %v5791_v8  ;;  %4022 = vmatpush3.bf16.msra.mxu1 %v4249_v23  ;;  %v5217_v17 = vld [vmem:[%s5753_s0 + $0x30] sm:$0xff]  }
 0x142   :  { %v622_v20 = vpop.f32.mrf.mxu1  ;;  %v855_v54 = vpop.f32.mrf.mxu0  ;;  %3904 = vmatmul.mubr.bf16.gmra.mxu1 %v1537_v14  ;;  %3968 = vmatmul.mubr.bf16.gmra.mxu0 %v1802_v46  ;;  %5793 = vst [vmem:[#allocation16_spill] sm:$0xff] %v5217_v17  ;;  %v1538_v32 = vrot.slane %v5217_v17, 6  ;;  %v1803_v19 = vrot.slane %v5217_v17, 2 }
 0x143   :  { %v623_v42 = vadd.f32 %v622_v20, %v5032_v24  ;;  %v5208_v18 = vadd.f32 %v855_v54, %v615_v6  ;;  %3907 = vmatprep.mubr.msk.bf16.mxu1 %vm4269_vm0, %v5791_v8  ;;  %3971 = vmatprep.mubr.msk.bf16.mxu0 %vm4269_vm0, %v5791_v8  ;;  %v4250_v54 = vld [vmem:[%s5752_s3 + $0x200] sm:$0xff]  }
 0x144   :  { %v3641_v0 = vpop.f32.mrf.mxu1  ;;  %v3705_v23 = vpop.f32.mrf.mxu0  ;;  %4088 = vmatpush3.bf16.msra.mxu0 %v4248_v7  ;;  %v1539_v41 = vsel %vm1526_vm6, %v1536_v37, %v1538_v32  ;;  %v1804_v14 = vsel %vm1793_vm7, %v1801_v49, %v1803_v19  ;;  %v1805_v37 = vrot.slane %v4918_v56, 2 }
 0x145   :  { %4089 = vmatprep.subr.bf16.mxu0 %v5791_v8 }
 0x146   :  { %v625_v24 = vpop.f32.mrf.mxu1  ;;  %v858_v6 = vpop.f32.mrf.mxu0 }
 0x147   :  { %v626_v20 = vadd.f32 %v625_v24, %v5042_v10  ;;  %v5226_v34 = vadd.f32 %v858_v6, %v618_v39  ;;  %v1540_v10 = vrot.slane %v4918_v56, 6  ;;  %v1542_v56 = vrot.slane %v4940_v22, 6 }
 0x148   :  { %v3642_v46 = vpop.f32.mrf.mxu1  ;;  %v3706_v5 = vpop.f32.mrf.mxu0  ;;  %4090 = vmatpush3.bf16.msra.mxu0 %v4250_v54 }
 0x14a   :  { %v630_v7 = vpop.f32.mrf.mxu1  ;;  %v863_v0 = vpop.f32.mrf.mxu0  ;;  %3908 = vmatmul.mubr.bf16.gmra.mxu1 %v1539_v41  ;;  %3972 = vmatmul.mubr.bf16.gmra.mxu0 %v1804_v14  ;;  %v1541_v41 = vsel %vm1526_vm6, %v1538_v32, %v1540_v10  ;;  %v1807_v32 = vrot.slane %v4940_v22, 2 }
 0x14b   :  { %v5230_v23 = vadd.f32 %v863_v0, %v623_v42  ;;  %3911 = vmatprep.mubr.msk.bf16.mxu1 %vm4269_vm0, %v5791_v8  ;;  %3975 = vmatprep.mubr.msk.bf16.mxu0 %vm4269_vm0, %v5791_v8  ;;  %v1806_v42 = vsel %vm1793_vm7, %v1803_v19, %v1805_v37  ;;  %v631_v5 = vadd.f32 %v630_v7, %v4909_v40 }
 0x14c   :  { %v3645_v49 = vpop.f32.mrf.mxu1  ;;  %v3709_v39 = vpop.f32.mrf.mxu0 }
 0x14d   :  { %5794 = vst [vmem:[#allocation17_spill] sm:$0xff] %v5230_v23  ;;  %v4270_v39 = vmov 0  }
 0x14e   :  { %v633_v24 = vpop.f32.mrf.mxu1  ;;  %v866_v54 = vpop.f32.mrf.mxu0  ;;  %4162 = vset.pattern.permute.xlu0 %v4270_v39  ;;  %4163 = vset.pattern.permute.xlu1 %v4270_v39  ;;  %v2599_v39 = vld [vmem:[%s5755_s2 + $0x10] sm:$0xff] }
 0x14f   :  { %v5238_v6 = vadd.f32 %v866_v54, %v626_v20  ;;  %v634_v40 = vadd.f32 %v633_v24, %v4923_v35  ;;  %2634 = vperm.xlu1 %4163, %v2599_v39   ;;  %v2602_v39 = vld [vmem:[%s5755_s2 + $0x28] sm:$0xff] }
 0x150   :  { %v3646_v14 = vpop.f32.mrf.mxu1  ;;  %v3710_v46 = vpop.f32.mrf.mxu0 }
 0x152   :  { %v638_v0 = vpop.f32.mrf.mxu1  ;;  %v871_v17 = vpop.f32.mrf.mxu0  ;;  %3912 = vmatmul.mubr.bf16.gmra.mxu1 %v1541_v41  ;;  %3976 = vmatmul.mubr.bf16.gmra.mxu0 %v1806_v42  ;;  %v1543_v41 = vsel %vm1526_vm6, %v1540_v10, %v1542_v56  ;;  %v1808_v42 = vsel %vm1793_vm7, %v1805_v37, %v1807_v32  ;;  %v1544_v10 = vrot.slane %v4962_v16, 6 }
 0x153   :  { %v5243_v23 = vadd.f32 %v871_v17, %v631_v5  ;;  %3915 = vmatprep.mubr.msk.bf16.mxu1 %vm4269_vm0, %v5791_v8  ;;  %3979 = vmatprep.mubr.msk.bf16.mxu0 %vm4269_vm0, %v5791_v8  ;;  %v2597_v17 = vld [vmem:[%s5755_s2] sm:$0xff]  ;;  %v639_v35 = vadd.f32 %v638_v0, %v4931_v51  ;;  %v2598_v5 = vld [vmem:[%s5755_s2 + $0x8] sm:$0xff]  ;;  %v1809_v51 = vrot.slane %v4962_v16, 2 }
 0x154   :  { %v3649_v19 = vpop.f32.mrf.mxu1  ;;  %v3713_v20 = vpop.f32.mrf.mxu0  ;;  %2624 = vperm.xlu0 %4162, %v2597_v17   ;;  %v2601_v17 = vld [vmem:[%s5755_s2 + $0x20] sm:$0xff] }
 0x155   :  { %v1810_v16 = vsel %vm1793_vm7, %v1807_v32, %v1809_v51  ;;  %v1811_v32 = vrot.slane %v4984_v48, 2 }
 0x156   :  { %v641_v7 = vpop.f32.mrf.mxu1  ;;  %v874_v49 = vpop.f32.mrf.mxu0 }
 0x157   :  { %v5255_v54 = vadd.f32 %v874_v49, %v634_v40  ;;  %v642_v20 = vadd.f32 %v641_v7, %v4945_v61 }
 0x158   :  { %v3650_v22 = vpop.f32.mrf.mxu1  ;;  %v3714_v14 = vpop.f32.mrf.mxu0  ;;  %2629 = vperm.xlu0 %4162, %v2598_v5  }
 0x15a   :  { %v646_v24 = vpop.f32.mrf.mxu1  ;;  %v879_v46 = vpop.f32.mrf.mxu0  ;;  %3916 = vmatmul.mubr.bf16.gmra.mxu1 %v1543_v41  ;;  %3980 = vmatmul.mubr.bf16.gmra.mxu0 %v1808_v42  ;;  %v1545_v42 = vsel %vm1526_vm6, %v1542_v56, %v1544_v10  ;;  %v2603_v56 = vld [vmem:[%s5755_s2 + $0x30] sm:$0xff] }
 0x15b   :  { %v5263_v19 = vadd.f32 %v879_v46, %v639_v35  ;;  %3919 = vmatprep.mubr.msk.bf16.mxu1 %vm4269_vm0, %v5791_v8  ;;  %3983 = vmatprep.mubr.msk.bf16.mxu0 %vm4269_vm0, %v5791_v8  ;;  %v647_v61 = vadd.f32 %v646_v24, %v4953_v13  ;;  %v2600_v46 = vld [vmem:[%s5755_s2 + $0x18] sm:$0xff]  ;;  %v1546_v13 = vrot.slane %v4984_v48, 6 }
 0x15c   :  { %v3653_v37 = vpop.f32.mrf.mxu1  ;;  %v3717_v0 = vpop.f32.mrf.mxu0  ;;  %2644 = vperm.xlu0 %4162, %v2601_v17   ;;  %2639 = vperm.xlu1 %4163, %v2600_v46   ;;  %v2605_v17 = vld [vmem:[%s5755_s2 + $0x40] sm:$0xff] }
 0x15d   :  { %v1547_v48 = vsel %vm1526_vm6, %v1544_v10, %v1546_v13  ;;  %v2607_v10 = vld [vmem:[%s5755_s2 + $0x50] sm:$0xff] }
 0x15e   :  { %v649_v40 = vpop.f32.mrf.mxu1  ;;  %v882_v49 = vpop.f32.mrf.mxu0 }
 0x15f   :  { %v5278_v41 = vadd.f32 %v882_v49, %v642_v20  ;;  %v650_v0 = vadd.f32 %v649_v40, %v4967_v30 }
 0x160   :  { %v3654_v22 = vpop.f32.mrf.mxu1  ;;  %v3718_v14 = vpop.f32.mrf.mxu0  ;;  %2654 = vperm.xlu0 %4162, %v2603_v56   ;;  %2649 = vperm.xlu1 %4163, %v2602_v39   ;;  %v2606_v39 = vld [vmem:[%s5755_s2 + $0x48] sm:$0xff] }
 0x162   :  { %v654_v7 = vpop.f32.mrf.mxu1  ;;  %v887_v35 = vpop.f32.mrf.mxu0  ;;  %3920 = vmatmul.mubr.bf16.gmra.mxu1 %v1545_v42  ;;  %3984 = vmatmul.mubr.bf16.gmra.mxu0 %v1810_v16  ;;  %v1812_v16 = vsel %vm1793_vm7, %v1809_v51, %v1811_v32 }
 0x163   :  { %v5289_v5 = vadd.f32 %v887_v35, %v647_v61  ;;  %3923 = vmatprep.mubr.msk.bf16.mxu1 %vm4269_vm0, %v5791_v8  ;;  %3987 = vmatprep.mubr.msk.bf16.mxu0 %vm4269_vm0, %v5791_v8  ;;  %v655_v30 = vadd.f32 %v654_v7, %v4975_v11  ;;  %v2604_v35 = vld [vmem:[%s5755_s2 + $0x38] sm:$0xff] }
 0x164   :  { %v3657_v24 = vpop.f32.mrf.mxu1  ;;  %v3721_v37 = vpop.f32.mrf.mxu0  ;;  %2664 = vperm.xlu0 %4162, %v2605_v17   ;;  %v5324_v11 = vld [vmem:[%s5753_s0 + $0x58] sm:$0xff]   ;;  %2659 = vperm.xlu1 %4163, %v2604_v35   ;;  %v2609_v17 = vld [vmem:[%s5755_s2 + $0x60] sm:$0xff] }
 0x165   :  { %v1548_v51 = vrot.slane %v5324_v11, 6  ;;  %v1813_v7 = vrot.slane %v5324_v11, 2  ;;  %v2608_v35 = vld [vmem:[%s5755_s2 + $0x58] sm:$0xff] }
 0x166   :  { %v657_v20 = vpop.f32.mrf.mxu1  ;;  %v890_v49 = vpop.f32.mrf.mxu0 }
 0x167   :  { %v5304_v42 = vadd.f32 %v890_v49, %v650_v0  ;;  %v658_v37 = vadd.f32 %v657_v20, %v4989_v2 }
 0x168   :  { %v3658_v22 = vpop.f32.mrf.mxu1  ;;  %v3722_v14 = vpop.f32.mrf.mxu0  ;;  %2674 = vperm.xlu0 %4162, %v2607_v10   ;;  %2669 = vperm.xlu1 %4163, %v2606_v39   ;;  %v2610_v39 = vld [vmem:[%s5755_s2 + $0x68] sm:$0xff] }
 0x169   :  { %v1814_v22 = vsel %vm1793_vm7, %v1811_v32, %v1813_v7  ;;  %v1815_v32 = vrot.slane %v4547_v26, 2 }
 0x16a   :  { %v662_v40 = vpop.f32.mrf.mxu1  ;;  %v895_v61 = vpop.f32.mrf.mxu0  ;;  %3924 = vmatmul.mubr.bf16.gmra.mxu1 %v1547_v48  ;;  %3988 = vmatmul.mubr.bf16.gmra.mxu0 %v1812_v16  ;;  %v1549_v16 = vsel %vm1526_vm6, %v1546_v13, %v1548_v51  ;;  %v2611_v13 = vld [vmem:[%s5755_s2 + $0x70] sm:$0xff] }
 0x16b   :  { %v5315_v46 = vadd.f32 %v895_v61, %v655_v30  ;;  %3927 = vmatprep.mubr.msk.bf16.mxu1 %vm4269_vm0, %v5791_v8  ;;  %3991 = vmatprep.mubr.msk.bf16.mxu0 %vm4269_vm0, %v5791_v8  ;;  %v663_v2 = vadd.f32 %v662_v40, %v4997_v44  ;;  %v1550_v44 = vrot.slane %v4547_v26, 6 }
 0x16c   :  { %v3661_v56 = vpop.f32.mrf.mxu1  ;;  %v3725_v24 = vpop.f32.mrf.mxu0  ;;  %2684 = vperm.xlu0 %4162, %v2609_v17   ;;  %2679 = vperm.xlu1 %4163, %v2608_v35   ;;  %v2613_v17 = vld [vmem:[%s5755_s2 + $0x80] sm:$0xff]  ;;  %v1552_v35 = vrot.slane %v5028_v1, 6 }
 0x16e   :  { %v665_v0 = vpop.f32.mrf.mxu1  ;;  %v898_v49 = vpop.f32.mrf.mxu0 }
 0x16f   :  { %v5335_v48 = vadd.f32 %v898_v49, %v658_v37  ;;  %v666_v24 = vadd.f32 %v665_v0, %v5006_v52 }
 0x170   :  { %v3662_v14 = vpop.f32.mrf.mxu1  ;;  %v3726_v30 = vpop.f32.mrf.mxu0  ;;  %2694 = vperm.xlu0 %4162, %v2611_v13   ;;  %2689 = vperm.xlu1 %4163, %v2610_v39   ;;  %v2612_v13 = vld [vmem:[%s5755_s2 + $0x78] sm:$0xff]  ;;  %v2059_v39 = vrot.slane %v4408_v28, 2 }
 0x171   :  { %v1816_v14 = vsel %vm1793_vm7, %v1813_v7, %v1815_v32 }
 0x172   :  { %v670_v20 = vpop.f32.mrf.mxu1  ;;  %v903_v61 = vpop.f32.mrf.mxu0  ;;  %3928 = vmatmul.mubr.bf16.gmra.mxu1 %v1549_v16  ;;  %3992 = vmatmul.mubr.bf16.gmra.mxu0 %v1814_v22  ;;  %v1551_v22 = vsel %vm1526_vm6, %v1548_v51, %v1550_v44  ;;  %v2615_v51 = vld [vmem:[%s5755_s2 + $0x90] sm:$0xff] }
 0x173   :  { %v5346_v10 = vadd.f32 %v903_v61, %v663_v2  ;;  %3931 = vmatprep.mubr.msk.bf16.mxu1 %vm4269_vm0, %v5791_v8  ;;  %3995 = vmatprep.mubr.msk.bf16.mxu0 %vm4269_vm0, %v5791_v8  ;;  %v671_v52 = vadd.f32 %v670_v20, %v5014_v55  ;;  %v1817_v55 = vrot.slane %v5028_v1, 2 }
 0x174   :  { %v3665_v40 = vpop.f32.mrf.mxu1  ;;  %v3729_v56 = vpop.f32.mrf.mxu0  ;;  %2704 = vperm.xlu0 %4162, %v2613_v17   ;;  %2699 = vperm.xlu1 %4163, %v2612_v13   ;;  %v2614_v17 = vld [vmem:[%s5755_s2 + $0x88] sm:$0xff] }
 0x176   :  { %v673_v37 = vpop.f32.mrf.mxu1  ;;  %v906_v49 = vpop.f32.mrf.mxu0 }
 0x177   :  { %v5361_v16 = vadd.f32 %v906_v49, %v666_v24  ;;  %v1553_v49 = vsel %vm1526_vm6, %v1550_v44, %v1552_v35  ;;  %v2063_v44 = vrot.slane %v4405_v27, 3  ;;  %v2616_v35 = vld [vmem:[%s5755_s2 + $0x98] sm:$0xff] }
 0x178   :  { %v3666_v30 = vpop.f32.mrf.mxu1  ;;  %v3730_v2 = vpop.f32.mrf.mxu0  ;;  %2714 = vperm.xlu0 %4162, %v2615_v51   ;;  %2709 = vperm.xlu1 %4163, %v2614_v17  }
 0x179   :  { %v1818_v30 = vsel %vm1793_vm7, %v1815_v32, %v1817_v55  ;;  %v2062_v2 = vrot.slane %v4459_v45, 2 }
 0x17a   :  { %v911_v0 = vpop.f32.mrf.mxu0  ;;  %v1082_v61 = vpop.f32.mrf.mxu1  ;;  %3932 = vmatmul.mubr.bf16.gmra.mxu1 %v1551_v22  ;;  %3996 = vmatmul.mubr.bf16.gmra.mxu0 %v1816_v14  ;;  %v2617_v22 = vld [vmem:[%s5755_s2 + $0xa0] sm:$0xff] }
 0x17b   :  { %v5373_v7 = vadd.f32 %v911_v0, %v671_v52  ;;  %v1184_v40 = vadd.f32 %v1082_v61, %v5052_v12  ;;  %3935 = vmatprep.mubr.msk.bf16.mxu1 %vm4269_vm0, %v5791_v8  ;;  %3999 = vmatprep.mubr.msk.bf16.mxu0 %vm4269_vm0, %v5791_v8  ;;  %v2060_v12 = vrot.slane %v4369_v15, 3  ;;  %v2064_v32 = vor.u32 %v2063_v44, %v2062_v2  ;;  %v2620_v2 = vld [vmem:[%s5755_s2 + $0xb8] sm:$0xff] }
 0x17c   :  { %v3733_v20 = vpop.f32.mrf.mxu0  ;;  %v3753_v56 = vpop.f32.mrf.mxu1  ;;  %2724 = vperm.xlu0 %4162, %v2617_v22   ;;  %2719 = vperm.xlu1 %4163, %v2616_v35  }
 0x17d   :  { %v2061_v61 = vor.u32 %v2060_v12, %v2059_v39 }
 0x17e   :  { %v914_v24 = vpop.f32.mrf.mxu0  ;;  %v1085_v37 = vpop.f32.mrf.mxu1 }
 0x17f   :  { %v1185_v14 = vadd.f32 %v1085_v37, %v5068_v60  ;;  %v2619_v60 = vld [vmem:[%s5755_s2 + $0xb0] sm:$0xff]  ;;  %v2066_v24 = vrot.slane %v4496_v58, 2  ;;  %v2621_v37 = vld [vmem:[%s5755_s2 + $0xc0] sm:$0xff]  ;;  %v2065_v12 = vsel %vm2058_vm8, %v2061_v61, %v2064_v32  ;;  %v2071_v61 = vrot.slane %v4499_v59, 3 }
 0x180   :  { %v3734_v52 = vpop.f32.mrf.mxu0  ;;  %v3754_v28 = vpop.f32.mrf.mxu1  ;;  %2734 = vperm.xlu0 %4162, %v2619_v60  }
 0x182   :  { %v1090_v15 = vpop.f32.mrf.mxu1  ;;  %v1382_v0 = vpop.f32.mrf.mxu0  ;;  %3936 = vmatmul.mubr.bf16.gmra.mxu1 %v1553_v49  ;;  %4000 = vmatmul.mubr.bf16.gmra.mxu0 %v1818_v30 }
 0x183   :  { %v1186_v45 = vadd.f32 %v1090_v15, %v5082_v36  ;;  %v5401_v27 = vadd.f32 %v1382_v0, %v1184_v40  ;;  %4003 = vmatprep.mubr.msk.bf16.mxu0 %vm4269_vm0, %v5791_v8  ;;  %4023 = vmatprep.mubr.msk.bf16.mxu1 %vm4269_vm0, %v5791_v8  ;;  %v2067_v36 = vrot.slane %v4453_v43, 3  ;;  %v2618_v40 = vld [vmem:[%s5755_s2 + $0xa8] sm:$0xff] }
 0x184   :  { %v3757_v13 = vpop.f32.mrf.mxu1  ;;  %v3821_v51 = vpop.f32.mrf.mxu0  ;;  %2729 = vperm.xlu1 %4163, %v2618_v40   ;;  %2744 = vperm.xlu0 %4162, %v2621_v37  }
 0x185   :  { %v2068_v30 = vor.u32 %v2067_v36, %v2066_v24  ;;  %v2353_v24 = vrot.slane %v5114_v9, 3 }
 0x186   :  { %v1093_v20 = vpop.f32.mrf.mxu1  ;;  %v1385_v56 = vpop.f32.mrf.mxu0 }
 0x187   :  { %v1187_v49 = vadd.f32 %v1093_v20, %v5095_v38  ;;  %v5416_v39 = vadd.f32 %v1385_v56, %v1185_v14  ;;  %v2350_v14 = vrot.slane %v5064_v29, 3 }
 0x188   :  { %v3758_v17 = vpop.f32.mrf.mxu1  ;;  %v3822_v22 = vpop.f32.mrf.mxu0  ;;  %2739 = vperm.xlu1 %4163, %v2620_v2  }
 0x189   :  { %v2075_v17 = vrot.slane %v4545_v25, 3 }
 0x18a   :  { %v1098_v58 = vpop.f32.mrf.mxu1  ;;  %v1390_v43 = vpop.f32.mrf.mxu0  ;;  %4004 = vmatmul.mubr.bf16.gmra.mxu0 %v1817_v55  ;;  %4024 = vmatmul.mubr.bf16.vlgmr.msra.gmra.mxu1 %v2065_v12  ;;  %v2351_v55 = vrot.slane %v5078_v57, 3 }
 0x18b   :  { %v1188_v44 = vadd.f32 %v1098_v58, %v5107_v33  ;;  %v5423_v38 = vadd.f32 %v1390_v43, %v1186_v45  ;;  %4027 = vmatprep.mubr.msk.bf16.mxu1 %vm4269_vm0, %v5791_v8  ;;  %4091 = vmatprep.mubr.msk.bf16.mxu0 %vm4269_vm0, %v5791_v8  ;;  %v2070_v33 = vrot.slane %v4555_v31, 2  ;;  %v2069_v45 = vsel %vm2058_vm8, %v2064_v32, %v2068_v30 }
 0x18c   :  { %v3761_v52 = vpop.f32.mrf.mxu1  ;;  %v3825_v28 = vpop.f32.mrf.mxu0  ;;  %v2352_v29 = vsel %vm2349_vm9, %v2350_v14, %v2351_v55 }
 0x18d   :  { %v2072_v56 = vor.u32 %v2071_v61, %v2070_v33  ;;  %v2078_v28 = vrot.slane %v4624_v4, 2 }
 0x18e   :  { %v1101_v15 = vpop.f32.mrf.mxu1  ;;  %v1393_v0 = vpop.f32.mrf.mxu0 }
 0x18f   :  { %v1189_v35 = vadd.f32 %v1101_v15, %v5129_v63  ;;  %v5434_v60 = vadd.f32 %v1393_v0, %v1187_v49  ;;  %v2073_v37 = vsel %vm2058_vm8, %v2068_v30, %v2072_v56  ;;  %v2354_v49 = vsel %vm2349_vm9, %v2351_v55, %v2353_v24  ;;  %v5795_v15 = vld [vmem:[#allocation13_spill] sm:$0xff] }
 0x190   :  { %v3762_v13 = vpop.f32.mrf.mxu1  ;;  %v3826_v57 = vpop.f32.mrf.mxu0  ;;  %v2079_v0 = vrot.slane %v5795_v15, 3  ;;  %v5801_v15 = vld [vmem:[#allocation6_spill] sm:$0xff] }
 0x192   :  { %v1106_v51 = vpop.f32.mrf.mxu1  ;;  %v1398_v20 = vpop.f32.mrf.mxu0  ;;  %4028 = vmatmul.mubr.bf16.gmra.mxu1 %v2069_v45  ;;  %4092 = vmatmul.mubr.bf16.vlgmr.msra.gmra.mxu0 %v2352_v29  ;;  %v2080_v57 = vor.u32 %v2079_v0, %v2078_v28  ;;  %v2086_v0 = vrot.slane %v5801_v15, 2 }
 0x193   :  { %v1190_v31 = vadd.f32 %v1106_v51, %v5141_v47  ;;  %v5440_v59 = vadd.f32 %v1398_v20, %v1188_v44  ;;  %4031 = vmatprep.mubr.msk.bf16.mxu1 %vm4269_vm0, %v5791_v8  ;;  %4095 = vmatprep.mubr.msk.bf16.mxu0 %vm4269_vm0, %v5791_v8  ;;  %v2074_v47 = vrot.slane %v4597_v53, 2  ;;  %v2355_v53 = vrot.slane %v5150_v21, 3  ;;  %v5796_v51 = vld [vmem:[#allocation15_spill] sm:$0xff] }
 0x194   :  { %v3765_v63 = vpop.f32.mrf.mxu1  ;;  %v3829_v32 = vpop.f32.mrf.mxu0  ;;  %v2357_v20 = vrot.slane %v5796_v51, 3 }
 0x196   :  { %v1109_v36 = vpop.f32.mrf.mxu1  ;;  %v1401_v40 = vpop.f32.mrf.mxu0 }
 0x197   :  { %v1191_v9 = vadd.f32 %v1109_v36, %v5164_v50  ;;  %v5449_v12 = vadd.f32 %v1401_v40, %v1189_v35  ;;  %v2076_v50 = vor.u32 %v2075_v17, %v2074_v47  ;;  %v2356_v35 = vsel %vm2349_vm9, %v2353_v24, %v2355_v53 }
 0x198   :  { %v3766_v22 = vpop.f32.mrf.mxu1  ;;  %v3830_v58 = vpop.f32.mrf.mxu0  ;;  %v2358_v36 = vsel %vm2349_vm9, %v2355_v53, %v2357_v20 }
 0x199   :  { %v2077_v61 = vsel %vm2058_vm8, %v2072_v56, %v2076_v50  ;;  %v2081_v32 = vsel %vm2058_vm8, %v2076_v50, %v2080_v57  ;;  %v5800_v50 = vld [vmem:[#allocation16_spill] sm:$0xff] }
 0x19a   :  { %v1114_v43 = vpop.f32.mrf.mxu1  ;;  %v1406_v2 = vpop.f32.mrf.mxu0  ;;  %4032 = vmatmul.mubr.bf16.gmra.mxu1 %v2073_v37  ;;  %4096 = vmatmul.mubr.bf16.gmra.mxu0 %v2354_v49  ;;  %v2359_v53 = vrot.slane %v5800_v50, 3 }
 0x19b   :  { %v1192_v44 = vadd.f32 %v1114_v43, %v5176_v62  ;;  %v5454_v14 = vadd.f32 %v1406_v2, %v1190_v31  ;;  %4035 = vmatprep.mubr.msk.bf16.mxu1 %vm4269_vm0, %v5791_v8  ;;  %4099 = vmatprep.mubr.msk.bf16.mxu0 %vm4269_vm0, %v5791_v8  ;;  %v5799_v2 = vld [vmem:[#allocation17_spill] sm:$0xff] }
 0x19c   :  { %v3769_v25 = vpop.f32.mrf.mxu1  ;;  %v3833_v30 = vpop.f32.mrf.mxu0 }
 0x19e   :  { %v1117_v55 = vpop.f32.mrf.mxu1  ;;  %v1409_v52 = vpop.f32.mrf.mxu0 }
 0x19f   :  { %v1193_v62 = vadd.f32 %v1117_v55, %v5199_v3  ;;  %v5464_v33 = vadd.f32 %v1409_v52, %v1191_v9  ;;  %v5798_v9 = vld [vmem:[#allocation2_spill] sm:$0xff] }
 0x1a0   :  { %v3770_v45 = vpop.f32.mrf.mxu1  ;;  %v3834_v29 = vpop.f32.mrf.mxu0  ;;  %v2083_v47 = vrot.slane %v5798_v9, 3 }
 0x1a2   :  { %v1122_v13 = vpop.f32.mrf.mxu1  ;;  %v1414_v21 = vpop.f32.mrf.mxu0  ;;  %4036 = vmatmul.mubr.bf16.gmra.mxu1 %v2077_v61  ;;  %4100 = vmatmul.mubr.bf16.gmra.mxu0 %v2356_v35 }
 0x1a3   :  { %v1194_v4 = vadd.f32 %v1122_v13, %v5208_v18  ;;  %v5470_v31 = vadd.f32 %v1414_v21, %v1192_v44  ;;  %4039 = vmatprep.mubr.msk.bf16.mxu1 %vm4269_vm0, %v5791_v8  ;;  %4103 = vmatprep.mubr.msk.bf16.mxu0 %vm4269_vm0, %v5791_v8  ;;  %v5797_v18 = vld [vmem:[#allocation3_spill] sm:$0xff]  ;;  %v2360_v13 = vsel %vm2349_vm9, %v2357_v20, %v2359_v53 }
 0x1a4   :  { %v3773_v3 = vpop.f32.mrf.mxu1  ;;  %v3837_v56 = vpop.f32.mrf.mxu0  ;;  %v2082_v49 = vrot.slane %v5797_v18, 2 }
 0x1a6   :  { %v1125_v24 = vpop.f32.mrf.mxu1  ;;  %v1417_v63 = vpop.f32.mrf.mxu0 }
 0x1a7   :  { %v1195_v40 = vadd.f32 %v1125_v24, %v5226_v34  ;;  %v5479_v37 = vadd.f32 %v1417_v63, %v1193_v62  ;;  %v2084_v34 = vor.u32 %v2083_v47, %v2082_v49  ;;  %v5802_v62 = vld [vmem:[#allocation4_spill] sm:$0xff]  ;;  %v4263_v24 = vld [vmem:[%s5753_s0 + $0x38] sm:$0xff]  }
 0x1a8   :  { %v3774_v17 = vpop.f32.mrf.mxu1  ;;  %v3838_v22 = vpop.f32.mrf.mxu0  ;;  %v2087_v61 = vrot.slane %v5802_v62, 3  ;;  %v2361_v63 = vrot.slane %v4263_v24, 3  ;;  %v5805_v62 = vld [vmem:[#allocation9_spill] sm:$0xff] }
 0x1a9   :  { %v2085_v29 = vsel %vm2058_vm8, %v2080_v57, %v2084_v34  ;;  %v5804_v22 = vld [vmem:[#allocation5_spill] sm:$0xff] }
 0x1aa   :  { %v1130_v58 = vpop.f32.mrf.mxu1  ;;  %v1422_v43 = vpop.f32.mrf.mxu0  ;;  %4040 = vmatmul.mubr.bf16.gmra.mxu1 %v2081_v32  ;;  %4104 = vmatmul.mubr.bf16.gmra.mxu0 %v2358_v36  ;;  %v2088_v56 = vor.u32 %v2087_v61, %v2086_v0  ;;  %v2362_v49 = vsel %vm2349_vm9, %v2359_v53, %v2361_v63  ;;  %v5806_v61 = vld [vmem:[#allocation7_spill] sm:$0xff] }
 0x1ab   :  { %v1196_v44 = vadd.f32 %v1130_v58, %v5799_v2  ;;  %v5484_v25 = vadd.f32 %v1422_v43, %v1194_v4  ;;  %4043 = vmatprep.mubr.msk.bf16.mxu1 %vm4269_vm0, %v5791_v8  ;;  %4107 = vmatprep.mubr.msk.bf16.mxu0 %vm4269_vm0, %v5791_v8  ;;  %v2091_v58 = vrot.slane %v5804_v22, 3 }
 0x1ac   :  { %v3777_v30 = vpop.f32.mrf.mxu1  ;;  %v3841_v55 = vpop.f32.mrf.mxu0  ;;  %v2089_v18 = vsel %vm2058_vm8, %v2084_v34, %v2088_v56  ;;  %v4264_v34 = vld [vmem:[%s5753_s0 + $0x40] sm:$0xff]  }
 0x1ad   :  { %v2363_v53 = vrot.slane %v4264_v34, 3 }
 0x1ae   :  { %v1133_v52 = vpop.f32.mrf.mxu1  ;;  %v1425_v28 = vpop.f32.mrf.mxu0 }
 0x1af   :  { %v1197_v35 = vadd.f32 %v1133_v52, %v5238_v6  ;;  %v5494_v45 = vadd.f32 %v1425_v28, %v1195_v40 }
 0x1b0   :  { %v3778_v21 = vpop.f32.mrf.mxu1  ;;  %v3842_v51 = vpop.f32.mrf.mxu0 }
 0x1b1   :  { %v2364_v51 = vsel %vm2349_vm9, %v2361_v63, %v2363_v53 }
 0x1b2   :  { %v1138_v4 = vpop.f32.mrf.mxu1  ;;  %v1430_v3 = vpop.f32.mrf.mxu0  ;;  %4044 = vmatmul.mubr.bf16.gmra.mxu1 %v2085_v29  ;;  %4108 = vmatmul.mubr.bf16.gmra.mxu0 %v2360_v13 }
 0x1b3   :  { %v1198_v6 = vadd.f32 %v1138_v4, %v5243_v23  ;;  %v5502_v32 = vadd.f32 %v1430_v3, %v1196_v44  ;;  %4047 = vmatprep.mubr.msk.bf16.mxu1 %vm4269_vm0, %v5791_v8  ;;  %4111 = vmatprep.mubr.msk.bf16.mxu0 %vm4269_vm0, %v5791_v8  ;;  %v5803_v23 = vld [vmem:[#allocation8_spill] sm:$0xff] }
 0x1b4   :  { %v3781_v57 = vpop.f32.mrf.mxu1  ;;  %v3845_v20 = vpop.f32.mrf.mxu0  ;;  %v2090_v17 = vrot.slane %v5803_v23, 2 }
 0x1b5   :  { %v4265_v20 = vld [vmem:[%s5753_s0 + $0x48] sm:$0xff]  }
 0x1b6   :  { %v1141_v36 = vpop.f32.mrf.mxu1  ;;  %v1433_v40 = vpop.f32.mrf.mxu0 }
 0x1b7   :  { %v1199_v9 = vadd.f32 %v1141_v36, %v5255_v54  ;;  %v5511_v47 = vadd.f32 %v1433_v40, %v1197_v35  ;;  %v2092_v54 = vor.u32 %v2091_v58, %v2090_v17  ;;  %v2095_v35 = vrot.slane %v5806_v61, 3  ;;  %v5809_v61 = vld [vmem:[#allocation14_spill] sm:$0xff] }
 0x1b8   :  { %v3782_v43 = vpop.f32.mrf.mxu1  ;;  %v3846_v2 = vpop.f32.mrf.mxu0  ;;  %v2365_v36 = vrot.slane %v4265_v20, 3 }
 0x1b9   :  { %v2093_v21 = vsel %vm2058_vm8, %v2088_v56, %v2092_v54  ;;  %v5808_v43 = vld [vmem:[#allocation10_spill] sm:$0xff] }
 0x1ba   :  { %v1146_v44 = vpop.f32.mrf.mxu1  ;;  %v1438_v50 = vpop.f32.mrf.mxu0  ;;  %4048 = vmatmul.mubr.bf16.gmra.mxu1 %v2089_v18  ;;  %4112 = vmatmul.mubr.bf16.gmra.mxu0 %v2362_v49  ;;  %v2366_v23 = vsel %vm2349_vm9, %v2363_v53, %v2365_v36  ;;  %v2099_v2 = vrot.slane %v5808_v43, 3  ;;  %v5812_v43 = vshll.u32 %v5028_v1, 16 }
 0x1bb   :  { %v1200_v30 = vadd.f32 %v1146_v44, %v5263_v19  ;;  %v5516_v55 = vadd.f32 %v1438_v50, %v1198_v6  ;;  %4051 = vmatprep.mubr.msk.bf16.mxu1 %vm4269_vm0, %v5791_v8  ;;  %4115 = vmatprep.mubr.msk.bf16.mxu0 %vm4269_vm0, %v5791_v8  ;;  %v2094_v19 = vrot.slane %v5805_v62, 2 }
 0x1bc   :  { %v3785_v52 = vpop.f32.mrf.mxu1  ;;  %v3849_v28 = vpop.f32.mrf.mxu0 }
 0x1bd   :  { %v2096_v57 = vor.u32 %v2095_v35, %v2094_v19  ;;  %v5810_v35 = vld [vmem:[#allocation12_spill] sm:$0xff] }
 0x1be   :  { %v1149_v15 = vpop.f32.mrf.mxu1  ;;  %v1441_v0 = vpop.f32.mrf.mxu0 }
 0x1bf   :  { %v1201_v29 = vadd.f32 %v1149_v15, %v5278_v41  ;;  %v5528_v13 = vadd.f32 %v1441_v0, %v1199_v9  ;;  %v2097_v9 = vsel %vm2058_vm8, %v2092_v54, %v2096_v57  ;;  %v4266_v54 = vld [vmem:[%s5753_s0 + $0x50] sm:$0xff]  }
 0x1c0   :  { %v3786_v4 = vpop.f32.mrf.mxu1  ;;  %v3850_v3 = vpop.f32.mrf.mxu0  ;;  %v2367_v53 = vrot.slane %v4266_v54, 3 }
 0x1c2   :  { %v1154_v24 = vpop.f32.mrf.mxu1  ;;  %v1446_v6 = vpop.f32.mrf.mxu0  ;;  %4052 = vmatmul.mubr.bf16.gmra.mxu1 %v2093_v21  ;;  %4116 = vmatmul.mubr.bf16.gmra.mxu0 %v2364_v51  ;;  %v2368_v3 = vsel %vm2349_vm9, %v2365_v36, %v2367_v53 }
 0x1c3   :  { %v1202_v41 = vadd.f32 %v1154_v24, %v5289_v5  ;;  %v5536_v40 = vadd.f32 %v1446_v6, %v1200_v30  ;;  %4055 = vmatprep.mubr.msk.bf16.mxu1 %vm4269_vm0, %v5791_v8  ;;  %4119 = vmatprep.mubr.msk.bf16.mxu0 %vm4269_vm0, %v5791_v8  ;;  %v5807_v5 = vld [vmem:[#allocation11_spill] sm:$0xff] }
 0x1c4   :  { %v3789_v56 = vpop.f32.mrf.mxu1  ;;  %v3853_v63 = vpop.f32.mrf.mxu0  ;;  %v2098_v58 = vrot.slane %v5807_v5, 2 }
 0x1c5   :  { %v2369_v63 = vrot.slane %v5324_v11, 3 }
 0x1c6   :  { %v1157_v18 = vpop.f32.mrf.mxu1  ;;  %v1449_v49 = vpop.f32.mrf.mxu0 }
 0x1c7   :  { %v1203_v17 = vadd.f32 %v1157_v18, %v5304_v42  ;;  %v5545_v22 = vadd.f32 %v1449_v49, %v1201_v29  ;;  %v2100_v42 = vor.u32 %v2099_v2, %v2098_v58  ;;  %v2103_v29 = vrot.slane %v5810_v35, 3 }
 0x1c8   :  { %v3790_v44 = vpop.f32.mrf.mxu1  ;;  %v3854_v50 = vpop.f32.mrf.mxu0  ;;  %v2107_v2 = vrot.slane %v5812_v43, 3 }
 0x1c9   :  { %v2101_v4 = vsel %vm2058_vm8, %v2096_v57, %v2100_v42 }
 0x1ca   :  { %v1162_v30 = vpop.f32.mrf.mxu1  ;;  %v1454_v34 = vpop.f32.mrf.mxu0  ;;  %4056 = vmatmul.mubr.bf16.gmra.mxu1 %v2097_v9  ;;  %4120 = vmatmul.mubr.bf16.gmra.mxu0 %v2366_v23 }
 0x1cb   :  { %v1204_v52 = vadd.f32 %v1162_v30, %v5315_v46  ;;  %v5550_v28 = vadd.f32 %v1454_v34, %v1202_v41  ;;  %4059 = vmatprep.mubr.msk.bf16.mxu1 %vm4269_vm0, %v5791_v8  ;;  %4123 = vmatprep.mubr.msk.bf16.mxu0 %vm4269_vm0, %v5791_v8  ;;  %v2102_v46 = vrot.slane %v5809_v61, 2 }
 0x1cc   :  { %v3793_v15 = vpop.f32.mrf.mxu1  ;;  %v3857_v0 = vpop.f32.mrf.mxu0 }
 0x1cd   :  { %v2104_v56 = vor.u32 %v2103_v29, %v2102_v46 }
 0x1ce   :  { %v1165_v62 = vpop.f32.mrf.mxu1  ;;  %v1457_v19 = vpop.f32.mrf.mxu0 }
 0x1cf   :  { %v1205_v21 = vadd.f32 %v1165_v62, %v5335_v48  ;;  %v5562_v51 = vadd.f32 %v1457_v19, %v1203_v17  ;;  %v2105_v23 = vsel %vm2058_vm8, %v2100_v42, %v2104_v56  ;;  %v2370_v17 = vsel %vm2349_vm9, %v2367_v53, %v2369_v63 }
 0x1d0   :  { %v3794_v24 = vpop.f32.mrf.mxu1  ;;  %v3858_v6 = vpop.f32.mrf.mxu0 }
 0x1d2   :  { %v1170_v20 = vpop.f32.mrf.mxu1  ;;  %v1462_v41 = vpop.f32.mrf.mxu0  ;;  %4060 = vmatmul.mubr.bf16.gmra.mxu1 %v2101_v4  ;;  %4124 = vmatmul.mubr.bf16.gmra.mxu0 %v2368_v3  ;;  %v4267_v4 = vld [vmem:[%s5754_s1 + $0x68] sm:$0xff]  }
 0x1d3   :  { %v1206_v18 = vadd.f32 %v1170_v20, %v5346_v10  ;;  %v5568_v49 = vadd.f32 %v1462_v41, %v1204_v52  ;;  %4063 = vmatprep.mubr.msk.bf16.mxu1 %vm4269_vm0, %v5791_v8  ;;  %4127 = vmatprep.mubr.msk.bf16.mxu0 %vm4269_vm0, %v5791_v8  ;;  %v5811_v10 = vshrl.u32 %v5028_v1, 16  ;;  %v2371_v1 = vrot.slane %v4547_v26, 3 }
 0x1d4   :  { %v3797_v48 = vpop.f32.mrf.mxu1  ;;  %v3861_v57 = vpop.f32.mrf.mxu0  ;;  %v2373_v3 = vrot.slane %v4267_v4, 3 }
 0x1d5   :  { %v2106_v58 = vrot.slane %v5811_v10, 2 }
 0x1d6   :  { %v1173_v36 = vpop.f32.mrf.mxu1  ;;  %v1465_v9 = vpop.f32.mrf.mxu0 }
 0x1d7   :  { %v1207_v11 = vadd.f32 %v1173_v36, %v5361_v16  ;;  %v5577_v5 = vadd.f32 %v1465_v9, %v1205_v21  ;;  %v2108_v16 = vor.u32 %v2107_v2, %v2106_v58 }
 0x1d8   :  { %v3798_v44 = vpop.f32.mrf.mxu1  ;;  %v3862_v50 = vpop.f32.mrf.mxu0 }
 0x1d9   :  { %v2109_v19 = vsel %vm2058_vm8, %v2104_v56, %v2108_v16 }
 0x1da   :  { %v1178_v30 = vpop.f32.mrf.mxu1  ;;  %v1470_v34 = vpop.f32.mrf.mxu0  ;;  %4064 = vmatmul.mubr.bf16.gmra.mxu1 %v2105_v23  ;;  %4128 = vmatmul.mubr.bf16.gmra.mxu0 %v2370_v17 }
 0x1db   :  { %v1208_v52 = vadd.f32 %v1178_v30, %v5373_v7  ;;  %v5584_v42 = vadd.f32 %v1470_v34, %v1206_v18  ;;  %4067 = vmatprep.mubr.msk.bf16.mxu1 %vm4269_vm0, %v5791_v8  ;;  %4131 = vmatprep.mubr.msk.bf16.mxu0 %vm4269_vm0, %v5791_v8  ;;  %v2372_v7 = vsel %vm2349_vm9, %v2369_v63, %v2371_v1 }
 0x1dc   :  { %v3801_v54 = vpop.f32.mrf.mxu1  ;;  %v3865_v53 = vpop.f32.mrf.mxu0  ;;  %v2374_v63 = vsel %vm2349_vm9, %v2371_v1, %v2373_v3 }
 0x1de   :  { %v1181_v15 = vpop.f32.mrf.mxu1  ;;  %v1473_v0 = vpop.f32.mrf.mxu0 }
 0x1df   :  { %v5591_v62 = vadd.f32 %v1473_v0, %v1207_v11 }
 0x1e0   :  { %v3802_v61 = vpop.f32.mrf.mxu1  ;;  %v3866_v46 = vpop.f32.mrf.mxu0 }
 0x1e2   :  { %v1478_v35 = vpop.f32.mrf.mxu0  ;;  %v1649_v29 = vpop.f32.mrf.mxu1  ;;  %4068 = vmatmul.mubr.bf16.gmra.mxu1 %v2109_v19  ;;  %4132 = vmatmul.mubr.bf16.gmra.mxu0 %v2372_v7 }
 0x1e3   :  { %v5595_v21 = vadd.f32 %v1478_v35, %v1208_v52  ;;  %v1751_v26 = vadd.f32 %v1649_v29, %v5401_v27  ;;  %4071 = vmatprep.mubr.msk.bf16.mxu1 %vm4269_vm0, %v5791_v8  ;;  %4135 = vmatprep.mubr.msk.bf16.mxu0 %vm4269_vm0, %v5791_v8 }
 0x1e4   :  { %v3869_v24 = vpop.f32.mrf.mxu0  ;;  %v3889_v6 = vpop.f32.mrf.mxu1 }
 0x1e6   :  { %v1481_v20 = vpop.f32.mrf.mxu0  ;;  %v1652_v41 = vpop.f32.mrf.mxu1 }
 0x1e7   :  { %v1752_v56 = vadd.f32 %v1652_v41, %v5416_v39 }
 0x1e8   :  { %v3870_v27 = vpop.f32.mrf.mxu0  ;;  %v3890_v18 = vpop.f32.mrf.mxu1 }
 0x1ea   :  { %v1657_v48 = vpop.f32.mrf.mxu1  ;;  %v1914_v57 = vpop.f32.mrf.mxu0  ;;  %4072 = vmatmul.mubr.bf16.gmra.mxu1 %v2108_v16  ;;  %4136 = vmatmul.mubr.bf16.gmra.mxu0 %v2374_v63 }
 0x1eb   :  { %v1753_v36 = vadd.f32 %v1657_v48, %v5423_v38  ;;  %v5608_v9 = vadd.f32 %v1914_v57, %v1751_v26  ;;  %4139 = vmatprep.mubr.msk.bf16.mxu0 %vm4269_vm0, %v5791_v8 }
 0x1ec   :  { %v3893_v23 = vpop.f32.mrf.mxu1  ;;  %v3957_v17 = vpop.f32.mrf.mxu0 }
 0x1ee   :  { %v1660_v11 = vpop.f32.mrf.mxu1  ;;  %v1917_v10 = vpop.f32.mrf.mxu0 }
 0x1ef   :  { %v1754_v39 = vadd.f32 %v1660_v11, %v5434_v60  ;;  %v5613_v58 = vadd.f32 %v1917_v10, %v1752_v56 }
 0x1f0   :  { %v3894_v43 = vpop.f32.mrf.mxu1  ;;  %v3958_v2 = vpop.f32.mrf.mxu0 }
 0x1f2   :  { %v1665_v44 = vpop.f32.mrf.mxu1  ;;  %v1922_v50 = vpop.f32.mrf.mxu0  ;;  %4140 = vmatmul.mubr.bf16.gmra.mxu0 %v2373_v3 }
 0x1f3   :  { %v1755_v38 = vadd.f32 %v1665_v44, %v5440_v59  ;;  %v5616_v30 = vadd.f32 %v1922_v50, %v1753_v36 }
 0x1f4   :  { %v3897_v34 = vpop.f32.mrf.mxu1  ;;  %v3961_v52 = vpop.f32.mrf.mxu0 }
 0x1f6   :  { %v1668_v8 = vpop.f32.mrf.mxu1  ;;  %v1925_v16 = vpop.f32.mrf.mxu0 }
 0x1f7   :  { %v1756_v1 = vadd.f32 %v1668_v8, %v5449_v12  ;;  %v5619_v54 = vadd.f32 %v1925_v16, %v1754_v39 }
 0x1f8   :  { %v3898_v60 = vpop.f32.mrf.mxu1  ;;  %v3962_v53 = vpop.f32.mrf.mxu0 }
 0x1fa   :  { %v1673_v15 = vpop.f32.mrf.mxu1  ;;  %v1930_v0 = vpop.f32.mrf.mxu0 }
 0x1fb   :  { %v1757_v19 = vadd.f32 %v1673_v15, %v5454_v14  ;;  %v5622_v7 = vadd.f32 %v1930_v0, %v1755_v38 }
 0x1fc   :  { %v3901_v61 = vpop.f32.mrf.mxu1  ;;  %v3965_v59 = vpop.f32.mrf.mxu0 }
 0x1fe   :  { %v1676_v46 = vpop.f32.mrf.mxu1  ;;  %v1933_v35 = vpop.f32.mrf.mxu0 }
 0x1ff   :  { %v1758_v29 = vadd.f32 %v1676_v46, %v5464_v33  ;;  %v5625_v26 = vadd.f32 %v1933_v35, %v1756_v1 }
 0x200   :  { %v3902_v4 = vpop.f32.mrf.mxu1  ;;  %v3966_v12 = vpop.f32.mrf.mxu0 }
 0x202   :  { %v1681_v3 = vpop.f32.mrf.mxu1  ;;  %v1938_v24 = vpop.f32.mrf.mxu0 }
 0x203   :  { %v1759_v6 = vadd.f32 %v1681_v3, %v5470_v31  ;;  %v5628_v20 = vadd.f32 %v1938_v24, %v1757_v19 }
 0x204   :  { %v3905_v41 = vpop.f32.mrf.mxu1  ;;  %v3969_v14 = vpop.f32.mrf.mxu0 }
 0x206   :  { %v1684_v56 = vpop.f32.mrf.mxu1  ;;  %v1941_v63 = vpop.f32.mrf.mxu0 }
 0x207   :  { %v1760_v27 = vadd.f32 %v1684_v56, %v5479_v37  ;;  %v5631_v18 = vadd.f32 %v1941_v63, %v1758_v29 }
 0x208   :  { %v3906_v48 = vpop.f32.mrf.mxu1  ;;  %v3970_v33 = vpop.f32.mrf.mxu0 }
 0x20a   :  { %v1689_v57 = vpop.f32.mrf.mxu1  ;;  %v1946_v36 = vpop.f32.mrf.mxu0 }
 0x20b   :  { %v1761_v23 = vadd.f32 %v1689_v57, %v5484_v25  ;;  %v5634_v17 = vadd.f32 %v1946_v36, %v1759_v6 }
 0x20c   :  { %v3909_v11 = vpop.f32.mrf.mxu1  ;;  %v3973_v31 = vpop.f32.mrf.mxu0 }
 0x20e   :  { %v1692_v10 = vpop.f32.mrf.mxu1  ;;  %v1949_v39 = vpop.f32.mrf.mxu0 }
 0x20f   :  { %v1762_v43 = vadd.f32 %v1692_v10, %v5494_v45  ;;  %v5637_v2 = vadd.f32 %v1949_v39, %v1760_v27 }
 0x210   :  { %v3910_v44 = vpop.f32.mrf.mxu1  ;;  %v3974_v37 = vpop.f32.mrf.mxu0 }
 0x212   :  { %v1697_v50 = vpop.f32.mrf.mxu1  ;;  %v1954_v38 = vpop.f32.mrf.mxu0 }
 0x213   :  { %v1763_v34 = vadd.f32 %v1697_v50, %v5502_v32  ;;  %v5640_v52 = vadd.f32 %v1954_v38, %v1761_v23 }
 0x214   :  { %v3913_v8 = vpop.f32.mrf.mxu1  ;;  %v3977_v25 = vpop.f32.mrf.mxu0 }
 0x216   :  { %v1700_v16 = vpop.f32.mrf.mxu1  ;;  %v1957_v1 = vpop.f32.mrf.mxu0 }
 0x217   :  { %v1764_v60 = vadd.f32 %v1700_v16, %v5511_v47  ;;  %v5643_v53 = vadd.f32 %v1957_v1, %v1762_v43 }
 0x218   :  { %v3914_v15 = vpop.f32.mrf.mxu1  ;;  %v3978_v45 = vpop.f32.mrf.mxu0 }
 0x21a   :  { %v1705_v0 = vpop.f32.mrf.mxu1  ;;  %v1962_v19 = vpop.f32.mrf.mxu0 }
 0x21b   :  { %v1765_v61 = vadd.f32 %v1705_v0, %v5516_v55  ;;  %v5646_v59 = vadd.f32 %v1962_v19, %v1763_v34 }
 0x21c   :  { %v3917_v46 = vpop.f32.mrf.mxu1  ;;  %v3981_v32 = vpop.f32.mrf.mxu0 }
 0x21e   :  { %v1708_v35 = vpop.f32.mrf.mxu1  ;;  %v1965_v29 = vpop.f32.mrf.mxu0 }
 0x21f   :  { %v1766_v4 = vadd.f32 %v1708_v35, %v5528_v13  ;;  %v5649_v12 = vadd.f32 %v1965_v29, %v1764_v60 }
 0x220   :  { %v3918_v3 = vpop.f32.mrf.mxu1  ;;  %v3982_v47 = vpop.f32.mrf.mxu0 }
 0x222   :  { %v1713_v24 = vpop.f32.mrf.mxu1  ;;  %v1970_v6 = vpop.f32.mrf.mxu0 }
 0x223   :  { %v1767_v41 = vadd.f32 %v1713_v24, %v5536_v40  ;;  %v5652_v14 = vadd.f32 %v1970_v6, %v1765_v61 }
 0x224   :  { %v3921_v56 = vpop.f32.mrf.mxu1  ;;  %v3985_v55 = vpop.f32.mrf.mxu0 }
 0x226   :  { %v1716_v63 = vpop.f32.mrf.mxu1  ;;  %v1973_v27 = vpop.f32.mrf.mxu0 }
 0x227   :  { %v1768_v48 = vadd.f32 %v1716_v63, %v5545_v22  ;;  %v5655_v33 = vadd.f32 %v1973_v27, %v1766_v4 }
 0x228   :  { %v3922_v57 = vpop.f32.mrf.mxu1  ;;  %v3986_v13 = vpop.f32.mrf.mxu0 }
 0x22a   :  { %v1721_v36 = vpop.f32.mrf.mxu1  ;;  %v1978_v23 = vpop.f32.mrf.mxu0 }
 0x22b   :  { %v1769_v11 = vadd.f32 %v1721_v36, %v5550_v28  ;;  %v5658_v31 = vadd.f32 %v1978_v23, %v1767_v41 }
 0x22c   :  { %v3925_v10 = vpop.f32.mrf.mxu1  ;;  %v3989_v40 = vpop.f32.mrf.mxu0 }
 0x22e   :  { %v1724_v39 = vpop.f32.mrf.mxu1  ;;  %v1981_v43 = vpop.f32.mrf.mxu0 }
 0x22f   :  { %v1770_v44 = vadd.f32 %v1724_v39, %v5562_v51  ;;  %v5661_v37 = vadd.f32 %v1981_v43, %v1768_v48 }
 0x230   :  { %v3926_v50 = vpop.f32.mrf.mxu1  ;;  %v3990_v22 = vpop.f32.mrf.mxu0 }
 0x231   :  { %v2625_v22 = vpop.permute.xlu0 %2624 }
 0x232   :  { %v1729_v38 = vpop.f32.mrf.mxu1  ;;  %v1986_v34 = vpop.f32.mrf.mxu0 }
 0x233   :  { %v1771_v8 = vadd.f32 %v1729_v38, %v5568_v49  ;;  %v5664_v25 = vadd.f32 %v1986_v34, %v1769_v11 }
 0x234   :  { %v3929_v16 = vpop.f32.mrf.mxu1  ;;  %v3993_v28 = vpop.f32.mrf.mxu0 }
 0x236   :  { %v1732_v1 = vpop.f32.mrf.mxu1  ;;  %v1989_v60 = vpop.f32.mrf.mxu0 }
 0x237   :  { %v1772_v15 = vadd.f32 %v1732_v1, %v5577_v5  ;;  %v5667_v45 = vadd.f32 %v1989_v60, %v1770_v44 }
 0x238   :  { %v3930_v0 = vpop.f32.mrf.mxu1  ;;  %v3994_v51 = vpop.f32.mrf.mxu0 }
 0x23a   :  { %v1737_v19 = vpop.f32.mrf.mxu1  ;;  %v1994_v61 = vpop.f32.mrf.mxu0 }
 0x23b   :  { %v1773_v46 = vadd.f32 %v1737_v19, %v5584_v42  ;;  %v5670_v32 = vadd.f32 %v1994_v61, %v1771_v8  ;;  %v2630_v19 = vpop.permute.xlu0 %2629 }
 0x23c   :  { %v3933_v35 = vpop.f32.mrf.mxu1  ;;  %v3997_v49 = vpop.f32.mrf.mxu0 }
 0x23d   :  { %v2635_v49 = vpop.permute.xlu1 %2634 }
 0x23e   :  { %v1740_v29 = vpop.f32.mrf.mxu1  ;;  %v1997_v4 = vpop.f32.mrf.mxu0 }
 0x23f   :  { %v1774_v3 = vadd.f32 %v1740_v29, %v5591_v62  ;;  %v5673_v47 = vadd.f32 %v1997_v4, %v1772_v15 }
 0x240   :  { %v3934_v24 = vpop.f32.mrf.mxu1  ;;  %v3998_v5 = vpop.f32.mrf.mxu0 }
 0x242   :  { %v1745_v6 = vpop.f32.mrf.mxu1  ;;  %v2002_v41 = vpop.f32.mrf.mxu0 }
 0x243   :  { %v1775_v56 = vadd.f32 %v1745_v6, %v5595_v21  ;;  %v5676_v55 = vadd.f32 %v2002_v41, %v1773_v46 }
 0x244   :  { %v3937_v63 = vpop.f32.mrf.mxu1  ;;  %v4001_v42 = vpop.f32.mrf.mxu0 }
 0x246   :  { %v1748_v27 = vpop.f32.mrf.mxu1  ;;  %v2005_v48 = vpop.f32.mrf.mxu0 }
 0x247   :  { %v5678_v57 = vadd.f32 %v2005_v48, %v1774_v3 }
 0x248   :  { %v3938_v13 = vpop.f32.mrf.mxu1  ;;  %v4002_v36 = vpop.f32.mrf.mxu0 }
 0x249   :  { %v2640_v36 = vpop.permute.xlu1 %2639 }
 0x24a   :  { %v2010_v23 = vpop.f32.mrf.mxu0  ;;  %v2205_v62 = vpop.f32.mrf.mxu1 }
 0x24b   :  { %v5680_v11 = vadd.f32 %v2010_v23, %v1775_v56  ;;  %v2307_v50 = vadd.f32 %v2205_v62, %v5608_v9 }
 0x24c   :  { %v4005_v10 = vpop.f32.mrf.mxu0  ;;  %v4025_v40 = vpop.f32.mrf.mxu1 }
 0x24e   :  { %v2013_v39 = vpop.f32.mrf.mxu0  ;;  %v2208_v43 = vpop.f32.mrf.mxu1 }
 0x24f   :  { %v2308_v1 = vadd.f32 %v2208_v43, %v5613_v58 }
 0x250   :  { %v4006_v44 = vpop.f32.mrf.mxu0  ;;  %v4026_v21 = vpop.f32.mrf.mxu1 }
 0x252   :  { %v2213_v38 = vpop.f32.mrf.mxu1  ;;  %v2470_v34 = vpop.f32.mrf.mxu0 }
 0x253   :  { %v2572_v8 = vadd.f32 %v2470_v34, %v2307_v50  ;;  %v2309_v29 = vadd.f32 %v2213_v38, %v5616_v30 }
 0x254   :  { %v4029_v16 = vpop.f32.mrf.mxu1  ;;  %v4093_v28 = vpop.f32.mrf.mxu0 }
 0x255   :  { %v2747_v0 = vmul.f32 %v2625_v22, %v2572_v8  ;;  %v2645_v28 = vpop.permute.xlu0 %2644 }
 0x256   :  { %v2216_v60 = vpop.f32.mrf.mxu1  ;;  %v2473_v15 = vpop.f32.mrf.mxu0 }
 0x257   :  { %v2573_v51 = vadd.f32 %v2473_v15, %v2308_v1  ;;  %v2929_v3 = vmul.f32 %v2747_v0, %v2747_v0  ;;  %v2310_v63 = vadd.f32 %v2216_v60, %v5619_v54 }
 0x258   :  { %v4030_v61 = vpop.f32.mrf.mxu1  ;;  %v4094_v46 = vpop.f32.mrf.mxu0 }
 0x259   :  { %v2748_v35 = vmul.f32 %v2630_v19, %v2573_v51  ;;  %v2650_v51 = vpop.permute.xlu1 %2649 }
 0x25a   :  { %v2221_v9 = vpop.f32.mrf.mxu1  ;;  %v2478_v4 = vpop.f32.mrf.mxu0 }
 0x25b   :  { %v3274_v24 = vpack.c.bf16 %v2748_v35, %v2747_v0  ;;  %v2898_v5 = vadd.f32 %v2748_v35, %v2747_v0  ;;  %v2930_v6 = vmul.f32 %v2748_v35, %v2748_v35  ;;  %v2574_v41 = vadd.f32 %v2478_v4, %v2309_v29 }
 0x25c   :  { %v4033_v56 = vpop.f32.mrf.mxu1  ;;  %v4097_v58 = vpop.f32.mrf.mxu0  ;;  %v2311_v43 = vadd.f32 %v2221_v9, %v5622_v7 }
 0x25d   :  { %3275 = vst [vmem:[%s5756_s4] sm:$0xff] %v3274_v24   ;;  %v2954_v42 = vadd.f32 %v2930_v6, %v2929_v3  ;;  %v2749_v27 = vmul.f32 %v2635_v49, %v2574_v41 }
 0x25e   :  { %v2224_v48 = vpop.f32.mrf.mxu1  ;;  %v2481_v13 = vpop.f32.mrf.mxu0 }
 0x25f   :  { %v2575_v30 = vadd.f32 %v2481_v13, %v2310_v63  ;;  %v2899_v23 = vadd.f32 %v2898_v5, %v2749_v27  ;;  %v2931_v62 = vmul.f32 %v2749_v27, %v2749_v27  ;;  %v2312_v1 = vadd.f32 %v2224_v48, %v5625_v26  ;;  %v2655_v63 = vpop.permute.xlu0 %2654 }
 0x260   :  { %v4034_v10 = vpop.f32.mrf.mxu1  ;;  %v4098_v40 = vpop.f32.mrf.mxu0 }
 0x261   :  { %v2750_v39 = vmul.f32 %v2640_v36, %v2575_v30  ;;  %v2955_v44 = vadd.f32 %v2954_v42, %v2931_v62  ;;  %v2660_v30 = vpop.permute.xlu1 %2659 }
 0x262   :  { %v2229_v21 = vpop.f32.mrf.mxu1  ;;  %v2486_v54 = vpop.f32.mrf.mxu0 }
 0x263   :  { %v3279_v50 = vpack.c.bf16 %v2750_v39, %v2749_v27  ;;  %v2900_v22 = vadd.f32 %v2899_v23, %v2750_v39  ;;  %v2932_v38 = vmul.f32 %v2750_v39, %v2750_v39  ;;  %v2576_v34 = vadd.f32 %v2486_v54, %v2311_v43 }
 0x264   :  { %v4037_v8 = vpop.f32.mrf.mxu1  ;;  %v4101_v16 = vpop.f32.mrf.mxu0  ;;  %v2313_v9 = vadd.f32 %v2229_v21, %v5628_v20 }
 0x265   :  { %3331 = vst [vmem:[%s5756_s4 + $0x8] sm:$0xff] %v3279_v50   ;;  %v2956_v60 = vadd.f32 %v2955_v44, %v2932_v38  ;;  %v2751_v15 = vmul.f32 %v2645_v28, %v2576_v34  ;;  %v2665_v16 = vpop.permute.xlu0 %2664 }
 0x266   :  { %v2232_v0 = vpop.f32.mrf.mxu1  ;;  %v2489_v7 = vpop.f32.mrf.mxu0 }
 0x267   :  { %v2577_v19 = vadd.f32 %v2489_v7, %v2312_v1  ;;  %v2901_v61 = vadd.f32 %v2900_v22, %v2751_v15  ;;  %v2933_v46 = vmul.f32 %v2751_v15, %v2751_v15  ;;  %v2314_v42 = vadd.f32 %v2232_v0, %v5631_v18  ;;  %v2670_v0 = vpop.permute.xlu1 %2669 }
 0x268   :  { %v4038_v35 = vpop.f32.mrf.mxu1  ;;  %v4102_v49 = vpop.f32.mrf.mxu0 }
 0x269   :  { %v2752_v29 = vmul.f32 %v2650_v51, %v2577_v19  ;;  %v2957_v4 = vadd.f32 %v2956_v60, %v2933_v46 }
 0x26a   :  { %v2237_v3 = vpop.f32.mrf.mxu1  ;;  %v2494_v26 = vpop.f32.mrf.mxu0 }
 0x26b   :  { %v3284_v24 = vpack.c.bf16 %v2752_v29, %v2751_v15  ;;  %v2902_v5 = vadd.f32 %v2901_v61, %v2752_v29  ;;  %v2934_v6 = vmul.f32 %v2752_v29, %v2752_v29  ;;  %v2578_v41 = vadd.f32 %v2494_v26, %v2313_v9 }
 0x26c   :  { %v4041_v56 = vpop.f32.mrf.mxu1  ;;  %v4105_v58 = vpop.f32.mrf.mxu0  ;;  %v2315_v43 = vadd.f32 %v2237_v3, %v5634_v17 }
 0x26d   :  { %3332 = vst [vmem:[%s5756_s4 + $0x10] sm:$0xff] %v3284_v24   ;;  %v2958_v27 = vadd.f32 %v2957_v4, %v2934_v6  ;;  %v2753_v48 = vmul.f32 %v2655_v63, %v2578_v41  ;;  %v2675_v41 = vpop.permute.xlu0 %2674 }
 0x26e   :  { %v2240_v13 = vpop.f32.mrf.mxu1  ;;  %v2497_v20 = vpop.f32.mrf.mxu0 }
 0x26f   :  { %v2579_v36 = vadd.f32 %v2497_v20, %v2314_v42  ;;  %v2903_v23 = vadd.f32 %v2902_v5, %v2753_v48  ;;  %v2935_v62 = vmul.f32 %v2753_v48, %v2753_v48  ;;  %v2316_v28 = vadd.f32 %v2240_v13, %v5637_v2 }
 0x270   :  { %v4042_v10 = vpop.f32.mrf.mxu1  ;;  %v4106_v40 = vpop.f32.mrf.mxu0 }
 0x271   :  { %v2754_v39 = vmul.f32 %v2660_v30, %v2579_v36  ;;  %v2959_v44 = vadd.f32 %v2958_v27, %v2935_v62  ;;  %v2680_v27 = vpop.permute.xlu1 %2679 }
 0x272   :  { %v2245_v21 = vpop.f32.mrf.mxu1  ;;  %v2502_v18 = vpop.f32.mrf.mxu0 }
 0x273   :  { %v3289_v54 = vpack.c.bf16 %v2754_v39, %v2753_v48  ;;  %v2904_v50 = vadd.f32 %v2903_v23, %v2754_v39  ;;  %v2936_v22 = vmul.f32 %v2754_v39, %v2754_v39  ;;  %v2580_v38 = vadd.f32 %v2502_v18, %v2315_v43 }
 0x274   :  { %v4045_v34 = vpop.f32.mrf.mxu1  ;;  %v4109_v8 = vpop.f32.mrf.mxu0  ;;  %v2317_v49 = vadd.f32 %v2245_v21, %v5640_v52 }
 0x275   :  { %3333 = vst [vmem:[%s5756_s4 + $0x18] sm:$0xff] %v3289_v54   ;;  %v2960_v1 = vadd.f32 %v2959_v44, %v2936_v22  ;;  %v2755_v60 = vmul.f32 %v2665_v16, %v2580_v38  ;;  %v2690_v16 = vpop.permute.xlu1 %2689 }
 0x276   :  { %v2248_v15 = vpop.f32.mrf.mxu1  ;;  %v2505_v17 = vpop.f32.mrf.mxu0 }
 0x277   :  { %v2581_v7 = vadd.f32 %v2505_v17, %v2316_v28  ;;  %v2905_v51 = vadd.f32 %v2904_v50, %v2755_v60  ;;  %v2937_v19 = vmul.f32 %v2755_v60, %v2755_v60  ;;  %v2318_v56 = vadd.f32 %v2248_v15, %v5643_v53  ;;  %v2685_v50 = vpop.permute.xlu0 %2684 }
 0x278   :  { %v4046_v61 = vpop.f32.mrf.mxu1  ;;  %v4110_v46 = vpop.f32.mrf.mxu0 }
 0x279   :  { %v2756_v35 = vmul.f32 %v2670_v0, %v2581_v7  ;;  %v2961_v29 = vadd.f32 %v2960_v1, %v2937_v19 }
 0x27a   :  { %v2253_v9 = vpop.f32.mrf.mxu1  ;;  %v2510_v2 = vpop.f32.mrf.mxu0 }
 0x27b   :  { %v3294_v4 = vpack.c.bf16 %v2756_v35, %v2755_v60  ;;  %v2906_v3 = vadd.f32 %v2905_v51, %v2756_v35  ;;  %v2938_v26 = vmul.f32 %v2756_v35, %v2756_v35  ;;  %v2582_v24 = vadd.f32 %v2510_v2, %v2317_v49  ;;  %v2695_v2 = vpop.permute.xlu0 %2694 }
 0x27c   :  { %v4049_v5 = vpop.f32.mrf.mxu1  ;;  %v4113_v6 = vpop.f32.mrf.mxu0  ;;  %v2319_v62 = vadd.f32 %v2253_v9, %v5646_v59 }
 0x27d   :  { %3334 = vst [vmem:[%s5756_s4 + $0x20] sm:$0xff] %v3294_v4   ;;  %v2962_v58 = vadd.f32 %v2961_v29, %v2938_v26  ;;  %v2757_v63 = vmul.f32 %v2675_v41, %v2582_v24  ;;  %v2700_v5 = vpop.permute.xlu1 %2699 }
 0x27e   :  { %v2256_v42 = vpop.f32.mrf.mxu1  ;;  %v2513_v52 = vpop.f32.mrf.mxu0 }
 0x27f   :  { %v2583_v48 = vadd.f32 %v2513_v52, %v2318_v56  ;;  %v2907_v13 = vadd.f32 %v2906_v3, %v2757_v63  ;;  %v2939_v20 = vmul.f32 %v2757_v63, %v2757_v63  ;;  %v2320_v22 = vadd.f32 %v2256_v42, %v5649_v12 }
 0x280   :  { %v4050_v30 = vpop.f32.mrf.mxu1  ;;  %v4114_v36 = vpop.f32.mrf.mxu0 }
 0x281   :  { %v2758_v23 = vmul.f32 %v2680_v27, %v2583_v48  ;;  %v2963_v10 = vadd.f32 %v2962_v58, %v2939_v20 }
 0x282   :  { %v2261_v40 = vpop.f32.mrf.mxu1  ;;  %v2518_v53 = vpop.f32.mrf.mxu0 }
 0x283   :  { %v3299_v39 = vpack.c.bf16 %v2758_v23, %v2757_v63  ;;  %v2908_v43 = vadd.f32 %v2907_v13, %v2758_v23  ;;  %v2940_v44 = vmul.f32 %v2758_v23, %v2758_v23  ;;  %v2584_v21 = vadd.f32 %v2518_v53, %v2319_v62 }
 0x284   :  { %v4053_v18 = vpop.f32.mrf.mxu1  ;;  %v4117_v54 = vpop.f32.mrf.mxu0  ;;  %v2321_v7 = vadd.f32 %v2261_v40, %v5652_v14 }
 0x285   :  { %3335 = vst [vmem:[%s5756_s4 + $0x28] sm:$0xff] %v3299_v39   ;;  %v2964_v38 = vadd.f32 %v2963_v10, %v2940_v44  ;;  %v2759_v34 = vmul.f32 %v2685_v50, %v2584_v21  ;;  %v2705_v10 = vpop.permute.xlu0 %2704  ;;  %v2710_v44 = vpop.permute.xlu1 %2709 }
 0x286   :  { %v2264_v8 = vpop.f32.mrf.mxu1  ;;  %v2521_v59 = vpop.f32.mrf.mxu0 }
 0x287   :  { %v2585_v28 = vadd.f32 %v2521_v59, %v2320_v22  ;;  %v2909_v1 = vadd.f32 %v2908_v43, %v2759_v34  ;;  %v2941_v60 = vmul.f32 %v2759_v34, %v2759_v34  ;;  %v2322_v4 = vadd.f32 %v2264_v8, %v5655_v33 }
 0x288   :  { %v4054_v15 = vpop.f32.mrf.mxu1  ;;  %v4118_v17 = vpop.f32.mrf.mxu0 }
 0x289   :  { %v2760_v0 = vmul.f32 %v2690_v16, %v2585_v28  ;;  %v2965_v51 = vadd.f32 %v2964_v38, %v2941_v60 }
 0x28a   :  { %v2269_v19 = vpop.f32.mrf.mxu1  ;;  %v2526_v12 = vpop.f32.mrf.mxu0 }
 0x28b   :  { %v3304_v61 = vpack.c.bf16 %v2760_v0, %v2759_v34  ;;  %v2910_v46 = vadd.f32 %v2909_v1, %v2760_v0  ;;  %v2942_v35 = vmul.f32 %v2760_v0, %v2760_v0  ;;  %v2586_v49 = vadd.f32 %v2526_v12, %v2321_v7  ;;  %v2715_v0 = vpop.permute.xlu0 %2714 }
 0x28c   :  { %v4057_v29 = vpop.f32.mrf.mxu1  ;;  %v4121_v9 = vpop.f32.mrf.mxu0  ;;  %v2323_v52 = vadd.f32 %v2269_v19, %v5658_v31 }
 0x28d   :  { %3336 = vst [vmem:[%s5756_s4 + $0x30] sm:$0xff] %v3304_v61   ;;  %v2966_v3 = vadd.f32 %v2965_v51, %v2942_v35  ;;  %v2761_v26 = vmul.f32 %v2695_v2, %v2586_v49  ;;  %v2720_v61 = vpop.permute.xlu1 %2719 }
 0x28e   :  { %v2272_v24 = vpop.f32.mrf.mxu1  ;;  %v2529_v14 = vpop.f32.mrf.mxu0 }
 0x28f   :  { %v2587_v6 = vadd.f32 %v2529_v14, %v2322_v4  ;;  %v2911_v41 = vadd.f32 %v2910_v46, %v2761_v26  ;;  %v2943_v56 = vmul.f32 %v2761_v26, %v2761_v26  ;;  %v2324_v40 = vadd.f32 %v2272_v24, %v5661_v37 }
 0x290   :  { %v4058_v58 = vpop.f32.mrf.mxu1  ;;  %v4122_v63 = vpop.f32.mrf.mxu0 }
 0x291   :  { %v2762_v42 = vmul.f32 %v2700_v5, %v2587_v6  ;;  %v2967_v27 = vadd.f32 %v2966_v3, %v2943_v56  ;;  %v2725_v58 = vpop.permute.xlu0 %2724 }
 0x292   :  { %v2277_v48 = vpop.f32.mrf.mxu1  ;;  %v2534_v33 = vpop.f32.mrf.mxu0 }
 0x293   :  { %v3309_v13 = vpack.c.bf16 %v2762_v42, %v2761_v26  ;;  %v2912_v20 = vadd.f32 %v2911_v41, %v2762_v42  ;;  %v2944_v30 = vmul.f32 %v2762_v42, %v2762_v42  ;;  %v2588_v36 = vadd.f32 %v2534_v33, %v2323_v52 }
 0x294   :  { %v4061_v23 = vpop.f32.mrf.mxu1  ;;  %v4125_v62 = vpop.f32.mrf.mxu0  ;;  %v2325_v34 = vadd.f32 %v2277_v48, %v5664_v25 }
 0x295   :  { %3337 = vst [vmem:[%s5756_s4 + $0x38] sm:$0xff] %v3309_v13   ;;  %v2968_v53 = vadd.f32 %v2967_v27, %v2944_v30  ;;  %v2763_v39 = vmul.f32 %v2705_v10, %v2588_v36  ;;  %v2730_v48 = vpop.permute.xlu1 %2729 }
 0x296   :  { %v2280_v43 = vpop.f32.mrf.mxu1  ;;  %v2537_v31 = vpop.f32.mrf.mxu0 }
 0x297   :  { %v2589_v21 = vadd.f32 %v2537_v31, %v2324_v40  ;;  %v2913_v18 = vadd.f32 %v2912_v20, %v2763_v39  ;;  %v2945_v54 = vmul.f32 %v2763_v39, %v2763_v39  ;;  %v2326_v7 = vadd.f32 %v2280_v43, %v5667_v45 }
 0x298   :  { %v4062_v50 = vpop.f32.mrf.mxu1  ;;  %v4126_v22 = vpop.f32.mrf.mxu0 }
 0x299   :  { %v2764_v38 = vmul.f32 %v2710_v44, %v2589_v21  ;;  %v2969_v8 = vadd.f32 %v2968_v53, %v2945_v54 }
 0x29a   :  { %v2285_v59 = vpop.f32.mrf.mxu1  ;;  %v2542_v37 = vpop.f32.mrf.mxu0 }
 0x29b   :  { %v3314_v16 = vpack.c.bf16 %v2764_v38, %v2763_v39  ;;  %v2914_v28 = vadd.f32 %v2913_v18, %v2764_v38  ;;  %v2946_v1 = vmul.f32 %v2764_v38, %v2764_v38  ;;  %v2590_v60 = vadd.f32 %v2542_v37, %v2325_v34  ;;  %v2735_v18 = vpop.permute.xlu0 %2734  ;;  %v2740_v34 = vpop.permute.xlu1 %2739 }
 0x29c   :  { %v4065_v15 = vpop.f32.mrf.mxu1  ;;  %v4129_v17 = vpop.f32.mrf.mxu0  ;;  %v2327_v4 = vadd.f32 %v2285_v59, %v5670_v32 }
 0x29d   :  { %3338 = vst [vmem:[%s5756_s4 + $0x40] sm:$0xff] %v3314_v16   ;;  %v2970_v51 = vadd.f32 %v2969_v8, %v2946_v1  ;;  %v2765_v19 = vmul.f32 %v2715_v0, %v2590_v60 }
 0x29e   :  { %v2288_v12 = vpop.f32.mrf.mxu1  ;;  %v2545_v25 = vpop.f32.mrf.mxu0 }
 0x29f   :  { %v2591_v46 = vadd.f32 %v2545_v25, %v2326_v7  ;;  %v2915_v35 = vadd.f32 %v2914_v28, %v2765_v19  ;;  %v2947_v49 = vmul.f32 %v2765_v19, %v2765_v19  ;;  %v2328_v63 = vadd.f32 %v2288_v12, %v5673_v47 }
 0x2a0   :  { %v4066_v29 = vpop.f32.mrf.mxu1  ;;  %v4130_v9 = vpop.f32.mrf.mxu0 }
 0x2a1   :  { %v2766_v2 = vmul.f32 %v2720_v61, %v2591_v46  ;;  %v2971_v3 = vadd.f32 %v2970_v51, %v2947_v49 }
 0x2a2   :  { %v2293_v26 = vpop.f32.mrf.mxu1  ;;  %v2550_v45 = vpop.f32.mrf.mxu0 }
 0x2a3   :  { %v3319_v24 = vpack.c.bf16 %v2766_v2, %v2765_v19  ;;  %v2916_v14 = vadd.f32 %v2915_v35, %v2766_v2  ;;  %v2948_v5 = vmul.f32 %v2766_v2, %v2766_v2  ;;  %v2592_v6 = vadd.f32 %v2550_v45, %v2327_v4  ;;  %v2745_v19 = vpop.permute.xlu0 %2744 }
 0x2a4   :  { %v4069_v41 = vpop.f32.mrf.mxu1  ;;  %v4133_v56 = vpop.f32.mrf.mxu0  ;;  %v2329_v62 = vadd.f32 %v2293_v26, %v5676_v55 }
 0x2a5   :  { %3339 = vst [vmem:[%s5756_s4 + $0x48] sm:$0xff] %v3319_v24   ;;  %v2972_v42 = vadd.f32 %v2971_v3, %v2948_v5  ;;  %v2767_v52 = vmul.f32 %v2725_v58, %v2592_v6 }
 0x2a6   :  { %v2296_v27 = vpop.f32.mrf.mxu1  ;;  %v2553_v32 = vpop.f32.mrf.mxu0 }
 0x2a7   :  { %v2593_v33 = vadd.f32 %v2553_v32, %v2328_v63  ;;  %v2917_v13 = vadd.f32 %v2916_v14, %v2767_v52  ;;  %v2949_v20 = vmul.f32 %v2767_v52, %v2767_v52  ;;  %v2330_v54 = vadd.f32 %v2296_v27, %v5678_v57 }
 0x2a8   :  { %v4070_v30 = vpop.f32.mrf.mxu1  ;;  %v4134_v36 = vpop.f32.mrf.mxu0 }
 0x2a9   :  { %v2768_v23 = vmul.f32 %v2730_v48, %v2593_v33  ;;  %v2973_v10 = vadd.f32 %v2972_v42, %v2949_v20 }
 0x2aa   :  { %v2301_v40 = vpop.f32.mrf.mxu1  ;;  %v2558_v47 = vpop.f32.mrf.mxu0 }
 0x2ab   :  { %v3324_v53 = vpack.c.bf16 %v2768_v23, %v2767_v52  ;;  %v2918_v39 = vadd.f32 %v2917_v13, %v2768_v23  ;;  %v2950_v43 = vmul.f32 %v2768_v23, %v2768_v23  ;;  %v2594_v31 = vadd.f32 %v2558_v47, %v2329_v62 }
 0x2ac   :  { %v4137_v44 = vpop.f32.mrf.mxu0  ;;  %v4073_v21 = vpop.f32.mrf.mxu1  ;;  %v2331_v1 = vadd.f32 %v2301_v40, %v5680_v11 }
 0x2ad   :  { %3340 = vst [vmem:[%s5756_s4 + $0x50] sm:$0xff] %v3324_v53   ;;  %v2974_v50 = vadd.f32 %v2973_v10, %v2950_v43  ;;  %v2769_v22 = vmul.f32 %v2735_v18, %v2594_v31 }
 0x2ae   :  { %v2561_v38 = vpop.f32.mrf.mxu0  ;;  %v2304_v55 = vpop.f32.mrf.mxu1 }
 0x2af   :  { %v2595_v8 = vadd.f32 %v2561_v38, %v2330_v54  ;;  %v2919_v59 = vadd.f32 %v2918_v39, %v2769_v22  ;;  %v2951_v37 = vmul.f32 %v2769_v22, %v2769_v22 }
 0x2b0   :  { %v4138_v16 = vpop.f32.mrf.mxu0  ;;  %v4074_v28 = vpop.f32.mrf.mxu1 }
 0x2b1   :  { %v2770_v60 = vmul.f32 %v2740_v34, %v2595_v8  ;;  %v2975_v15 = vadd.f32 %v2974_v50, %v2951_v37 }
 0x2b2   :  { %v2566_v17 = vpop.f32.mrf.mxu0 }
 0x2b3   :  { %v3329_v57 = vpack.c.bf16 %v2770_v60, %v2769_v22  ;;  %v2920_v0 = vadd.f32 %v2919_v59, %v2770_v60  ;;  %v2952_v7 = vmul.f32 %v2770_v60, %v2770_v60  ;;  %v2596_v51 = vadd.f32 %v2566_v17, %v2331_v1 }
 0x2b4   :  { %v4141_v12 = vpop.f32.mrf.mxu0 }
 0x2b5   :  { %3341 = vst [vmem:[%s5756_s4 + $0x58] sm:$0xff] %v3329_v57   ;;  %v2976_v25 = vadd.f32 %v2975_v15, %v2952_v7  ;;  %v2771_v61 = vmul.f32 %v2745_v19, %v2596_v51 }
 0x2b6   :  { %v2569_v46 = vpop.f32.mrf.mxu0 }
 0x2b7   :  { %v3270_v35 = vpack.c.bf16 %v2771_v61, %v2771_v61  ;;  %v2921_v49 = vadd.f32 %v2920_v0, %v2771_v61  ;;  %v2953_v29 = vmul.f32 %v2771_v61, %v2771_v61 }
 0x2b8   :  { %v4142_v11 = vpop.f32.mrf.mxu0 }
 0x2b9   :  { %2897 = vst [vmem:[%s5756_s4 + $0x60] sm:$0xf] %v3270_v35  ;;  %v2922_v9 = vrot.slane %v2921_v49, 4  ;;  %v2977_v2 = vadd.f32 %v2976_v25, %v2953_v29 }
 0x2bb   :  { %v2923_v4 = vadd.f32 %v2922_v9, %v2921_v49  ;;  %v2978_v3 = vrot.slane %v2977_v2, 4 }
 0x2bd   :  { %v2924_v26 = vrot.slane %v2923_v4, 2  ;;  %v2979_v45 = vadd.f32 %v2978_v3, %v2977_v2 }
 0x2bf   :  { %v2925_v24 = vadd.f32 %v2924_v26, %v2923_v4  ;;  %v2980_v14 = vrot.slane %v2979_v45, 2 }
 0x2c1   :  { %v2926_v5 = vrot.slane %v2925_v24, 1  ;;  %v2981_v6 = vadd.f32 %v2980_v14, %v2979_v45 }
 0x2c3   :  { %v2927_v41 = vadd.f32 %v2926_v5, %v2925_v24  ;;  %v2982_v56 = vrot.slane %v2981_v6, 1 }
 0x2c5   :  { %2928 = vst [vmem:[%s5757_s5] sm:$0xff] %v2927_v41  ;;  %v2983_v58 = vadd.f32 %v2982_v56, %v2981_v6 }
 0x2c7   :  { %2984 = vst [vmem:[%s5758_s6] sm:$0xff] %v2983_v58 }

</bundles_post_ra>
